<compile_context>
chip_gen: v7x
topology: tpu7x:2x2x1
jax: 0.10.0
libtpu: 0.0.40
codegen_flags: <defaults>
</compile_context>

<pallas_src>
import functools

import jax
import jax.numpy as jnp
from jax import lax
from jax.experimental import pallas as pl
from jax.experimental.pallas import tpu as pltpu


_INV_SQRT2 = 0.7071067811865476
_SLAB = 256   # transform-epilogue row slab (bounds f32 intermediates in VMEM)


def _erf_approx(x):
    # Abramowitz & Stegun 7.1.26 polynomial erf (max abs err ~1.5e-7, i.e.
    # f32-indistinguishable from exact erf); lowers to plain VPU/EUP ops.
    a1, a2, a3, a4, a5 = (0.254829592, -0.284496736, 1.421413741,
                          -1.453152027, 1.061405429)
    p = 0.3275911
    sign = jnp.where(x >= 0.0, 1.0, -1.0)
    ax = jnp.abs(x)
    t = 1.0 / (1.0 + p * ax)
    poly = t * (a1 + t * (a2 + t * (a3 + t * (a4 + t * a5))))
    return sign * (1.0 - poly * jnp.exp(-ax * ax))


def _gelu_exact(x):
    # Matches torch.nn.functional.gelu default (erf form) == HF ACT2FN["gelu"].
    return 0.5 * x * (1.0 + _erf_approx(x * _INV_SQRT2))


def mlm_head_kernel(x_ref, w1_ref, p_ref, w2_ref, b2_ref, o_ref, t_ref, *, eps):
    j = pl.program_id(1)   # vocab-tile index (innermost, sequential)

    @pl.when(j == 0)
    def _():
        # --- BertPredictionHeadTransform (computed once per token tile) ---
        # Chunked over _SLAB-row slabs so the (slab, H) f32 temporaries stay
        # small regardless of how big tm is.
        hdim = w1_ref.shape[1]
        n_slabs = t_ref.shape[0] // _SLAB
        b1v = p_ref[0:1, :]        # dense bias
        gamma = p_ref[1:2, :]      # LN weight
        beta = p_ref[2:3, :]       # LN bias

        def slab_body(s, carry):
            r0 = pl.multiple_of(s * _SLAB, _SLAB)
            h = jnp.dot(x_ref[pl.ds(r0, _SLAB), :], w1_ref[...],
                        preferred_element_type=jnp.float32)   # (_SLAB, H) f32
            h = h + b1v
            h = _gelu_exact(h)
            # LayerNorm over the hidden dim (f32).  Clamp the one-pass
            # variance so near-constant rows (incl. zero-padded token rows)
            # can't go slightly negative and NaN under rsqrt.
            mean = jnp.sum(h, axis=-1, keepdims=True) * (1.0 / hdim)
            var = jnp.sum(h * h, axis=-1, keepdims=True) * (1.0 / hdim) - mean * mean
            var = jnp.maximum(var, 0.0)
            inv = lax.rsqrt(var + eps)
            out = (h - mean) * inv * gamma + beta
            t_ref[pl.ds(r0, _SLAB), :] = out.astype(t_ref.dtype)  # bf16 scratch
            return carry

        lax.fori_loop(0, n_slabs, slab_body, 0)

    # --- decoder: (tm, H) @ (H, tv) + vocab bias (bf16 MXU, f32 accumulate) ---
    logits = jnp.dot(t_ref[...], w2_ref[...], preferred_element_type=jnp.float32)
    logits = logits + b2_ref[...]
    o_ref[...] = logits.astype(o_ref.dtype)


def _round_up(x, m):
    return ((x + m - 1) // m) * m


def _select_tiles(tm, tv, vmem_limit_bytes):
    """Per-generation defaults: maximize the token tile (arithmetic intensity
    vs the streamed decoder weight ~= tm FLOP/byte) within the VMEM budget."""
    if tm is not None and tv is not None and vmem_limit_bytes is not None:
        return tm, tv, vmem_limit_bytes
    vmem_cap = None
    try:
        vmem_cap = int(pltpu.get_tpu_info().vmem_capacity_bytes)
    except Exception:
        vmem_cap = None
    if vmem_cap is not None and vmem_cap >= 100 * (1 << 20):
        # v5e / v6e class: 128 MiB physical VMEM -> big vocab tile too.
        d_tm, d_tv, d_lim = 2048, 1024, 96 * (1 << 20)
    else:
        # v7x (64 MiB per TensorCore) or unknown chip: conservative budget.
        d_tm, d_tv, d_lim = 2048, 512, 48 * (1 << 20)
    if vmem_cap is not None:
        d_lim = min(d_lim, (vmem_cap * 3) // 4)   # always leave headroom
    return (tm if tm is not None else d_tm,
            tv if tv is not None else d_tv,
            vmem_limit_bytes if vmem_limit_bytes is not None else d_lim)


def prepare_mlm_head_params(w1, b1, gamma, beta, w2, b2):
    """One-time parameter preprocessing — call at weight-load time and CACHE,
    so the forward path does no full-size weight cast/pad HBM passes.
       w1: (H, H) transform dense weight stored as W^T (in, out)
       b1, gamma, beta: (H,)
       w2: (H, V) decoder weight stored as W^T; b2: (V,) decoder bias."""
    w1_bf = w1.astype(jnp.bfloat16)
    params = jnp.stack([b1, gamma, beta]).astype(jnp.float32)   # (3, H)
    w2_bf = w2.astype(jnp.bfloat16)
    b2_2d = b2.astype(jnp.float32).reshape(1, -1)               # (1, V)
    return w1_bf, params, w2_bf, b2_2d


def bert_only_mlm_head(sequence_output, prepared_params, *, eps=1e-12,
                       tm=None, tv=None, vmem_limit_bytes=None, out_dtype=None):
    """sequence_output: (B, S, H) -> prediction scores (B, S, V).
    Pass out_dtype=jnp.bfloat16 to halve logit writeback traffic if the
    downstream loss tolerates it."""
    w1_bf, params, w2_bf, b2_2d = prepared_params
    B, S, H = sequence_output.shape
    V = w2_bf.shape[1]
    M = B * S
    if out_dtype is None:
        out_dtype = sequence_output.dtype

    tm, tv, vmem_limit_bytes = _select_tiles(tm, tv, vmem_limit_bytes)
    # Tile alignment: tm multiple of the transform slab (and MXU friendly),
    # tv multiple of 128 (lane-dense stores); clamp for small problems.
    tm = min(_round_up(tm, _SLAB), _round_up(M, _SLAB))
    tv = min(_round_up(tv, 128), _round_up(V, 128))

    grid_m = pl.cdiv(M, tm)
    grid_v = pl.cdiv(V, tv)
    M_pad = grid_m * tm

    # bf16 MXU activations.  Only the cheap (M, H) activation tensor is ever
    # padded; weights and the (M, V) logits stay unpadded.
    x2d = sequence_output.reshape(M, H).astype(jnp.bfloat16)
    if M_pad != M:
        x2d = jnp.pad(x2d, ((0, M_pad - M), (0, 0)))

    kernel = functools.partial(mlm_head_kernel, eps=eps)

    out = pl.pallas_call(
        kernel,
        out_shape=jax.ShapeDtypeStruct((M_pad, V), out_dtype),
        grid_spec=pltpu.PrefetchScalarGridSpec(
            num_scalar_prefetch=0,
            grid=(grid_m, grid_v),
            in_specs=[
                pl.BlockSpec((tm, H), lambda i, j: (i, 0)),   # token tile
                # Resident operands (constant index map).
                # TODO(synk): pipeline_mode=pl.Buffered(1) on these two would
                # drop their redundant second pipeline buffer (~H*H*2 bytes).
                pl.BlockSpec((H, H), lambda i, j: (0, 0)),    # transform W
                pl.BlockSpec((3, H), lambda i, j: (0, 0)),    # b1/gamma/beta
                # Streamed decoder weight / bias tiles (change every j step).
                pl.BlockSpec((H, tv), lambda i, j: (0, j)),
                pl.BlockSpec((1, tv), lambda i, j: (0, j)),
            ],
            out_specs=pl.BlockSpec((tm, tv), lambda i, j: (i, j)),
            scratch_shapes=[pltpu.VMEM((tm, H), jnp.bfloat16)],  # transformed tile
        ),
        compiler_params=pltpu.CompilerParams(
            # Token axis parallel (megacore on v7x), vocab axis sequential so
            # the pl.when(j==0) transform + scratch reuse stays correct.
            dimension_semantics=("parallel", "arbitrary"),
            vmem_limit_bytes=vmem_limit_bytes,
        ),
    )(x2d, w1_bf, params, w2_bf, b2_2d)

    # Vocab dim is never padded or sliced.  Token dim is only sliced when M is
    # not a multiple of tm (pick tm | M in production to make this a no-op).
    if M_pad != M:
        out = out[:M]
    return out.reshape(B, S, V)


def reference(x, w1, b1, gamma, beta, w2, b2, eps=1e-12):
    h = jnp.einsum("bsh,hk->bsk", x, w1) + b1
    h = 0.5 * h * (1.0 + lax.erf(h * _INV_SQRT2))
    mean = jnp.mean(h, axis=-1, keepdims=True)
    var = jnp.mean((h - mean) ** 2, axis=-1, keepdims=True)
    h = (h - mean) * lax.rsqrt(var + eps) * gamma + beta
    return jnp.einsum("bsh,hv->bsv", h, w2) + b2


if __name__ == "__main__":
    # Small BERT-like config
    batch, seq = 2, 8
    hidden_size = 128            # config.hidden_size
    vocab_size = 512             # config.vocab_size
    eps = 1e-12                  # config.layer_norm_eps
    # TODO(synk): config.hidden_act assumed "gelu" (exact erf form), the HF default.

    key = jax.random.PRNGKey(0)
    k1, k2, k3, k4, k5 = jax.random.split(key, 5)

    sequence_output = jax.random.normal(
        k1, (batch, seq, hidden_size), dtype=jnp.float32)
    # Linear weights stored as (in, out) = W^T
    w1 = jax.random.normal(k2, (hidden_size, hidden_size), dtype=jnp.float32) * 0.02
    b1 = jax.random.normal(k3, (hidden_size,), dtype=jnp.float32) * 0.02
    gamma = jnp.ones((hidden_size,), dtype=jnp.float32)
    beta = jnp.zeros((hidden_size,), dtype=jnp.float32)
    w2 = jax.random.normal(k4, (hidden_size, vocab_size), dtype=jnp.float32) * 0.02
    b2 = jax.random.normal(k5, (vocab_size,), dtype=jnp.float32) * 0.02

    # One-time weight preprocessing (hoisted out of the forward path).
    prepared = prepare_mlm_head_params(w1, b1, gamma, beta, w2, b2)

    out = bert_only_mlm_head(sequence_output, prepared, eps=eps)
    out = jax.block_until_ready(out)

    ref = reference(sequence_output, w1, b1, gamma, beta, w2, b2, eps)
    assert out.shape == (batch, seq, vocab_size)
    max_err = float(jnp.max(jnp.abs(out - ref)))
    assert jnp.allclose(out, ref, atol=5e-2, rtol=5e-2), f"max abs err {max_err}"

    print("KERNEL_OK")
</pallas_src>

<mosaic_0001>
module attributes {stable_mosaic.version = 11 : i64} {
  func.func @mlm_head_kernel(%arg0: i32, %arg1: i32, %arg2: memref<256x128xbf16, #tpu.memory_space<vmem>>, %arg3: memref<128x128xbf16, #tpu.memory_space<vmem>>, %arg4: memref<3x128xf32, #tpu.memory_space<vmem>>, %arg5: memref<128x512xbf16, #tpu.memory_space<vmem>>, %arg6: memref<1x512xf32, #tpu.memory_space<vmem>>, %arg7: memref<256x512xf32, #tpu.memory_space<vmem>>, %arg8: memref<256x128xbf16, #tpu.memory_space<vmem>>) attributes {dimension_semantics = [#tpu.dimension_semantics<parallel>, #tpu.dimension_semantics<arbitrary>], iteration_bounds = array<i64: 1, 1>, scalar_prefetch = 0 : i64, scratch_operands = 1 : i64, tpu.core_type = #tpu.core_type<tc>, window_params = [{transform_indices = @transform_0, window_bounds = array<i64: 256, 128>}, {pipeline_mode = #tpu.pipeline_mode<synchronous>, transform_indices = @transform_1, window_bounds = array<i64: 128, 128>}, {pipeline_mode = #tpu.pipeline_mode<synchronous>, transform_indices = @transform_2, window_bounds = array<i64: 3, 128>}, {transform_indices = @transform_3, window_bounds = array<i64: 128, 512>}, {transform_indices = @transform_4, window_bounds = array<i64: 1, 512>}, {transform_indices = @transform_5, window_bounds = array<i64: 256, 512>}]} {
    %c0_i32 = arith.constant 0 : i32
    %0 = arith.cmpi eq, %arg1, %c0_i32 : i32
    %1 = arith.extui %0 : i1 to i32
    %c0_i32_0 = arith.constant 0 : i32
    %2 = arith.cmpi ne, %1, %c0_i32_0 : i32
    scf.if %2 {
      %c0_8 = arith.constant 0 : index
      %c0_9 = arith.constant 0 : index
      %10 = vector.load %arg4[%c0_8, %c0_9] : memref<3x128xf32, #tpu.memory_space<vmem>>, vector<1x128xf32>
      %c1 = arith.constant 1 : index
      %c0_10 = arith.constant 0 : index
      %11 = vector.load %arg4[%c1, %c0_10] : memref<3x128xf32, #tpu.memory_space<vmem>>, vector<1x128xf32>
      %c2 = arith.constant 2 : index
      %c0_11 = arith.constant 0 : index
      %12 = vector.load %arg4[%c2, %c0_11] : memref<3x128xf32, #tpu.memory_space<vmem>>, vector<1x128xf32>
      %c0_i32_12 = arith.constant 0 : i32
      %c256_i32 = arith.constant 256 : i32
      %13 = arith.muli %c0_i32_12, %c256_i32 : i32
      %14 = tpu.assume_multiple %13, 256 : i32
      %15 = arith.index_cast %14 : i32 to index
      %c0_13 = arith.constant 0 : index
      %16 = vector.load %arg2[%15, %c0_13] : memref<256x128xbf16, #tpu.memory_space<vmem>>, vector<256x128xbf16>
      %c0_14 = arith.constant 0 : index
      %c0_15 = arith.constant 0 : index
      %17 = vector.load %arg3[%c0_14, %c0_15] : memref<128x128xbf16, #tpu.memory_space<vmem>>, vector<128x128xbf16>
      %cst_16 = arith.constant dense<0.000000e+00> : vector<256x128xf32>
      %18 = tpu.matmul %16, %17, %cst_16 {dimension_numbers = #tpu.dot_dimension_numbers<[1], [0], [0], [1], [0, 0, 1, 1], [], []>} : vector<256x128xbf16>, vector<128x128xbf16>, vector<256x128xf32> -> vector<256x128xf32>
      %19 = vector.broadcast %10 : vector<1x128xf32> to vector<256x128xf32>
      %20 = arith.addf %18, %19 : vector<256x128xf32>
      %cst_17 = arith.constant 5.000000e-01 : f32
      %21 = vector.broadcast %cst_17 : f32 to vector<256x128xf32>
      %22 = arith.mulf %21, %20 : vector<256x128xf32>
      %cst_18 = arith.constant 0.707106769 : f32
      %23 = vector.broadcast %cst_18 : f32 to vector<256x128xf32>
      %24 = arith.mulf %20, %23 : vector<256x128xf32>
      %cst_19 = arith.constant 0.000000e+00 : f32
      %25 = vector.broadcast %cst_19 : f32 to vector<256x128xf32>
      %26 = arith.cmpf oge, %24, %25 : vector<256x128xf32>
      %cst_20 = arith.constant 1.000000e+00 : f32
      %cst_21 = arith.constant -1.000000e+00 : f32
      %27 = vector.broadcast %cst_20 : f32 to vector<256x128xf32>
      %28 = vector.broadcast %cst_21 : f32 to vector<256x128xf32>
      %29 = arith.select %26, %27, %28 : vector<256x128xi1>, vector<256x128xf32>
      %30 = math.absf %24 : vector<256x128xf32>
      %cst_22 = arith.constant 0.327591091 : f32
      %31 = vector.broadcast %cst_22 : f32 to vector<256x128xf32>
      %32 = arith.mulf %31, %30 : vector<256x128xf32>
      %cst_23 = arith.constant 1.000000e+00 : f32
      %33 = vector.broadcast %cst_23 : f32 to vector<256x128xf32>
      %34 = arith.addf %33, %32 : vector<256x128xf32>
      %cst_24 = arith.constant 1.000000e+00 : f32
      %35 = vector.broadcast %cst_24 : f32 to vector<256x128xf32>
      %36 = arith.divf %35, %34 : vector<256x128xf32>
      %cst_25 = arith.constant 1.06140542 : f32
      %37 = vector.broadcast %cst_25 : f32 to vector<256x128xf32>
      %38 = arith.mulf %36, %37 : vector<256x128xf32>
      %cst_26 = arith.constant -1.45315206 : f32
      %39 = vector.broadcast %cst_26 : f32 to vector<256x128xf32>
      %40 = arith.addf %39, %38 : vector<256x128xf32>
      %41 = arith.mulf %36, %40 : vector<256x128xf32>
      %cst_27 = arith.constant 1.42141378 : f32
      %42 = vector.broadcast %cst_27 : f32 to vector<256x128xf32>
      %43 = arith.addf %42, %41 : vector<256x128xf32>
      %44 = arith.mulf %36, %43 : vector<256x128xf32>
      %cst_28 = arith.constant -0.284496725 : f32
      %45 = vector.broadcast %cst_28 : f32 to vector<256x128xf32>
      %46 = arith.addf %45, %44 : vector<256x128xf32>
      %47 = arith.mulf %36, %46 : vector<256x128xf32>
      %cst_29 = arith.constant 0.254829586 : f32
      %48 = vector.broadcast %cst_29 : f32 to vector<256x128xf32>
      %49 = arith.addf %48, %47 : vector<256x128xf32>
      %50 = arith.mulf %36, %49 : vector<256x128xf32>
      %cst_30 = arith.constant 0.000000e+00 : f32
      %51 = vector.broadcast %cst_30 : f32 to vector<256x128xf32>
      %52 = arith.subf %51, %30 : vector<256x128xf32>
      %53 = arith.mulf %52, %30 : vector<256x128xf32>
      %54 = math.exp %53 : vector<256x128xf32>
      %55 = arith.mulf %50, %54 : vector<256x128xf32>
      %cst_31 = arith.constant 1.000000e+00 : f32
      %56 = vector.broadcast %cst_31 : f32 to vector<256x128xf32>
      %57 = arith.subf %56, %55 : vector<256x128xf32>
      %58 = arith.mulf %29, %57 : vector<256x128xf32>
      %cst_32 = arith.constant 1.000000e+00 : f32
      %59 = vector.broadcast %cst_32 : f32 to vector<256x128xf32>
      %60 = arith.addf %59, %58 : vector<256x128xf32>
      %61 = arith.mulf %22, %60 : vector<256x128xf32>
      %cst_33 = arith.constant dense<0.000000e+00> : vector<256xf32>
      %62 = vector.multi_reduction <add>, %61, %cst_33 [1] : vector<256x128xf32> to vector<256xf32>
      %63 = vector.shape_cast %62 : vector<256xf32> to vector<256x1xf32>
      %cst_34 = arith.constant 7.812500e-03 : f32
      %64 = vector.broadcast %cst_34 : f32 to vector<256x1xf32>
      %65 = arith.mulf %63, %64 : vector<256x1xf32>
      %66 = arith.mulf %61, %61 : vector<256x128xf32>
      %cst_35 = arith.constant dense<0.000000e+00> : vector<256xf32>
      %67 = vector.multi_reduction <add>, %66, %cst_35 [1] : vector<256x128xf32> to vector<256xf32>
      %68 = vector.shape_cast %67 : vector<256xf32> to vector<256x1xf32>
      %cst_36 = arith.constant 7.812500e-03 : f32
      %69 = vector.broadcast %cst_36 : f32 to vector<256x1xf32>
      %70 = arith.mulf %68, %69 : vector<256x1xf32>
      %71 = arith.mulf %65, %65 : vector<256x1xf32>
      %72 = arith.subf %70, %71 : vector<256x1xf32>
      %cst_37 = arith.constant 0.000000e+00 : f32
      %73 = vector.broadcast %cst_37 : f32 to vector<256x1xf32>
      %74 = arith.maximumf %72, %73 : vector<256x1xf32>
      %cst_38 = arith.constant 9.99999996E-13 : f32
      %75 = vector.broadcast %cst_38 : f32 to vector<256x1xf32>
      %76 = arith.addf %74, %75 : vector<256x1xf32>
      %77 = math.rsqrt %76 : vector<256x1xf32>
      %78 = vector.broadcast %65 : vector<256x1xf32> to vector<256x128xf32>
      %79 = arith.subf %61, %78 : vector<256x128xf32>
      %80 = vector.broadcast %77 : vector<256x1xf32> to vector<256x128xf32>
      %81 = arith.mulf %79, %80 : vector<256x128xf32>
      %82 = vector.broadcast %11 : vector<1x128xf32> to vector<256x128xf32>
      %83 = arith.mulf %81, %82 : vector<256x128xf32>
      %84 = vector.broadcast %12 : vector<1x128xf32> to vector<256x128xf32>
      %85 = arith.addf %83, %84 : vector<256x128xf32>
      %86 = arith.truncf %85 : vector<256x128xf32> to vector<256x128xbf16>
      %87 = arith.index_cast %14 : i32 to index
      %c0_39 = arith.constant 0 : index
      %88 = vector.load %arg8[%87, %c0_39] : memref<256x128xbf16, #tpu.memory_space<vmem>>, vector<256x128xbf16>
      tpu.vector_store %arg8[%87, %c0_39], %86 {strides = array<i32>} : memref<256x128xbf16, #tpu.memory_space<vmem>>, vector<256x128xbf16>,
      %c1_i32 = arith.constant 1 : i32
    } else {
    }
    %c0 = arith.constant 0 : index
    %c0_1 = arith.constant 0 : index
    %3 = vector.load %arg8[%c0, %c0_1] : memref<256x128xbf16, #tpu.memory_space<vmem>>, vector<256x128xbf16>
    %c0_2 = arith.constant 0 : index
    %c0_3 = arith.constant 0 : index
    %4 = vector.load %arg5[%c0_2, %c0_3] : memref<128x512xbf16, #tpu.memory_space<vmem>>, vector<128x512xbf16>
    %cst = arith.constant dense<0.000000e+00> : vector<256x512xf32>
    %5 = tpu.matmul %3, %4, %cst {dimension_numbers = #tpu.dot_dimension_numbers<[1], [0], [0], [1], [0, 0, 1, 1], [], []>} : vector<256x128xbf16>, vector<128x512xbf16>, vector<256x512xf32> -> vector<256x512xf32>
    %c0_4 = arith.constant 0 : index
    %c0_5 = arith.constant 0 : index
    %6 = vector.load %arg6[%c0_4, %c0_5] : memref<1x512xf32, #tpu.memory_space<vmem>>, vector<1x512xf32>
    %7 = vector.broadcast %6 : vector<1x512xf32> to vector<256x512xf32>
    %8 = arith.addf %5, %7 : vector<256x512xf32>
    %c0_6 = arith.constant 0 : index
    %c0_7 = arith.constant 0 : index
    %9 = vector.load %arg7[%c0_6, %c0_7] : memref<256x512xf32, #tpu.memory_space<vmem>>, vector<256x512xf32>
    tpu.vector_store %arg7[%c0_6, %c0_7], %8 {strides = array<i32>} : memref<256x512xf32, #tpu.memory_space<vmem>>, vector<256x512xf32>,
    return
  }
  func.func @transform_0(%arg0: i32, %arg1: i32) -> (i32, i32) {
    %c0_i32 = arith.constant 0 : i32
    %c0_i32_0 = arith.constant 0 : i32
    return %arg0, %c0_i32 : i32, i32
  }
  func.func @transform_1(%arg0: i32, %arg1: i32) -> (i32, i32) {
    %c0_i32 = arith.constant 0 : i32
    %c0_i32_0 = arith.constant 0 : i32
    %c0_i32_1 = arith.constant 0 : i32
    return %c0_i32, %c0_i32_0 : i32, i32
  }
  func.func @transform_2(%arg0: i32, %arg1: i32) -> (i32, i32) {
    %c0_i32 = arith.constant 0 : i32
    %c0_i32_0 = arith.constant 0 : i32
    %c0_i32_1 = arith.constant 0 : i32
    return %c0_i32, %c0_i32_0 : i32, i32
  }
  func.func @transform_3(%arg0: i32, %arg1: i32) -> (i32, i32) {
    %c0_i32 = arith.constant 0 : i32
    %c0_i32_0 = arith.constant 0 : i32
    return %c0_i32, %arg1 : i32, i32
  }
  func.func @transform_4(%arg0: i32, %arg1: i32) -> (i32, i32) {
    %c0_i32 = arith.constant 0 : i32
    %c0_i32_0 = arith.constant 0 : i32
    return %c0_i32, %arg1 : i32, i32
  }
  func.func @transform_5(%arg0: i32, %arg1: i32) -> (i32, i32) {
    %c0_i32 = arith.constant 0 : i32
    return %arg0, %arg1 : i32, i32
  }
}

</mosaic_0001>

<bundles_post_ra>
// kernel: tpu_custom_call.1
= control target key start
LH: loop header
LB: loop body
LE: loop exit
PB: predicated region body
PF: predicated region fallthrough
CT: control target
= control target key end

     0   :  { %10 = vsyncpa [#allocation4], 0  ;;  %s4554_s0 = inlined_call_operand.hbm [shape: bf16[256,128], index: 0, kind: input, shape index: {}]   ;;  %s4555_s1 = inlined_call_operand.hbm [shape: bf16[128,128], index: 1, kind: input, shape index: {}]   ;;  %s4556_s2 = inlined_call_operand.vmem [shape: f32[3,128], index: 2, kind: input, shape index: {}]   ;;  %s4557_s3 = inlined_call_operand.hbm [shape: bf16[128,512], index: 3, kind: input, shape index: {}]   ;;  %s4558_s4 = inlined_call_operand.vmem [shape: f32[1,512], index: 4, kind: input, shape index: {}]   ;;  %s4559_s5 = inlined_call_operand.hbm [shape: f32[256,512], index: 5, kind: output, shape index: {}]  }
   0x1   :  { %11 = vsyncpa [#allocation7], 0 }
   0x2   :  { %12 = vsyncpa [#allocation5], 0  ;;  %s3122_s18 = smov [#allocation6]   ;;  %s3123_s20 = smov [#allocation3]  }
   0x3   :  { %s30_s19 = sshll.u32 %s3122_s18, 4  ;;  %s18_s21 = sshll.u32 %s3123_s20, 4  ;;  %s31_s19 = int_to_ptr.vmem [resolvable:$true] %s30_s19  ;;  %s3164_s21 = int_to_ptr.vmem [resolvable:$true] %s18_s21 }
   0x4   :  { %s3028_s24 = scalar_lea.hbm %s4555_s1, 1024 }
   0x5   :  { %p3029_p0 = scmp.ne.s32.totalorder %s4555_s1, %s3028_s24  ;;  %p3032_p1 = scmp.lt.u32.totalorder %s3028_s24, %s4555_s1 }
   0x7   :  { %p3034_p2 = pnand %p3032_p1, %p3029_p0 }
   0x9   :  { %3037 = shalt.err (!%p3034_p2)
}
   0xa   :  { %s3038_s29 = scalar_lea.vmem %s31_s19, 1024  ;;  %p3043_p4 = scmp.lt.s32.totalorder %s31_s19, %s31_s19 }
   0xb   :  { %p3039_p3 = scmp.ne.s32.totalorder %s31_s19, %s3038_s29  ;;  %p3044_p5 = scmp.lt.s32.totalorder %s3038_s29, %s3038_s29 }
   0xd   :  { %p3045_p6 = por %p3044_p5, %p3043_p4 }
   0xf   :  { %p3046_p7 = pnand %p3045_p6, %p3039_p3 }
  0x11   :  { %3049 = shalt.err (!%p3046_p7)
}
  0x12   :  { %s3124_s30 = smov 64   ;;  %s3125_s6 = smov 4  }
  0x13   :  { %36 = dma.hbm_to_vmem [thread:$0]  %s4555_s1, 1024, %s31_s19, [#allocation7], %s3124_s30, %s3124_s30, %s3125_s6  }
  0x14   :  { %s3050_s11 = scalar_lea.hbm %s4554_s0, 2048 }
  0x15   :  { %p3051_p8 = scmp.ne.s32.totalorder %s4554_s0, %s3050_s11  ;;  %p3054_p9 = scmp.lt.u32.totalorder %s3050_s11, %s4554_s0 }
  0x17   :  { %p3056_p10 = pnand %p3054_p9, %p3051_p8 }
  0x19   :  { %3059 = shalt.err (!%p3056_p10)
}
  0x1a   :  { %s3060_s16 = scalar_lea.vmem %s3164_s21, 2048  ;;  %p3065_p12 = scmp.lt.s32.totalorder %s3164_s21, %s3164_s21 }
  0x1b   :  { %p3061_p11 = scmp.ne.s32.totalorder %s3164_s21, %s3060_s16  ;;  %p3066_p13 = scmp.lt.s32.totalorder %s3060_s16, %s3060_s16 }
  0x1d   :  { %p3067_p0 = por %p3066_p13, %p3065_p12 }
  0x1f   :  { %p3068_p1 = pnand %p3067_p0, %p3061_p11 }
  0x21   :  { %3071 = shalt.err (!%p3068_p1)
}
  0x22   :  { %24 = dma.hbm_to_vmem [thread:$0]  %s4554_s0, 2048, %s3164_s21, [#allocation4], %s3124_s30, %s3124_s30, %s3125_s6  }
  0x23   :  { %s3126_s18 = smov [#allocation8]   ;;  %s3072_s23 = scalar_lea.hbm %s4557_s3, 4096 }
  0x24   :  { %s44_s19 = sshll.u32 %s3126_s18, 4  ;;  %p3073_p2 = scmp.ne.s32.totalorder %s4557_s3, %s3072_s23  ;;  %s45_s19 = int_to_ptr.vmem [resolvable:$true] %s44_s19 }
  0x25   :  { %p3076_p3 = scmp.lt.u32.totalorder %s3072_s23, %s4557_s3 }
  0x27   :  { %p3078_p4 = pnand %p3076_p3, %p3073_p2 }
  0x29   :  { %3081 = shalt.err (!%p3078_p4)
}
  0x2a   :  { %s3082_s28 = scalar_lea.vmem %s45_s19, 4096  ;;  %p3087_p6 = scmp.lt.s32.totalorder %s45_s19, %s45_s19 }
  0x2b   :  { %p3083_p5 = scmp.ne.s32.totalorder %s45_s19, %s3082_s28  ;;  %p3088_p7 = scmp.lt.s32.totalorder %s3082_s28, %s3082_s28 }
  0x2d   :  { %p3089_p8 = por %p3088_p7, %p3087_p6 }
  0x2f   :  { %p3090_p9 = pnand %p3089_p8, %p3083_p5 }
  0x31   :  { %3093 = shalt.err (!%p3090_p9)
}
  0x32   :  { %s3127_s0 = smov 256   ;;  %s3128_s21 = smov 16  }
  0x33   :  { %50 = dma.hbm_to_vmem [thread:$0]  %s4557_s3, 4096, %s45_s19, [#allocation7], %s3127_s0, %s3127_s0, %s3128_s21  }
  0x34   :  { %3116 = dma.done.wait [#allocation4], 2048  }
  0x35   :  { %3117 = vsyncadd [#allocation4], 4294965248 }
  0x36   :  { %3118 = dma.done.wait [#allocation7], 5120  }
  0x37   :  { %3119 = vsyncadd [#allocation7], 4294962176  ;;  %v2764_v0 = vld [vmem:[#allocation6] sm:$0xff]   ;;  %v2765_v1 = vld [vmem:[#allocation6 + $0x8] sm:$0xff]  }
  0x38   :  { %2688 = vmatprep.subr.bf16.mxu0 %v2764_v0  ;;  %2736 = vmatprep.subr.bf16.mxu1 %v2764_v0  ;;  %v2766_v2 = vld [vmem:[#allocation6 + $0x10] sm:$0xff]   ;;  %v2767_v3 = vld [vmem:[#allocation6 + $0x18] sm:$0xff]   ;;  %v2772_v4 = vld [vmem:[#allocation3] sm:$0xff]  }
  0x39   :  { %2689 = vmatpush3.bf16.msra.mxu0 %v2764_v0  ;;  %2744 = vmatpush3.bf16.msra.mxu1 %v2764_v0  ;;  %v2768_v5 = vld [vmem:[#allocation6 + $0x20] sm:$0xff]   ;;  %v2769_v7 = vld [vmem:[#allocation6 + $0x28] sm:$0xff]   ;;  %v2770_v8 = vld [vmem:[#allocation6 + $0x30] sm:$0xff]  }
  0x3a   :  { %2690 = vmatprep.subr.bf16.mxu0 %v2765_v1  ;;  %2737 = vmatprep.subr.bf16.mxu1 %v2765_v1  ;;  %v2778_v6 = vld [vmem:[#allocation3 + $0x40] sm:$0xff]   ;;  %v2771_v9 = vld [vmem:[#allocation6 + $0x38] sm:$0xff]   ;;  %v2773_v10 = vld [vmem:[#allocation3 + $0x8] sm:$0xff]  }
  0x3b   :  { %2704 = vmatprep.mubr.bf16.mxu0 %v2772_v4  ;;  %2720 = vmatprep.mubr.bf16.mxu1 %v2778_v6  ;;  %v2779_v11 = vld [vmem:[#allocation3 + $0x48] sm:$0xff]   ;;  %v2774_v12 = vld [vmem:[#allocation3 + $0x10] sm:$0xff]   ;;  %v2775_v14 = vld [vmem:[#allocation3 + $0x18] sm:$0xff]  }
  0x3c   :  { %v2782_v13 = vld [vmem:[#allocation3 + $0x50] sm:$0xff]   ;;  %v2783_v15 = vld [vmem:[#allocation3 + $0x58] sm:$0xff]   ;;  %v2776_v16 = vld [vmem:[#allocation3 + $0x20] sm:$0xff]  }
  0x3d   :  { %2691 = vmatpush3.bf16.msra.mxu0 %v2765_v1  ;;  %2745 = vmatpush3.bf16.msra.mxu1 %v2765_v1  ;;  %v2784_v17 = vld [vmem:[#allocation3 + $0x60] sm:$0xff]   ;;  %v2777_v18 = vld [vmem:[#allocation3 + $0x28] sm:$0xff]   ;;  %v2780_v20 = vld [vmem:[#allocation3 + $0x30] sm:$0xff]  }
  0x3e   :  { %2692 = vmatprep.subr.bf16.mxu0 %v2766_v2  ;;  %2738 = vmatprep.subr.bf16.mxu1 %v2766_v2  ;;  %v2785_v19 = vld [vmem:[#allocation3 + $0x68] sm:$0xff]   ;;  %v2786_v21 = vld [vmem:[#allocation3 + $0x70] sm:$0xff]   ;;  %v2781_v22 = vld [vmem:[#allocation3 + $0x38] sm:$0xff]  }
  0x3f   :  { %v2787_v23 = vld [vmem:[#allocation3 + $0x78] sm:$0xff]   ;;  %v3210_v24 = vld [vmem:[%s4556_s2] ss:$0 sm:$0xff] }
  0x41   :  { %2693 = vmatpush3.bf16.msra.mxu0 %v2766_v2  ;;  %2746 = vmatpush3.bf16.msra.mxu1 %v2766_v2 }
  0x42   :  { %2694 = vmatprep.subr.bf16.mxu0 %v2767_v3  ;;  %2739 = vmatprep.subr.bf16.mxu1 %v2767_v3 }
  0x45   :  { %2695 = vmatpush3.bf16.msra.mxu0 %v2767_v3  ;;  %2747 = vmatpush3.bf16.msra.mxu1 %v2767_v3 }
  0x46   :  { %2696 = vmatprep.subr.bf16.mxu0 %v2768_v5  ;;  %2740 = vmatprep.subr.bf16.mxu1 %v2768_v5 }
  0x49   :  { %2697 = vmatpush3.bf16.msra.mxu0 %v2768_v5  ;;  %2748 = vmatpush3.bf16.msra.mxu1 %v2768_v5 }
  0x4a   :  { %2698 = vmatprep.subr.bf16.mxu0 %v2769_v7  ;;  %2741 = vmatprep.subr.bf16.mxu1 %v2769_v7 }
  0x4d   :  { %2699 = vmatpush3.bf16.msra.mxu0 %v2769_v7  ;;  %2749 = vmatpush3.bf16.msra.mxu1 %v2769_v7  ;;  %v4560_v7 = vmov -1.0  }
  0x4e   :  { %2700 = vmatprep.subr.bf16.mxu0 %v2770_v8  ;;  %2742 = vmatprep.subr.bf16.mxu1 %v2770_v8 }
  0x51   :  { %2701 = vmatpush3.bf16.msra.mxu0 %v2770_v8  ;;  %2750 = vmatpush3.bf16.msra.mxu1 %v2770_v8 }
  0x52   :  { %2702 = vmatprep.subr.bf16.mxu0 %v2771_v9  ;;  %2743 = vmatprep.subr.bf16.mxu1 %v2771_v9 }
  0x55   :  { %2703 = vmatpush3.bf16.msra.mxu0 %v2771_v9  ;;  %2751 = vmatpush3.bf16.msra.mxu1 %v2771_v9 }
  0x58   :  { %2705 = vmatmul.mubr.bf16.vlgmr.msra.gmra.mrb[0].mxu0 %v2773_v10  ;;  %2721 = vmatmul.mubr.bf16.vlgmr.msra.gmra.mrb[0].mxu1 %v2779_v11 }
  0x59   :  { %2708 = vmatprep.mubr.bf16.mxu0 %v2774_v12  ;;  %2724 = vmatprep.mubr.bf16.mxu1 %v2782_v13 }
  0x60   :  { %2709 = vmatmul.mubr.bf16.gmra.mrb[4].mxu0 %v2775_v14  ;;  %2725 = vmatmul.mubr.bf16.gmra.mrb[4].mxu1 %v2783_v15 }
  0x61   :  { %2712 = vmatprep.mubr.bf16.mxu0 %v2776_v16  ;;  %2728 = vmatprep.mubr.bf16.mxu1 %v2784_v17 }
  0x68   :  { %2713 = vmatmul.mubr.bf16.gmra.mrb[8].mxu0 %v2777_v18  ;;  %2729 = vmatmul.mubr.bf16.gmra.mrb[8].mxu1 %v2785_v19 }
  0x69   :  { %2716 = vmatprep.mubr.bf16.mxu0 %v2780_v20  ;;  %2732 = vmatprep.mubr.bf16.mxu1 %v2786_v21 }
  0x70   :  { %2717 = vmatmul.mubr.bf16.gmra.mrb[12].mxu0 %v2781_v22  ;;  %2733 = vmatmul.mubr.bf16.gmra.mrb[12].mxu1 %v2787_v23 }
 0x12b   :  { %v2706_v25 = vpop.f32.mrb[0].mxu0  ;;  %v2722_v26 = vpop.f32.mrb[0].mxu1 }
 0x12c   :  { %v309_v27 = vadd.f32 %v2706_v25, %v3210_v24  ;;  %v300_v28 = vpop.f32.mrb[1].mxu0  ;;  %v3213_v29 = vpop.f32.mrb[1].mxu1  ;;  %v373_v51 = vadd.f32 %v2722_v26, %v3210_v24 }
 0x12d   :  { %v2707_v30 = vpop.f32.mrb[2].mxu0  ;;  %v3215_v31 = vpop.f32.mrb[2].mxu1  ;;  %v301_v32 = vadd.f32 %v3210_v24, %v300_v28 }
 0x12e   :  { %v303_v33 = vpop.f32.mrb[3].mxu0  ;;  %v3218_v34 = vpop.f32.mrb[3].mxu1  ;;  %v461_v35 = vmul.f32 0.70710677, %v309_v27  ;;  %v312_v36 = vadd.f32 %v2707_v30, %v3210_v24  ;;  %v3231_v54 = vmul.f32 0.5, %v309_v27  ;;  %v3233_v56 = vmul.f32 0.5, %v373_v51 }
 0x12f   :  { %v459_v37 = vmul.f32 0.70710677, %v301_v32  ;;  %v304_v42 = vadd.f32 %v3210_v24, %v303_v33  ;;  %v3235_v58 = vmul.f32 0.5, %v301_v32  ;;  %v3245_v6 = vmul.f32 0.70710677, %v373_v51 }
 0x130   :  { %v557_v38 = vand.u32 2147483647, %v461_v35  ;;  %v462_v39 = vmul.f32 0.70710677, %v312_v36  ;;  %4586 = vst [vmem:[#allocation13_spill] sm:$0xff] %v3233_v56  ;;  %vm493_vm0 = vcmp.ge.f32.partialorder %v461_v35, 0.0 }
 0x131   :  { %v555_v45 = vand.u32 2147483647, %v459_v37  ;;  %v460_v53 = vmul.f32 0.70710677, %v304_v42  ;;  %v3240_v2 = vmul.f32 0.5, %v312_v36  ;;  %v3249_v8 = vsel %vm493_vm0, 1.0, %v4560_v7 }
 0x132   :  { %v1005_v49 = vsub.f32 0.0, %v557_v38  ;;  %v558_v50 = vand.u32 2147483647, %v462_v39  ;;  %v589_v57 = vmul.f32 0.3275911, %v557_v38  ;;  %vm491_vm1 = vcmp.ge.f32.partialorder %v459_v37, 0.0 }
 0x133   :  { %v2710_v40 = vpop.f32.mrb[4].mxu0  ;;  %v3221_v41 = vpop.f32.mrb[4].mxu1  ;;  %v1003_v55 = vsub.f32 0.0, %v555_v45  ;;  %v587_v62 = vmul.f32 0.3275911, %v555_v45  ;;  %4587 = vst [vmem:[#allocation14_spill] sm:$0xff] %v3240_v2 }
 0x134   :  { %v316_v43 = vpop.f32.mrb[5].mxu0  ;;  %v3224_v44 = vpop.f32.mrb[5].mxu1  ;;  %v1037_v61 = vmul.f32 %v1005_v49, %v557_v38  ;;  %v1006_v63 = vsub.f32 0.0, %v558_v50  ;;  %v325_v0 = vadd.f32 %v2710_v40, %v3210_v24  ;;  %v556_v3 = vand.u32 2147483647, %v460_v53 }
 0x135   :  { %v2711_v46 = vpop.f32.mrb[6].mxu0  ;;  %v3226_v48 = vpop.f32.mrb[6].mxu1  ;;  %v317_v4 = vadd.f32 %v3210_v24, %v316_v43  ;;  %v1035_v9 = vmul.f32 %v1003_v55, %v555_v45  ;;  %v3251_v10 = vmul.f32 0.5, %v304_v42  ;;  %v621_v13 = vadd.f32 1.0, %v589_v57 }
 0x136   :  { %v319_v47 = vpop.f32.mrb[7].mxu0  ;;  %v3229_v52 = vpop.f32.mrb[7].mxu1  ;;  %vm494_vm2 = vcmp.ge.f32.partialorder %v462_v39, 0.0  ;;  %v590_v14 = vmul.f32 0.3275911, %v558_v50  ;;  %v328_v15 = vadd.f32 %v2711_v46, %v3210_v24  ;;  %v619_v18 = vadd.f32 1.0, %v587_v62 }
 0x137   :  { %v1071_v17 = vmul.f32 1.442695, %v1037_v61  ;;  %v1038_v19 = vmul.f32 %v1006_v63, %v558_v50  ;;  %v465_v20 = vmul.f32 0.70710677, %v325_v0  ;;  %v3261_v21 = vsel %vm491_vm1, 1.0, %v4560_v7 }
 0x138   :  { %v588_v22 = vmul.f32 0.3275911, %v556_v3  ;;  %v463_v23 = vmul.f32 0.70710677, %v317_v4  ;;  %v1067_v26 = vmul.f32 1.442695, %v1035_v9  ;;  %2836 = vrcp.f32 %v621_v13 }
 0x139   :  { %v3266_v27 = vsel %vm494_vm2, 1.0, %v4560_v7  ;;  %vm492_vm3 = vcmp.ge.f32.partialorder %v460_v53, 0.0  ;;  %v1004_v28 = vsub.f32 0.0, %v556_v3  ;;  %v622_v30 = vadd.f32 1.0, %v590_v14 }
 0x13a   :  { %v3268_v32 = vmul.f32 0.70710677, %v328_v15  ;;  %v3271_v33 = vadd.f32 %v3210_v24, %v319_v47  ;;  %2838 = vrcp.f32 %v619_v18  ;;  %v1073_v36 = vmul.f32 1.442695, %v1038_v19 }
 0x13b   :  { %v2714_v59 = vpop.f32.mrb[8].mxu0  ;;  %v3237_v60 = vpop.f32.mrb[8].mxu1  ;;  %v561_v37 = vand.u32 2147483647, %v465_v20  ;;  %v3277_v38 = vadd.f32 %v3210_v24, %v3213_v29  ;;  %2840 = vpow2.f32 %v1071_v17  ;;  %v3284_v42 = vsel %vm492_vm3, 1.0, %v4560_v7 }
 0x13c   :  { %v332_v1 = vpop.f32.mrb[9].mxu0  ;;  %v3255_v12 = vpop.f32.mrb[9].mxu1  ;;  %v620_v43 = vadd.f32 1.0, %v588_v22  ;;  %v559_v45 = vand.u32 2147483647, %v463_v23  ;;  %2842 = vpow2.f32 %v1067_v26  ;;  %v1036_v49 = vmul.f32 %v1004_v28, %v556_v3 }
 0x13d   :  { %v3243_v5 = vpop.f32.mrb[10].mxu0  ;;  %v3258_v16 = vpop.f32.mrb[10].mxu1  ;;  %v1009_v50 = vsub.f32 0.0, %v561_v37  ;;  %v3291_v29 = vadd.f32 %v2714_v59, %v3210_v24  ;;  %2844 = vrcp.f32 %v622_v30  ;;  %v562_v57 = vand.u32 2147483647, %v3268_v32 }
 0x13e   :  { %v3253_v11 = vpop.f32.mrb[11].mxu0  ;;  %v3263_v25 = vpop.f32.mrb[11].mxu1  ;;  %v1007_v55 = vsub.f32 0.0, %v559_v45  ;;  %v464_v61 = vmul.f32 0.70710677, %v3271_v33  ;;  %2846 = vpow2.f32 %v1073_v36  ;;  %v3301_v63 = vmul.f32 0.5, %v325_v0 }
 0x13f   :  { %v593_v3 = vmul.f32 0.3275911, %v561_v37  ;;  %v333_v9 = vadd.f32 %v3210_v24, %v332_v1  ;;  %2848 = vrcp.f32 %v620_v43  ;;  %v3304_v59 = vmul.f32 0.5, %v317_v4 }
 0x140   :  { %4588 = vst [vmem:[#allocation15_spill] sm:$0xff] %v3301_v63  ;;  %v591_v13 = vmul.f32 0.3275911, %v559_v45  ;;  %v1010_v14 = vsub.f32 0.0, %v562_v57  ;;  %v1069_v17 = vmul.f32 1.442695, %v1036_v49  ;;  %v1041_v18 = vmul.f32 %v1009_v50, %v561_v37 }
 0x141   :  { %4589 = vst [vmem:[#allocation16_spill] sm:$0xff] %v3304_v59  ;;  %vm497_vm4 = vcmp.ge.f32.partialorder %v465_v20, 0.0  ;;  %v3307_v19 = vmul.f32 0.70710677, %v3291_v29  ;;  %vm495_vm5 = vcmp.ge.f32.partialorder %v463_v23, 0.0  ;;  %v1039_v22 = vmul.f32 %v1007_v55, %v559_v45 }
 0x142   :  { %v560_v26 = vand.u32 2147483647, %v464_v61  ;;  %v344_v0 = vadd.f32 %v3243_v5, %v3210_v24  ;;  %v625_v28 = vadd.f32 1.0, %v593_v3  ;;  %v3311_v30 = vmul.f32 0.5, %v328_v15  ;;  %v3315_v36 = vpop.eup %2836 }
 0x143   :  { %v3273_v35 = vpop.f32.mrb[12].mxu0  ;;  %v3281_v40 = vpop.f32.mrb[12].mxu1  ;;  %v594_v1 = vmul.f32 0.3275911, %v562_v57  ;;  %v3313_v4 = vmul.f32 0.70710677, %v333_v9  ;;  %v1042_v23 = vmul.f32 %v1010_v14, %v562_v57  ;;  %2850 = vpow2.f32 %v1069_v17 }
 0x144   :  { %v3279_v39 = vpop.f32.mrb[13].mxu0  ;;  %v3288_v47 = vpop.f32.mrb[13].mxu1  ;;  %4590 = vst [vmem:[#allocation17_spill] sm:$0xff] %v3311_v30  ;;  %v3318_v20 = vsel %vm497_vm4, 1.0, %v4560_v7  ;;  %v623_v37 = vadd.f32 1.0, %v591_v13  ;;  %vm498_vm6 = vcmp.ge.f32.partialorder %v3268_v32, 0.0  ;;  %2852 = vrcp.f32 %v625_v28 }
 0x145   :  { %v3286_v46 = vpop.f32.mrb[14].mxu0  ;;  %v3295_v53 = vpop.f32.mrb[14].mxu1  ;;  %4591 = vst [vmem:[#allocation18_spill] sm:$0xff] %v3318_v20  ;;  %v1079_v45 = vmul.f32 1.442695, %v1041_v18  ;;  %v3324_v5 = vsel %vm495_vm5, 1.0, %v4560_v7 }
 0x146   :  { %v3293_v51 = vpop.f32.mrb[15].mxu0  ;;  %v3299_v62 = vpop.f32.mrb[15].mxu1  ;;  %4592 = vst [vmem:[#allocation19_spill] sm:$0xff] %v3324_v5  ;;  %v1008_v15 = vsub.f32 0.0, %v560_v26  ;;  %v565_v49 = vand.u32 2147483647, %v3307_v19  ;;  %2854 = vrcp.f32 %v623_v37 }
 0x147   :  { %v3321_v43 = vpop.eup %2838  ;;  %vm509_vm7 = vcmp.ge.f32.partialorder %v3245_v6, 0.0  ;;  %v1075_v55 = vmul.f32 1.442695, %v1039_v22  ;;  %v592_v3 = vmul.f32 0.3275911, %v560_v26  ;;  %v3335_v57 = vsel %vm498_vm6, 1.0, %v4560_v7 }
 0x148   :  { %v3328_v50 = vpop.eup %2840  ;;  %v3330_v13 = vmul.f32 0.70710677, %v344_v0  ;;  %4593 = vst [vmem:[#allocation20_spill] sm:$0xff] %v3335_v57  ;;  %v626_v14 = vadd.f32 1.0, %v594_v1  ;;  %v563_v18 = vand.u32 2147483647, %v3313_v4  ;;  %2856 = vpow2.f32 %v1079_v45 }
 0x149   :  { %v3332_v32 = vpop.eup %2842  ;;  %v1081_v30 = vmul.f32 1.442695, %v1042_v23  ;;  %vm496_vm8 = vcmp.ge.f32.partialorder %v464_v61, 0.0  ;;  %v1013_v63 = vsub.f32 0.0, %v565_v49  ;;  %v1040_v22 = vmul.f32 %v1008_v15, %v560_v26 }
 0x14a   :  { %v3338_v56 = vpop.eup %2844  ;;  %v597_v20 = vmul.f32 0.3275911, %v565_v49  ;;  %v1011_v59 = vsub.f32 0.0, %v563_v18  ;;  %2858 = vpow2.f32 %v1075_v55  ;;  %v624_v28 = vadd.f32 1.0, %v592_v3 }
 0x14b   :  { %v3340_v17 = vpop.eup %2846  ;;  %v566_v1 = vand.u32 2147483647, %v3330_v13  ;;  %v3347_v7 = vadd.f32 %v3210_v24, %v3253_v11  ;;  %2860 = vrcp.f32 %v626_v14  ;;  %v3350_v61 = vmul.f32 0.5, %v3271_v33 }
 0x14c   :  { %v3342_v5 = vpop.eup %2848  ;;  %v4595_v37 = vmov -1.0   ;;  %v595_v26 = vmul.f32 0.3275911, %v563_v18  ;;  %2862 = vpow2.f32 %v1081_v30  ;;  %v3356_v45 = vmul.f32 0.5, %v3291_v29 }
 0x14d   :  { %4594 = vst [vmem:[#allocation21_spill] sm:$0xff] %v3350_v61  ;;  %v3353_v23 = vsel %vm496_vm8, 1.0, %v4595_v37  ;;  %v1045_v15 = vmul.f32 %v1013_v63, %v565_v49  ;;  %v3358_v55 = vmul.f32 0.5, %v333_v9  ;;  %v1077_v3 = vmul.f32 1.442695, %v1040_v22  ;;  %v3368_v63 = vpop.eup %2850 }
 0x14e   :  { %4596 = vst [vmem:[#allocation22_spill] sm:$0xff] %v3353_v23  ;;  %4597 = vst [vmem:[#allocation23_spill] sm:$0xff] %v3356_v45  ;;  %v629_v57 = vadd.f32 1.0, %v597_v20  ;;  %v1043_v2 = vmul.f32 %v1011_v59, %v563_v18  ;;  %v1014_v11 = vsub.f32 0.0, %v566_v1  ;;  %2864 = vrcp.f32 %v624_v28  ;;  %v3377_v18 = vpop.eup %2852 }
 0x14f   :  { %4598 = vst [vmem:[#allocation24_spill] sm:$0xff] %v3358_v55  ;;  %v598_v14 = vmul.f32 0.3275911, %v566_v1  ;;  %v573_v33 = vand.u32 2147483647, %v3245_v6  ;;  %vm501_vm9 = vcmp.ge.f32.partialorder %v3307_v19, 0.0  ;;  %v376_v49 = vadd.f32 %v3215_v31, %v3210_v24 }
 0x150   :  { %v468_v61 = vmul.f32 0.70710677, %v3347_v7  ;;  %v627_v23 = vadd.f32 1.0, %v595_v26  ;;  %v3363_v30 = vmul.f32 0.5, %v344_v0  ;;  %v3366_v29 = vmul.f32 0.70710677, %v3277_v38  ;;  %v3380_v28 = vpop.eup %2854 }
 0x151   :  { %v1087_v9 = vmul.f32 1.442695, %v1045_v15  ;;  %v3373_v59 = vsel %vm509_vm7, 1.0, %v4595_v37  ;;  %v1021_v20 = vsub.f32 0.0, %v573_v33  ;;  %2866 = vpow2.f32 %v1077_v3 }
 0x152   :  { %4599 = vst [vmem:[#allocation25_spill] sm:$0xff] %v3363_v30  ;;  %4600 = vst [vmem:[#allocation26_spill] sm:$0xff] %v3373_v59  ;;  %vm499_vm10 = vcmp.ge.f32.partialorder %v3313_v4, 0.0  ;;  %v1083_v0 = vmul.f32 1.442695, %v1043_v2  ;;  %v1046_v22 = vmul.f32 %v1014_v11, %v566_v1  ;;  %2868 = vrcp.f32 %v629_v57  ;;  %v3382_v6 = vpop.eup %2856 }
 0x153   :  { %v630_v26 = vadd.f32 1.0, %v598_v14  ;;  %v605_v15 = vmul.f32 0.3275911, %v573_v33  ;;  %v564_v30 = vand.u32 2147483647, %v468_v61  ;;  %4601 = vst [vmem:[#allocation27_spill] sm:$0xff] %v3382_v6  ;;  %2870 = vrcp.f32 %v627_v23 }
 0x154   :  { %v3387_v59 = vsel %vm501_vm9, 1.0, %v4595_v37  ;;  %vm502_vm11 = vcmp.ge.f32.partialorder %v3330_v13, 0.0  ;;  %v571_v31 = vand.u32 2147483647, %v3366_v29  ;;  %v3391_v2 = vpop.eup %2858  ;;  %2872 = vpow2.f32 %v1087_v9 }
 0x155   :  { %4602 = vst [vmem:[#allocation28_spill] sm:$0xff] %v3387_v59  ;;  %4603 = vst [vmem:[#allocation29_spill] sm:$0xff] %v3391_v2  ;;  %v1053_v1 = vmul.f32 %v1021_v20, %v573_v33  ;;  %v478_v57 = vmul.f32 0.70710677, %v376_v49  ;;  %v368_v3 = vadd.f32 %v3210_v24, %v3218_v34  ;;  %v3395_v11 = vpop.eup %2860  ;;  %v3400_v19 = vsel %vm499_vm10, 1.0, %v4595_v37 }
 0x156   :  { %4604 = vst [vmem:[#allocation30_spill] sm:$0xff] %v3400_v19  ;;  %2874 = vpow2.f32 %v1083_v0  ;;  %v1089_v23 = vmul.f32 1.442695, %v1046_v22  ;;  %v1012_v13 = vsub.f32 0.0, %v564_v30  ;;  %v3402_v14 = vpop.eup %2862  ;;  %v3405_v45 = vsel %vm502_vm11, 1.0, %v4595_v37 }
 0x157   :  { %4605 = vst [vmem:[#allocation31_spill] sm:$0xff] %v3402_v14  ;;  %4606 = vst [vmem:[#allocation32_spill] sm:$0xff] %v3405_v45  ;;  %2876 = vrcp.f32 %v630_v26  ;;  %v637_v33 = vadd.f32 1.0, %v605_v15  ;;  %v596_v9 = vmul.f32 0.3275911, %v564_v30  ;;  %vm500_vm12 = vcmp.ge.f32.partialorder %v468_v61, 0.0 }
 0x158   :  { %v603_v34 = vmul.f32 0.3275911, %v571_v31  ;;  %v1019_v20 = vsub.f32 0.0, %v571_v31  ;;  %v357_v55 = vadd.f32 %v3273_v35, %v3210_v24  ;;  %v3409_v4 = vpop.eup %2864  ;;  %v1103_v59 = vmul.f32 1.442695, %v1053_v1 }
 0x159   :  { %v574_v0 = vand.u32 2147483647, %v478_v57  ;;  %v476_v22 = vmul.f32 0.70710677, %v368_v3  ;;  %v349_v19 = vadd.f32 %v3210_v24, %v3279_v39  ;;  %2878 = vpow2.f32 %v1089_v23 }
 0x15a   :  { %v3414_v45 = vmul.f32 0.5, %v3347_v7  ;;  %v1044_v26 = vmul.f32 %v1012_v13, %v564_v30  ;;  %v3417_v61 = vmul.f32 0.5, %v3277_v38  ;;  %2880 = vrcp.f32 %v637_v33 }
 0x15b   :  { %v3420_v15 = vsel %vm500_vm12, 1.0, %v4595_v37  ;;  %v628_v35 = vadd.f32 1.0, %v596_v9  ;;  %vm507_vm13 = vcmp.ge.f32.partialorder %v3366_v29, 0.0  ;;  %v3423_v1 = vpop.eup %2866  ;;  %v635_v14 = vadd.f32 1.0, %v603_v34 }
 0x15c   :  { %4607 = vst [vmem:[#allocation33_spill] sm:$0xff] %v3414_v45  ;;  %4608 = vst [vmem:[#allocation34_spill] sm:$0xff] %v3417_v61  ;;  %v1051_v6 = vmul.f32 %v1019_v20, %v571_v31  ;;  %v1022_v39 = vsub.f32 0.0, %v574_v0  ;;  %v473_v23 = vmul.f32 0.70710677, %v357_v55  ;;  %v3425_v2 = vpop.eup %2868  ;;  %2882 = vpow2.f32 %v1103_v59 }
 0x15d   :  { %4609 = vst [vmem:[#allocation35_spill] sm:$0xff] %v3420_v15  ;;  %4610 = vst [vmem:[#allocation36_spill] sm:$0xff] %v3423_v1  ;;  %v606_v7 = vmul.f32 0.3275911, %v574_v0  ;;  %v572_v30 = vand.u32 2147483647, %v476_v22  ;;  %v3429_v13 = vpop.eup %2870  ;;  %v3438_v31 = vadd.f32 %v3286_v46, %v3210_v24  ;;  %2884 = vrcp.f32 %v628_v35 }
 0x15e   :  { %v3427_v38 = vmul.f32 0.70710677, %v349_v19  ;;  %v1085_v33 = vmul.f32 1.442695, %v1044_v26  ;;  %v3432_v9 = vsel %vm507_vm13, 1.0, %v4595_v37  ;;  %v3434_v29 = vmul.f32 0.5, %v376_v49  ;;  %v3440_v34 = vpop.eup %2872 }
 0x15f   :  { %4611 = vst [vmem:[#allocation37_spill] sm:$0xff] %v3432_v9  ;;  %4613 = vst [vmem:[#allocation39_spill] sm:$0xff] %v3440_v34  ;;  %vm510_vm14 = vcmp.ge.f32.partialorder %v478_v57, 0.0  ;;  %v1020_v59 = vsub.f32 0.0, %v572_v30  ;;  %v3444_v20 = vadd.f32 %v3210_v24, %v3293_v51  ;;  %v1099_v26 = vmul.f32 1.442695, %v1051_v6 }
 0x160   :  { %4612 = vst [vmem:[#allocation38_spill] sm:$0xff] %v3434_v29  ;;  %v3446_v61 = vpop.eup %2874  ;;  %v1054_v45 = vmul.f32 %v1022_v39, %v574_v0  ;;  %vm508_vm15 = vcmp.ge.f32.partialorder %v476_v22, 0.0  ;;  %v569_v49 = vand.u32 2147483647, %v473_v23  ;;  %2886 = vrcp.f32 %v635_v14 }
 0x161   :  { %4614 = vst [vmem:[#allocation40_spill] sm:$0xff] %v3446_v61  ;;  %v3448_v29 = vpop.eup %2876  ;;  %v638_v46 = vadd.f32 1.0, %v606_v7  ;;  %v604_v9 = vmul.f32 0.3275911, %v572_v30  ;;  %v567_v15 = vand.u32 2147483647, %v3427_v38  ;;  %2888 = vpow2.f32 %v1085_v33 }
 0x162   :  { %v3452_v57 = vsel %vm510_vm14, 1.0, %v4595_v37  ;;  %v3454_v35 = vmul.f32 0.5, %v368_v3  ;;  %v3457_v51 = vmul.f32 0.70710677, %v3438_v31  ;;  %v3460_v6 = vsel %vm508_vm15, 1.0, %v4595_v37 }
 0x163   :  { %4615 = vst [vmem:[#allocation41_spill] sm:$0xff] %v3452_v57  ;;  %4617 = vst [vmem:[#allocation43_spill] sm:$0xff] %v3460_v6  ;;  %v1052_v0 = vmul.f32 %v1020_v59, %v572_v30  ;;  %v1017_v22 = vsub.f32 0.0, %v569_v49  ;;  %v472_v14 = vmul.f32 0.70710677, %v3444_v20  ;;  %v3463_v39 = vpop.eup %2878  ;;  %2890 = vpow2.f32 %v1099_v26 }
 0x164   :  { %4616 = vst [vmem:[#allocation42_spill] sm:$0xff] %v3454_v35  ;;  %4618 = vst [vmem:[#allocation44_spill] sm:$0xff] %v3463_v39  ;;  %v1105_v7 = vmul.f32 1.442695, %v1054_v45  ;;  %v601_v33 = vmul.f32 0.3275911, %v569_v49  ;;  %v3465_v61 = vpop.eup %2880  ;;  %2892 = vrcp.f32 %v638_v46  ;;  %v389_v59 = vadd.f32 %v3221_v41, %v3210_v24 }
 0x165   :  { %v1015_v34 = vsub.f32 0.0, %v567_v15  ;;  %4619 = vst [vmem:[#allocation45_spill] sm:$0xff] %v3465_v61  ;;  %v636_v3 = vadd.f32 1.0, %v604_v9  ;;  %v3467_v57 = vmul.f32 0.5, %v357_v55  ;;  %v599_v35 = vmul.f32 0.3275911, %v567_v15 }
 0x166   :  { %vm505_vm0 = vcmp.ge.f32.partialorder %v473_v23, 0.0  ;;  %v3469_v1 = vmul.f32 0.5, %v349_v19  ;;  %v570_v30 = vand.u32 2147483647, %v3457_v51  ;;  %v3474_v6 = vpop.eup %2882  ;;  %v1101_v45 = vmul.f32 1.442695, %v1052_v0 }
 0x167   :  { %4620 = vst [vmem:[#allocation46_spill] sm:$0xff] %v3467_v57  ;;  %4622 = vst [vmem:[#allocation48_spill] sm:$0xff] %v3474_v6  ;;  %v1049_v26 = vmul.f32 %v1017_v22, %v569_v49  ;;  %v568_v39 = vand.u32 2147483647, %v472_v14  ;;  %v381_v46 = vadd.f32 %v3210_v24, %v3224_v44  ;;  %2894 = vpow2.f32 %v1105_v7  ;;  %v3478_v23 = vpop.eup %2884 }
 0x168   :  { %4621 = vst [vmem:[#allocation47_spill] sm:$0xff] %v3469_v1  ;;  %v633_v55 = vadd.f32 1.0, %v601_v33  ;;  %v1047_v9 = vmul.f32 %v1015_v34, %v567_v15  ;;  %v1018_v57 = vsub.f32 0.0, %v570_v30  ;;  %2896 = vrcp.f32 %v636_v3 }
 0x169   :  { %v3481_v19 = vsel %vm505_vm0, 1.0, %v4595_v37  ;;  %vm503_vm1 = vcmp.ge.f32.partialorder %v3427_v38, 0.0  ;;  %v631_v41 = vadd.f32 1.0, %v599_v35  ;;  %v602_v6 = vmul.f32 0.3275911, %v570_v30 }
 0x16a   :  { %4623 = vst [vmem:[#allocation49_spill] sm:$0xff] %v3481_v19  ;;  %v1016_v0 = vsub.f32 0.0, %v568_v39  ;;  %v481_v49 = vmul.f32 0.70710677, %v389_v59  ;;  %v392_v22 = vadd.f32 %v3226_v48, %v3210_v24  ;;  %v3486_v44 = vpop.eup %2886  ;;  %2898 = vpow2.f32 %v1101_v45 }
 0x16b   :  { %4624 = vst [vmem:[#allocation50_spill] sm:$0xff] %v3486_v44  ;;  %v1095_v15 = vmul.f32 1.442695, %v1049_v26  ;;  %v600_v34 = vmul.f32 0.3275911, %v568_v39  ;;  %v3488_v33 = vpop.eup %2888  ;;  %2900 = vrcp.f32 %v633_v55  ;;  %v3491_v3 = vsel %vm503_vm1, 1.0, %v4595_v37 }
 0x16c   :  { %v479_v7 = vmul.f32 0.70710677, %v381_v46  ;;  %v1091_v38 = vmul.f32 1.442695, %v1047_v9  ;;  %v1050_v35 = vmul.f32 %v1018_v57, %v570_v30  ;;  %2902 = vrcp.f32 %v631_v41 }
 0x16d   :  { %v3494_v19 = vmul.f32 0.5, %v3438_v31  ;;  %vm506_vm2 = vcmp.ge.f32.partialorder %v3457_v51, 0.0  ;;  %vm504_vm3 = vcmp.ge.f32.partialorder %v472_v14, 0.0  ;;  %v3497_v48 = vpop.eup %2890  ;;  %v634_v45 = vadd.f32 1.0, %v602_v6 }
 0x16e   :  { %4626 = vst [vmem:[#allocation52_spill] sm:$0xff] %v3497_v48  ;;  %v1048_v26 = vmul.f32 %v1016_v0, %v568_v39  ;;  %v577_v1 = vand.u32 2147483647, %v481_v49  ;;  %v482_v61 = vmul.f32 0.70710677, %v392_v22  ;;  %v3499_v44 = vpop.eup %2892  ;;  %2904 = vpow2.f32 %v1095_v15 }
 0x16f   :  { %4625 = vst [vmem:[#allocation51_spill] sm:$0xff] %v3494_v19  ;;  %v3502_v55 = vmul.f32 0.5, %v3444_v20  ;;  %v632_v57 = vadd.f32 1.0, %v600_v34  ;;  %v575_v30 = vand.u32 2147483647, %v479_v7  ;;  %2906 = vpow2.f32 %v1091_v38 }
 0x170   :  { %v3505_v31 = vsel %vm506_vm2, 1.0, %v4595_v37  ;;  %v1097_v51 = vmul.f32 1.442695, %v1050_v35  ;;  %v1025_v14 = vsub.f32 0.0, %v577_v1  ;;  %v3508_v9 = vsel %vm504_vm3, 1.0, %v4595_v37 }
 0x171   :  { %4627 = vst [vmem:[#allocation53_spill] sm:$0xff] %v3502_v55  ;;  %4628 = vst [vmem:[#allocation54_spill] sm:$0xff] %v3505_v31  ;;  %vm513_vm4 = vcmp.ge.f32.partialorder %v481_v49, 0.0  ;;  %v1023_v6 = vsub.f32 0.0, %v575_v30  ;;  %v384_v39 = vadd.f32 %v3210_v24, %v3229_v52  ;;  %v3512_v41 = vpop.eup %2894  ;;  %2908 = vrcp.f32 %v634_v45 }
 0x172   :  { %4629 = vst [vmem:[#allocation55_spill] sm:$0xff] %v3508_v9  ;;  %4630 = vst [vmem:[#allocation56_spill] sm:$0xff] %v3512_v41  ;;  %v1093_v20 = vmul.f32 1.442695, %v1048_v26  ;;  %v609_v0 = vmul.f32 0.3275911, %v577_v1  ;;  %v3514_v34 = vpop.eup %2896  ;;  %2910 = vrcp.f32 %v632_v57  ;;  %v1057_v55 = vmul.f32 %v1025_v14, %v577_v1 }
 0x173   :  { %v578_v15 = vand.u32 2147483647, %v482_v61  ;;  %v3516_v38 = vmul.f32 0.5, %v389_v59  ;;  %v3518_v35 = vmul.f32 0.5, %v381_v46  ;;  %v607_v19 = vmul.f32 0.3275911, %v575_v30 }
 0x174   :  { %2912 = vpow2.f32 %v1097_v51  ;;  %v3521_v49 = vsel %vm513_vm4, 1.0, %v4595_v37  ;;  %vm511_vm5 = vcmp.ge.f32.partialorder %v479_v7, 0.0  ;;  %v3523_v52 = vpop.eup %2898  ;;  %v1055_v45 = vmul.f32 %v1023_v6, %v575_v30 }
 0x175   :  { %4631 = vst [vmem:[#allocation57_spill] sm:$0xff] %v3516_v38  ;;  %4632 = vst [vmem:[#allocation58_spill] sm:$0xff] %v3518_v35  ;;  %v1026_v26 = vsub.f32 0.0, %v578_v15  ;;  %v480_v41 = vmul.f32 0.70710677, %v384_v39  ;;  %v3527_v31 = vadd.f32 %v3237_v60, %v3210_v24  ;;  %v3529_v59 = vpop.eup %2900  ;;  %2914 = vpow2.f32 %v1093_v20 }
 0x176   :  { %4633 = vst [vmem:[#allocation59_spill] sm:$0xff] %v3521_v49  ;;  %4634 = vst [vmem:[#allocation60_spill] sm:$0xff] %v3523_v52  ;;  %v641_v46 = vadd.f32 1.0, %v609_v0  ;;  %v610_v57 = vmul.f32 0.3275911, %v578_v15  ;;  %v3532_v38 = vpop.eup %2902  ;;  %v3535_v1 = vsel %vm511_vm5, 1.0, %v4595_v37  ;;  %v397_v14 = vadd.f32 %v3210_v24, %v3255_v12 }
 0x177   :  { %4635 = vst [vmem:[#allocation61_spill] sm:$0xff] %v3527_v31  ;;  %v715_v51 = vmul.f32 1.0614054, %v3321_v43  ;;  %4636 = vst [vmem:[#allocation62_spill] sm:$0xff] %v3535_v1  ;;  %v639_v7 = vadd.f32 1.0, %v607_v19  ;;  %v3537_v30 = vmul.f32 0.5, %v392_v22  ;;  %v1058_v49 = vmul.f32 %v1026_v26, %v578_v15 }
 0x178   :  { %v1111_v60 = vmul.f32 1.442695, %v1057_v55  ;;  %vm514_vm6 = vcmp.ge.f32.partialorder %v482_v61, 0.0  ;;  %vm512_vm7 = vcmp.ge.f32.partialorder %v480_v41, 0.0  ;;  %v3541_v20 = vpop.eup %2904  ;;  %v1107_v0 = vmul.f32 1.442695, %v1055_v45 }
 0x179   :  { %4637 = vst [vmem:[#allocation63_spill] sm:$0xff] %v3537_v30  ;;  %v747_v6 = vadd.f32 -1.4531521, %v715_v51  ;;  %4638 = vst [vmem:[#allocation64_spill] sm:$0xff] %v3541_v20  ;;  %v576_v35 = vand.u32 2147483647, %v480_v41  ;;  %v3544_v48 = vpop.eup %2906  ;;  %2916 = vrcp.f32 %v641_v46 }
 0x17a   :  { %v485_v52 = vmul.f32 0.70710677, %v3527_v31  ;;  %v642_v19 = vadd.f32 1.0, %v610_v57  ;;  %v3546_v22 = vmul.f32 0.5, %v384_v39  ;;  %2918 = vrcp.f32 %v639_v7 }
 0x17b   :  { %v779_v30 = vmul.f32 %v3321_v43, %v747_v6  ;;  %v3550_v12 = vsel %vm514_vm6, 1.0, %v4595_v37  ;;  %v1024_v61 = vsub.f32 0.0, %v576_v35  ;;  %v3552_v55 = vmul.f32 0.70710677, %v397_v14  ;;  %v3554_v45 = vpop.eup %2908 }
 0x17c   :  { %4639 = vst [vmem:[#allocation65_spill] sm:$0xff] %v3546_v22  ;;  %4640 = vst [vmem:[#allocation66_spill] sm:$0xff] %v3550_v12  ;;  %2920 = vpow2.f32 %v1111_v60  ;;  %v3558_v15 = vsel %vm512_vm7, 1.0, %v4595_v37  ;;  %v716_v39 = vmul.f32 1.0614054, %v3342_v5  ;;  %v3561_v46 = vpop.eup %2910  ;;  %vm517_vm8 = vcmp.ge.f32.partialorder %v485_v52, 0.0 }
 0x17d   :  { %4641 = vst [vmem:[#allocation67_spill] sm:$0xff] %v3552_v55  ;;  %4642 = vst [vmem:[#allocation68_spill] sm:$0xff] %v3558_v15  ;;  %v811_v26 = vadd.f32 1.4214138, %v779_v30  ;;  %2922 = vpow2.f32 %v1107_v0  ;;  %v1113_v57 = vmul.f32 1.442695, %v1058_v49  ;;  %v1056_v41 = vmul.f32 %v1024_v61, %v576_v35 }
 0x17e   :  { %v608_v51 = vmul.f32 0.3275911, %v576_v35  ;;  %v581_v7 = vand.u32 2147483647, %v485_v52  ;;  %v3563_v6 = vpop.eup %2912  ;;  %2924 = vrcp.f32 %v642_v19  ;;  %v748_v22 = vadd.f32 -1.4531521, %v716_v39 }
 0x17f   :  { %4643 = vst [vmem:[#allocation69_spill] sm:$0xff] %v3563_v6  ;;  %v843_v31 = vmul.f32 %v3321_v43, %v811_v26  ;;  %v717_v60 = vmul.f32 1.0614054, %v3315_v36  ;;  %v3567_v12 = vmul.f32 0.5, %v397_v14  ;;  %v579_v30 = vand.u32 2147483647, %v3552_v55  ;;  %v3570_v15 = vpop.eup %2914 }
 0x180   :  { %4645 = vst [vmem:[#allocation71_spill] sm:$0xff] %v3570_v15  ;;  %v780_v49 = vmul.f32 %v3342_v5, %v748_v22  ;;  %v718_v9 = vmul.f32 1.0614054, %v3338_v56  ;;  %2926 = vpow2.f32 %v1113_v57  ;;  %v640_v19 = vadd.f32 1.0, %v608_v51 }
 0x181   :  { %4644 = vst [vmem:[#allocation70_spill] sm:$0xff] %v3567_v12  ;;  %v875_v0 = vadd.f32 -0.28449672, %v843_v31  ;;  %v749_v1 = vadd.f32 -1.4531521, %v717_v60  ;;  %v3576_v39 = vadd.f32 %v3258_v16, %v3210_v24  ;;  %v3582_v31 = vsel %vm517_vm8, 1.0, %v4595_v37 }
 0x182   :  { %v613_v26 = vmul.f32 0.3275911, %v581_v7  ;;  %v812_v14 = vadd.f32 1.4214138, %v780_v49  ;;  %v750_v12 = vadd.f32 -1.4531521, %v718_v9  ;;  %v3594_v9 = vadd.f32 %v3210_v24, %v3263_v25 }
 0x183   :  { %4646 = vst [vmem:[#allocation72_spill] sm:$0xff] %v3576_v39  ;;  %v907_v35 = vmul.f32 %v3321_v43, %v875_v0  ;;  %v781_v61 = vmul.f32 %v3315_v36, %v749_v1  ;;  %v1109_v55 = vmul.f32 1.442695, %v1056_v41  ;;  %4647 = vst [vmem:[#allocation73_spill] sm:$0xff] %v3582_v31  ;;  %v1029_v22 = vsub.f32 0.0, %v581_v7  ;;  %v3584_v57 = vpop.eup %2916 }
 0x184   :  { %v611_v60 = vmul.f32 0.3275911, %v579_v30  ;;  %4648 = vst [vmem:[#allocation74_spill] sm:$0xff] %v3584_v57  ;;  %v1027_v51 = vsub.f32 0.0, %v579_v30  ;;  %v844_v16 = vmul.f32 %v3342_v5, %v812_v14  ;;  %v3587_v15 = vpop.eup %2918  ;;  %v645_v0 = vadd.f32 1.0, %v613_v26 }
 0x185   :  { %v939_v6 = vadd.f32 0.2548296, %v907_v35  ;;  %v813_v20 = vadd.f32 1.4214138, %v781_v61  ;;  %v3590_v1 = vmul.f32 0.70710677, %v3576_v39  ;;  %v782_v52 = vmul.f32 %v3338_v56, %v750_v12 }
 0x186   :  { %v3597_v41 = vpop.eup %2920  ;;  %2928 = vrcp.f32 %v640_v19  ;;  %v876_v35 = vadd.f32 -0.28449672, %v844_v16  ;;  %v1061_v26 = vmul.f32 %v1029_v22, %v581_v7  ;;  %v643_v39 = vadd.f32 1.0, %v611_v60 }
 0x187   :  { %4649 = vst [vmem:[#allocation75_spill] sm:$0xff] %v3597_v41  ;;  %v971_v49 = vmul.f32 %v3321_v43, %v939_v6  ;;  %v845_v14 = vmul.f32 %v3315_v36, %v813_v20  ;;  %v3601_v61 = vpop.eup %2922  ;;  %2930 = vpow2.f32 %v1109_v55  ;;  %v814_v31 = vadd.f32 1.4214138, %v782_v52 }
 0x188   :  { %v3603_v37 = vpop.eup %2924  ;;  %v1059_v25 = vmul.f32 %v1027_v51, %v579_v30  ;;  %v908_v12 = vmul.f32 %v3342_v5, %v876_v35  ;;  %2932 = vrcp.f32 %v645_v0  ;;  %v582_v43 = vand.u32 2147483647, %v3590_v1 }
 0x189   :  { %v1131_v57 = vmul.f32 %v3332_v32, %v971_v49  ;;  %v877_v41 = vadd.f32 -0.28449672, %v845_v14  ;;  %v3609_v6 = vmul.f32 0.70710677, %v3594_v9  ;;  %v846_v20 = vmul.f32 %v3338_v56, %v814_v31 }
 0x18a   :  { %v940_v7 = vadd.f32 0.2548296, %v908_v12  ;;  %v719_v22 = vmul.f32 1.0614054, %v3380_v28  ;;  %v3614_v30 = vpop.eup %2926  ;;  %v1119_v32 = vmul.f32 1.442695, %v1061_v26  ;;  %2934 = vrcp.f32 %v643_v39 }
 0x18b   :  { %v1163_v55 = vsub.f32 1.0, %v1131_v57  ;;  %v909_v19 = vmul.f32 %v3315_v36, %v877_v41  ;;  %v878_v60 = vadd.f32 -0.28449672, %v846_v20  ;;  %v3618_v51 = vadd.f32 %v3281_v40, %v3210_v24 }
 0x18c   :  { %v1115_v16 = vmul.f32 1.442695, %v1059_v25  ;;  %v972_v31 = vmul.f32 %v3342_v5, %v940_v7  ;;  %v614_v52 = vmul.f32 0.3275911, %v582_v43  ;;  %v580_v41 = vand.u32 2147483647, %v3609_v6 }
 0x18d   :  { %4650 = vst [vmem:[#allocation76_spill] sm:$0xff] %v3618_v51  ;;  %v1195_v0 = vmul.f32 %v1163_v55, %v3261_v21  ;;  %v941_v57 = vadd.f32 0.2548296, %v909_v19  ;;  %v910_v49 = vmul.f32 %v3338_v56, %v878_v60  ;;  %v3626_v35 = vadd.f32 %v3210_v24, %v3288_v47 }
 0x18e   :  { %v1132_v14 = vmul.f32 %v3368_v63, %v972_v31  ;;  %v751_v26 = vadd.f32 -1.4531521, %v719_v22  ;;  %2936 = vpow2.f32 %v1119_v32  ;;  %v1028_v21 = vsub.f32 0.0, %v580_v41 }
 0x18f   :  { %4651 = vst [vmem:[#allocation77_spill] sm:$0xff] %v3626_v35  ;;  %v1227_v39 = vadd.f32 1.0, %v1195_v0  ;;  %v973_v40 = vmul.f32 %v3315_v36, %v941_v57  ;;  %v942_v25 = vadd.f32 0.2548296, %v910_v49  ;;  %v3631_v5 = vmul.f32 0.70710677, %v3618_v51 }
 0x190   :  { %v3633_v12 = vpop.eup %2928  ;;  %v1164_v55 = vsub.f32 1.0, %v1132_v14  ;;  %v783_v7 = vmul.f32 %v3380_v28, %v751_v26  ;;  %v612_v36 = vmul.f32 0.3275911, %v580_v41  ;;  %v3644_v22 = vmul.f32 0.70710677, %v3626_v35 }
 0x191   :  { %4652 = vst [vmem:[#allocation78_spill] sm:$0xff] %v3631_v5  ;;  %v3636_v20 = vmul.f32 %v1227_v39, %v3235_v58  ;;  %v1133_v47 = vmul.f32 %v3328_v50, %v973_v40  ;;  %v3640_v63 = vpop.eup %2930  ;;  %v974_v19 = vmul.f32 %v3338_v56, %v942_v25  ;;  %v3648_v32 = vadd.f32 %v3295_v53, %v3210_v24 }
 0x192   :  { %4654 = vst [vmem:[#allocation80_spill] sm:$0xff] %v3644_v22  ;;  %v1196_v50 = vmul.f32 %v1164_v55, %v3284_v42  ;;  %v815_v0 = vadd.f32 1.4214138, %v783_v7  ;;  %v3654_v31 = vpop.eup %2932  ;;  %v1030_v57 = vsub.f32 0.0, %v582_v43  ;;  %v1060_v56 = vmul.f32 %v1028_v21, %v580_v41 }
 0x193   :  { %4653 = vst [vmem:[#allocation79_spill] sm:$0xff] %v3636_v20  ;;  %4655 = vst [vmem:[#allocation81_spill] sm:$0xff] %v3648_v32  ;;  %1291 = vadd.xlane.f32.xlu0 %v3636_v20  ;;  %v1387_v58 = vmul.f32 %v3636_v20, %v3636_v20  ;;  %v1165_v60 = vsub.f32 1.0, %v1133_v47  ;;  %v1134_v49 = vmul.f32 %v3340_v17, %v974_v19  ;;  %v3658_v39 = vand.u32 2147483647, %v3631_v5 }
 0x194   :  { %v1228_v53 = vadd.f32 1.0, %v1196_v50  ;;  %v847_v40 = vmul.f32 %v3380_v28, %v815_v0  ;;  %v3664_v42 = vadd.f32 %v3210_v24, %v3299_v62  ;;  %v3666_v26 = vpop.eup %2934  ;;  %v646_v25 = vadd.f32 1.0, %v614_v52 }
 0x195   :  { %1419 = vadd.xlane.f32.xlu1 %v1387_v58  ;;  %v1197_v14 = vmul.f32 %v1165_v60, %v3249_v8  ;;  %v644_v55 = vadd.f32 1.0, %v612_v36  ;;  %v1166_v41 = vsub.f32 1.0, %v1134_v49  ;;  %v3669_v17 = vand.u32 2147483647, %v3644_v22 }
 0x196   :  { %4656 = vst [vmem:[#allocation82_spill] sm:$0xff] %v3664_v42  ;;  %v3672_v21 = vmul.f32 %v1228_v53, %v3251_v10  ;;  %v879_v7 = vadd.f32 -0.28449672, %v847_v40  ;;  %v3675_v8 = vmul.f32 0.70710677, %v3648_v32  ;;  %v1062_v19 = vmul.f32 %v1030_v57, %v582_v43 }
 0x197   :  { %v1229_v47 = vadd.f32 1.0, %v1197_v14  ;;  %v1117_v58 = vmul.f32 1.442695, %v1060_v56  ;;  %v1198_v24 = vmul.f32 %v1166_v41, %v3266_v27  ;;  %v617_v62 = vmul.f32 0.3275911, %v3658_v39  ;;  %v4661_v14 = vld [vmem:[#allocation14_spill] sm:$0xff] }
 0x198   :  { %4657 = vst [vmem:[#allocation83_spill] sm:$0xff] %v3672_v21  ;;  %4658 = vst [vmem:[#allocation84_spill] sm:$0xff] %v3675_v8  ;;  %2938 = vpow2.f32 %v1115_v16  ;;  %1293 = vadd.xlane.f32.xlu0 %v3672_v21  ;;  %v1388_v52 = vmul.f32 %v3672_v21, %v3672_v21  ;;  %v911_v10 = vmul.f32 %v3380_v28, %v879_v7  ;;  %v3684_v36 = vmul.f32 0.70710677, %v3664_v42  ;;  %v3686_v50 = vpop.eup %2936 }
 0x199   :  { %2940 = vrcp.f32 %v646_v25  ;;  %v1230_v43 = vadd.f32 1.0, %v1198_v24  ;;  %v615_v60 = vmul.f32 0.3275911, %v3669_v17  ;;  %v720_v27 = vmul.f32 1.0614054, %v3409_v4  ;;  %v4663_v24 = vld [vmem:[#allocation29_spill] sm:$0xff] }
 0x19a   :  { %4659 = vst [vmem:[#allocation85_spill] sm:$0xff] %v3684_v36  ;;  %2942 = vrcp.f32 %v644_v55  ;;  %1421 = vadd.xlane.f32.xlu1 %v1388_v52  ;;  %v3691_v16 = vmul.f32 %v1229_v47, %v3231_v54  ;;  %v943_v0 = vadd.f32 0.2548296, %v911_v10  ;;  %v3694_v57 = vand.u32 2147483647, %v3675_v8 }
 0x19b   :  { %v3696_v56 = vmul.f32 1.442695, %v1062_v19  ;;  %2944 = vpow2.f32 %v1117_v58  ;;  %v649_v49 = vadd.f32 1.0, %v617_v62  ;;  %v3701_v40 = vmul.f32 %v1230_v43, %v4661_v14 }
 0x19c   :  { %4660 = vst [vmem:[#allocation86_spill] sm:$0xff] %v3691_v16  ;;  %1295 = vadd.xlane.f32.xlu0 %v3691_v16  ;;  %v975_v25 = vmul.f32 %v3380_v28, %v943_v0  ;;  %v3705_v54 = vand.u32 2147483647, %v3684_v36  ;;  %v752_v55 = vadd.f32 -1.4531521, %v720_v27  ;;  %v647_v41 = vadd.f32 1.0, %v615_v60 }
 0x19d   :  { %4662 = vst [vmem:[#allocation14_spill] sm:$0xff] %v3701_v40  ;;  %v721_v7 = vmul.f32 1.0614054, %v3377_v18  ;;  %v722_v19 = vmul.f32 1.0614054, %v3395_v11  ;;  %v1389_v58 = vmul.f32 %v3691_v16, %v3691_v16  ;;  %2946 = vrcp.f32 %v649_v49  ;;  %v4668_v36 = vld [vmem:[#allocation27_spill] sm:$0xff] }
 0x19e   :  { %1297 = vadd.xlane.f32.xlu1 %v3701_v40  ;;  %v1135_v62 = vmul.f32 %v4663_v24, %v975_v25  ;;  %v618_v28 = vmul.f32 0.3275911, %v3694_v57  ;;  %v784_v52 = vmul.f32 %v3409_v4, %v752_v55  ;;  %v723_v60 = vmul.f32 1.0614054, %v3429_v13  ;;  %v2790_v16 = vld [vmem:[#allocation8 + $0x4] ss:$16 sps:$4 sm:$0xff]  }
 0x19f   :  { %v753_v10 = vadd.f32 -1.4531521, %v721_v7  ;;  %v754_v43 = vadd.f32 -1.4531521, %v722_v19  ;;  %v1390_v27 = vmul.f32 %v3701_v40, %v3701_v40  ;;  %v3720_v14 = vmul.f32 0.3275911, %v3705_v54  ;;  %2073 = vmatprep.subr.bf16.mxu1 %v2790_v16 }
 0x1a0   :  { %1423 = vadd.xlane.f32.xlu0 %v1389_v58  ;;  %v1167_v0 = vsub.f32 1.0, %v1135_v62  ;;  %v816_v53 = vadd.f32 1.4214138, %v784_v52  ;;  %v755_v47 = vadd.f32 -1.4531521, %v723_v60  ;;  %2948 = vrcp.f32 %v647_v41  ;;  %v4664_v7 = vld [vmem:[#allocation19_spill] sm:$0xff] }
 0x1a1   :  { %v785_v25 = vmul.f32 %v3377_v18, %v753_v10  ;;  %v786_v24 = vmul.f32 %v3395_v11, %v754_v43  ;;  %v724_v49 = vmul.f32 1.0614054, %v3478_v23  ;;  %v725_v62 = vmul.f32 1.0614054, %v3425_v2  ;;  %v2788_v40 = vld [vmem:[#allocation8] ss:$16 sps:$4 sm:$0xff]  }
 0x1a2   :  { %v3725_v55 = vpop.eup %2938  ;;  %1425 = vadd.xlane.f32.xlu1 %v1390_v27  ;;  %v1199_v19 = vmul.f32 %v1167_v0, %v4664_v7  ;;  %v848_v58 = vmul.f32 %v3409_v4, %v816_v53  ;;  %v787_v43 = vmul.f32 %v3429_v13, %v755_v47  ;;  %v3735_v27 = vadd.f32 1.0, %v618_v28  ;;  %v2793_v47 = vld [vmem:[#allocation8 + $0xc] ss:$16 sps:$4 sm:$0xff]   ;;  %2074 = vmatpush1.bf16.msra.mxu1 %v2788_v40 }
 0x1a3   :  { %v3730_v52 = vpop.eup %2940  ;;  %v817_v10 = vadd.f32 1.4214138, %v785_v25  ;;  %v818_v21 = vadd.f32 1.4214138, %v786_v24  ;;  %v756_v60 = vadd.f32 -1.4531521, %v724_v49  ;;  %2266 = vmatprep.subr.bf16.mxu0 %v2793_v47 }
 0x1a4   :  { %v3733_v20 = vpop.eup %2942  ;;  %v1231_v32 = vadd.f32 1.0, %v1199_v19  ;;  %v880_v41 = vadd.f32 -0.28449672, %v848_v58  ;;  %v757_v0 = vadd.f32 -1.4531521, %v725_v62  ;;  %v4665_v49 = vld [vmem:[#allocation16_spill] sm:$0xff]  ;;  %2950 = vrcp.f32 %v3735_v27 }
 0x1a5   :  { %v3737_v53 = vpop.eup %2944  ;;  %v849_v7 = vmul.f32 %v3377_v18, %v817_v10  ;;  %v850_v51 = vmul.f32 %v3395_v11, %v818_v21  ;;  %v819_v42 = vadd.f32 1.4214138, %v787_v43  ;;  %v788_v25 = vmul.f32 %v3478_v23, %v756_v60  ;;  %v2791_v24 = vld [vmem:[#allocation8 + $0x8] ss:$16 sps:$4 sm:$0xff]  }
 0x1a6   :  { %v3743_v8 = vmul.f32 %v1231_v32, %v4665_v49  ;;  %v912_v28 = vmul.f32 %v3409_v4, %v880_v41  ;;  %v789_v19 = vmul.f32 %v3425_v2, %v757_v0  ;;  %v726_v16 = vmul.f32 1.0614054, %v3448_v29  ;;  %2267 = vmatpush1.bf16.msra.mxu0 %v2791_v24  ;;  %v4706_v27 = vld [vmem:[#allocation26_spill] sm:$0xff] }
 0x1a7   :  { %v881_v58 = vadd.f32 -0.28449672, %v849_v7  ;;  %v882_v62 = vadd.f32 -0.28449672, %v850_v51  ;;  %v851_v10 = vmul.f32 %v3429_v13, %v819_v42  ;;  %v820_v21 = vadd.f32 1.4214138, %v788_v25  ;;  %v3752_v41 = vpop.eup %2946 }
 0x1a8   :  { %4666 = vst [vmem:[#allocation29_spill] sm:$0xff] %v3743_v8  ;;  %1299 = vadd.xlane.f32.xlu0 %v3743_v8  ;;  %v944_v43 = vadd.f32 0.2548296, %v912_v28  ;;  %v1391_v40 = vmul.f32 %v3743_v8, %v3743_v8  ;;  %v821_v32 = vadd.f32 1.4214138, %v789_v19  ;;  %vm516_vm10 = vcmp.ge.f32.partialorder %v3609_v6, 0.0 }
 0x1a9   :  { %v758_v60 = vadd.f32 -1.4531521, %v726_v16  ;;  %v913_v0 = vmul.f32 %v3377_v18, %v881_v58  ;;  %v914_v7 = vmul.f32 %v3395_v11, %v882_v62  ;;  %v883_v51 = vadd.f32 -0.28449672, %v851_v10  ;;  %v4667_v58 = vld [vmem:[#allocation36_spill] sm:$0xff] }
 0x1aa   :  { %v852_v42 = vmul.f32 %v3478_v23, %v820_v21  ;;  %v976_v25 = vmul.f32 %v3409_v4, %v944_v43  ;;  %v853_v47 = vmul.f32 %v3425_v2, %v821_v32  ;;  %v727_v28 = vmul.f32 1.0614054, %v3532_v38  ;;  %v3762_v35 = vpop.eup %2948 }
 0x1ab   :  { %v790_v49 = vmul.f32 %v3448_v29, %v758_v60  ;;  %v945_v19 = vadd.f32 0.2548296, %v913_v0  ;;  %v946_v16 = vadd.f32 0.2548296, %v914_v7  ;;  %v915_v24 = vmul.f32 %v3429_v13, %v883_v51 }
 0x1ac   :  { %v884_v8 = vadd.f32 -0.28449672, %v852_v42  ;;  %v1136_v62 = vmul.f32 %v4667_v58, %v976_v25  ;;  %1427 = vadd.xlane.f32.xlu0 %v1391_v40  ;;  %v885_v10 = vadd.f32 -0.28449672, %v853_v47  ;;  %v759_v5 = vadd.f32 -1.4531521, %v727_v28 }
 0x1ad   :  { %v822_v21 = vadd.f32 1.4214138, %v790_v49  ;;  %v977_v4 = vmul.f32 %v3377_v18, %v945_v19  ;;  %v978_v43 = vmul.f32 %v3395_v11, %v946_v16  ;;  %v947_v32 = vadd.f32 0.2548296, %v915_v24  ;;  %v4669_v40 = vld [vmem:[#allocation31_spill] sm:$0xff]  ;;  %v4670_v18 = vld [vmem:[#allocation22_spill] sm:$0xff] }
 0x1ae   :  { %v916_v60 = vmul.f32 %v3478_v23, %v884_v8  ;;  %v1168_v0 = vsub.f32 1.0, %v1136_v62  ;;  %v917_v7 = vmul.f32 %v3425_v2, %v885_v10  ;;  %v791_v42 = vmul.f32 %v3532_v38, %v759_v5  ;;  %v4671_v62 = vld [vmem:[#allocation40_spill] sm:$0xff] }
 0x1af   :  { %v854_v51 = vmul.f32 %v3448_v29, %v822_v21  ;;  %v1137_v25 = vmul.f32 %v4668_v36, %v977_v4  ;;  %v1138_v47 = vmul.f32 %v4669_v40, %v978_v43  ;;  %v979_v49 = vmul.f32 %v3429_v13, %v947_v32  ;;  %v4672_v13 = vld [vmem:[#allocation18_spill] sm:$0xff]  ;;  %v4673_v32 = vld [vmem:[#allocation20_spill] sm:$0xff] }
 0x1b0   :  { %v948_v28 = vadd.f32 0.2548296, %v916_v60  ;;  %v1200_v19 = vmul.f32 %v1168_v0, %v4670_v18  ;;  %v949_v11 = vadd.f32 0.2548296, %v917_v7  ;;  %v823_v24 = vadd.f32 1.4214138, %v791_v42 }
 0x1b1   :  { %v886_v16 = vadd.f32 -0.28449672, %v854_v51  ;;  %v1169_v8 = vsub.f32 1.0, %v1137_v25  ;;  %v1170_v58 = vsub.f32 1.0, %v1138_v47  ;;  %v1139_v10 = vmul.f32 %v4671_v62, %v979_v49  ;;  %v4674_v51 = vld [vmem:[#allocation21_spill] sm:$0xff]  ;;  %v4675_v25 = vld [vmem:[#allocation39_spill] sm:$0xff] }
 0x1b2   :  { %v980_v21 = vmul.f32 %v3478_v23, %v948_v28  ;;  %v1232_v22 = vadd.f32 1.0, %v1200_v19  ;;  %v981_v5 = vmul.f32 %v3425_v2, %v949_v11  ;;  %v855_v4 = vmul.f32 %v3532_v38, %v823_v24  ;;  %v4676_v28 = vld [vmem:[#allocation30_spill] sm:$0xff]  ;;  %v2794_v24 = vld [vmem:[#allocation8 + $0x20] ss:$16 sps:$4 sm:$0xff]  }
 0x1b3   :  { %v918_v36 = vmul.f32 %v3448_v29, %v886_v16  ;;  %v1201_v43 = vmul.f32 %v1169_v8, %v4672_v13  ;;  %v1202_v60 = vmul.f32 %v1170_v58, %v4673_v32  ;;  %v1171_v0 = vsub.f32 1.0, %v1139_v10  ;;  %v2796_v8 = vld [vmem:[#allocation8 + $0x24] ss:$16 sps:$4 sm:$0xff]   ;;  %v2797_v13 = vld [vmem:[#allocation8 + $0x28] ss:$16 sps:$4 sm:$0xff]  }
 0x1b4   :  { %v1140_v7 = vmul.f32 %v3488_v33, %v980_v21  ;;  %v3784_v42 = vmul.f32 %v1232_v22, %v4674_v51  ;;  %v1141_v40 = vmul.f32 %v4675_v25, %v981_v5  ;;  %v887_v47 = vadd.f32 -0.28449672, %v855_v4  ;;  %v4677_v58 = vld [vmem:[#allocation15_spill] sm:$0xff]  ;;  %v4678_v10 = vld [vmem:[#allocation17_spill] sm:$0xff]  ;;  %v4681_v32 = vld [vmem:[#allocation28_spill] sm:$0xff]  ;;  %2075 = vmatprep.subr.bf16.mxu1 %v2796_v8 }
 0x1b5   :  { %v950_v23 = vadd.f32 0.2548296, %v918_v36  ;;  %v1233_v49 = vadd.f32 1.0, %v1201_v43  ;;  %v1234_v2 = vadd.f32 1.0, %v1202_v60  ;;  %v1203_v18 = vmul.f32 %v1171_v0, %v4676_v28  ;;  %v4680_v36 = vld [vmem:[#allocation35_spill] sm:$0xff]  ;;  %v4682_v0 = vld [vmem:[#allocation44_spill] sm:$0xff]  ;;  %2076 = vmatpush1.bf16.msra.mxu1 %v2794_v24 }
 0x1b6   :  { %v1172_v19 = vsub.f32 1.0, %v1140_v7  ;;  %1301 = vadd.xlane.f32.xlu1 %v3784_v42  ;;  %v1392_v11 = vmul.f32 %v3784_v42, %v3784_v42  ;;  %v1173_v16 = vsub.f32 1.0, %v1141_v40  ;;  %v919_v22 = vmul.f32 %v3532_v38, %v887_v47  ;;  %v2799_v43 = vld [vmem:[#allocation8 + $0x2c] ss:$16 sps:$4 sm:$0xff]  }
 0x1b7   :  { %v982_v33 = vmul.f32 %v3448_v29, %v950_v23  ;;  %v3794_v62 = vmul.f32 %v1233_v49, %v4677_v58  ;;  %v3797_v21 = vmul.f32 %v1234_v2, %v4678_v10  ;;  %v1235_v5 = vadd.f32 1.0, %v1203_v18  ;;  %v4683_v23 = vld [vmem:[#allocation24_spill] sm:$0xff]  ;;  %2268 = vmatprep.subr.bf16.mxu0 %v2799_v43  ;;  %v2800_v10 = vld [vmem:[#allocation8 + $0x40] ss:$16 sps:$4 sm:$0xff]   ;;  %v2802_v43 = vld [vmem:[#allocation8 + $0x44] ss:$16 sps:$4 sm:$0xff]  }
 0x1b8   :  { %v1204_v4 = vmul.f32 %v1172_v19, %v4680_v36  ;;  %v1205_v60 = vmul.f32 %v1173_v16, %v4681_v32  ;;  %v951_v29 = vadd.f32 0.2548296, %v919_v22  ;;  %v728_v51 = vmul.f32 1.0614054, %v3561_v46  ;;  %v4685_v16 = vld [vmem:[#allocation33_spill] sm:$0xff]  ;;  %2269 = vmatpush1.bf16.msra.mxu0 %v2797_v13  ;;  %v4688_v36 = vld [vmem:[#allocation32_spill] sm:$0xff]  ;;  %2077 = vmatprep.subr.bf16.mxu1 %v2802_v43 }
 0x1b9   :  { %4679 = vst [vmem:[#allocation19_spill] sm:$0xff] %v3797_v21  ;;  %v1142_v7 = vmul.f32 %v4682_v0, %v982_v33  ;;  %1303 = vadd.xlane.f32.xlu0 %v3794_v62  ;;  %v1393_v25 = vmul.f32 %v3794_v62, %v3794_v62  ;;  %v1394_v40 = vmul.f32 %v3797_v21, %v3797_v21  ;;  %v729_v8 = vmul.f32 1.0614054, %v3529_v59  ;;  %v2803_v32 = vld [vmem:[#allocation8 + $0x48] ss:$16 sps:$4 sm:$0xff]  }
 0x1ba   :  { %v3809_v47 = vmul.f32 %v1235_v5, %v4683_v23  ;;  %v1236_v49 = vadd.f32 1.0, %v1204_v4  ;;  %1429 = vadd.xlane.f32.xlu1 %v1392_v11  ;;  %v1237_v2 = vadd.f32 1.0, %v1205_v60  ;;  %v983_v18 = vmul.f32 %v3532_v38, %v951_v29  ;;  %v4687_v11 = vld [vmem:[#allocation23_spill] sm:$0xff]  ;;  %v2805_v60 = vld [vmem:[#allocation8 + $0x4c] ss:$16 sps:$4 sm:$0xff]   ;;  %2078 = vmatpush1.bf16.msra.mxu1 %v2800_v10 }
 0x1bb   :  { %v1174_v28 = vsub.f32 1.0, %v1142_v7  ;;  %v760_v19 = vadd.f32 -1.4531521, %v728_v51  ;;  %v730_v58 = vmul.f32 1.0614054, %v3554_v45  ;;  %v4689_v29 = vld [vmem:[#allocation50_spill] sm:$0xff]  ;;  %2270 = vmatprep.subr.bf16.mxu0 %v2805_v60 }
 0x1bc   :  { %4684 = vst [vmem:[#allocation16_spill] sm:$0xff] %v3809_v47  ;;  %v3813_v33 = vmul.f32 %v1236_v49, %v4685_v16  ;;  %v3817_v22 = vmul.f32 %v3809_v47, %v3809_v47  ;;  %v3822_v5 = vmul.f32 %v1237_v2, %v4687_v11  ;;  %v1143_v24 = vmul.f32 %v3544_v48, %v983_v18  ;;  %v2809_v43 = vld [vmem:[#allocation8 + $0x68] ss:$16 sps:$4 sm:$0xff]  }
 0x1bd   :  { %v1206_v38 = vmul.f32 %v1174_v28, %v4688_v36  ;;  %v792_v4 = vmul.f32 %v3561_v46, %v760_v19  ;;  %1431 = vadd.xlane.f32.xlu0 %v1393_v25  ;;  %v761_v7 = vadd.f32 -1.4531521, %v729_v8  ;;  %v762_v13 = vadd.f32 -1.4531521, %v730_v58  ;;  %v2806_v28 = vld [vmem:[#allocation8 + $0x60] ss:$16 sps:$4 sm:$0xff]   ;;  %2271 = vmatpush1.bf16.msra.mxu0 %v2803_v32 }
 0x1be   :  { %4686 = vst [vmem:[#allocation36_spill] sm:$0xff] %v3813_v33  ;;  %v3829_v0 = vmul.f32 %v3813_v33, %v3813_v33  ;;  %v731_v51 = vmul.f32 1.0614054, %v4689_v29  ;;  %1305 = vadd.xlane.f32.xlu1 %v3797_v21  ;;  %v3835_v48 = vmul.f32 %v3822_v5, %v3822_v5  ;;  %v1175_v49 = vsub.f32 1.0, %v1143_v24  ;;  %v2808_v8 = vld [vmem:[#allocation8 + $0x64] ss:$16 sps:$4 sm:$0xff]  }
 0x1bf   :  { %v1238_v23 = vadd.f32 1.0, %v1206_v38  ;;  %v824_v2 = vadd.f32 1.4214138, %v792_v4  ;;  %v793_v25 = vmul.f32 %v3529_v59, %v761_v7  ;;  %v794_v18 = vmul.f32 %v3554_v45, %v762_v13  ;;  %v4690_v58 = vld [vmem:[#allocation25_spill] sm:$0xff]  ;;  %v2811_v7 = vld [vmem:[#allocation8 + $0x6c] ss:$16 sps:$4 sm:$0xff]   ;;  %2079 = vmatprep.subr.bf16.mxu1 %v2808_v8 }
 0x1c0   :  { %v763_v19 = vadd.f32 -1.4531521, %v731_v51  ;;  %v732_v16 = vmul.f32 1.0614054, %v3514_v34  ;;  %v1207_v36 = vmul.f32 %v1175_v49, %v3491_v3  ;;  %v4691_v24 = vld [vmem:[#allocation45_spill] sm:$0xff]  ;;  %2272 = vmatprep.subr.bf16.mxu0 %v2811_v7  ;;  %2080 = vmatpush1.bf16.msra.mxu1 %v2806_v28  ;;  %vm518_vm11 = vcmp.ge.f32.partialorder %v3590_v1, 0.0 }
 0x1c1   :  { %v3841_v11 = vmul.f32 %v1238_v23, %v4690_v58  ;;  %v856_v38 = vmul.f32 %v3561_v46, %v824_v2  ;;  %v733_v4 = vmul.f32 1.0614054, %v4691_v24  ;;  %1307 = vadd.xlane.f32.xlu0 %v3809_v47  ;;  %v825_v13 = vadd.f32 1.4214138, %v793_v25  ;;  %2273 = vmatpush1.bf16.msra.mxu0 %v2809_v43  ;;  %v2817_v7 = vld [vmem:[#allocation8 + $0x8c] ss:$16 sps:$4 sm:$0xff]  }
 0x1c2   :  { %v826_v51 = vadd.f32 1.4214138, %v794_v18  ;;  %v795_v60 = vmul.f32 %v4689_v29, %v763_v19  ;;  %v764_v10 = vadd.f32 -1.4531521, %v732_v16  ;;  %1433 = vadd.xlane.f32.xlu1 %v1394_v40  ;;  %v1239_v3 = vadd.f32 1.0, %v1207_v36  ;;  %v4692_v16 = vld [vmem:[#allocation47_spill] sm:$0xff]  ;;  %2274 = vmatprep.subr.bf16.mxu0 %v2817_v7 }
 0x1c3   :  { %v3850_v23 = vmul.f32 %v3841_v11, %v3841_v11  ;;  %v888_v49 = vadd.f32 -0.28449672, %v856_v38  ;;  %v765_v2 = vadd.f32 -1.4531521, %v733_v4  ;;  %v857_v32 = vmul.f32 %v3529_v59, %v825_v13  ;;  %v2812_v18 = vld [vmem:[#allocation8 + $0x80] ss:$16 sps:$4 sm:$0xff]  }
 0x1c4   :  { %v858_v58 = vmul.f32 %v3554_v45, %v826_v51  ;;  %v827_v47 = vadd.f32 1.4214138, %v795_v60  ;;  %v796_v25 = vmul.f32 %v3514_v34, %v764_v10  ;;  %v2814_v19 = vld [vmem:[#allocation8 + $0x84] ss:$16 sps:$4 sm:$0xff]   ;;  %v3856_v40 = vmul.f32 %v1239_v3, %v4692_v16  ;;  %v2815_v4 = vld [vmem:[#allocation8 + $0x88] ss:$16 sps:$4 sm:$0xff]  }
 0x1c5   :  { %v920_v8 = vmul.f32 %v3561_v46, %v888_v49  ;;  %v797_v36 = vmul.f32 %v4691_v24, %v765_v2  ;;  %v734_v38 = vmul.f32 1.0614054, %v3499_v44  ;;  %1435 = vadd.xlane.f32.xlu0 %v3817_v22  ;;  %v889_v13 = vadd.f32 -0.28449672, %v857_v32  ;;  %2081 = vmatprep.subr.bf16.mxu1 %v2814_v19  ;;  %v2823_v7 = vld [vmem:[#allocation8 + $0xac] ss:$16 sps:$4 sm:$0xff]  }
 0x1c6   :  { %v890_v51 = vadd.f32 -0.28449672, %v858_v58  ;;  %v859_v28 = vmul.f32 %v4689_v29, %v827_v47  ;;  %v828_v60 = vadd.f32 1.4214138, %v796_v25  ;;  %1309 = vadd.xlane.f32.xlu1 %v3813_v33  ;;  %v3866_v3 = vmul.f32 %v3856_v40, %v3856_v40  ;;  %2082 = vmatpush1.bf16.msra.mxu1 %v2812_v18  ;;  %v2818_v47 = vld [vmem:[#allocation8 + $0xa0] ss:$16 sps:$4 sm:$0xff]  }
 0x1c7   :  { %v952_v10 = vadd.f32 0.2548296, %v920_v8  ;;  %v829_v49 = vadd.f32 1.4214138, %v797_v36  ;;  %v766_v2 = vadd.f32 -1.4531521, %v734_v38  ;;  %v921_v43 = vmul.f32 %v3529_v59, %v889_v13  ;;  %2275 = vmatpush1.bf16.msra.mxu0 %v2815_v4 }
 0x1c8   :  { %v922_v22 = vmul.f32 %v3554_v45, %v890_v51  ;;  %v891_v32 = vadd.f32 -0.28449672, %v859_v28  ;;  %v860_v58 = vmul.f32 %v3514_v34, %v828_v60  ;;  %v2820_v25 = vld [vmem:[#allocation8 + $0xa4] ss:$16 sps:$4 sm:$0xff]   ;;  %v735_v36 = vmul.f32 1.0614054, %v3587_v15  ;;  %2276 = vmatprep.subr.bf16.mxu0 %v2823_v7 }
 0x1c9   :  { %v984_v19 = vmul.f32 %v3561_v46, %v952_v10  ;;  %v861_v16 = vmul.f32 %v4691_v24, %v829_v49  ;;  %v798_v8 = vmul.f32 %v3499_v44, %v766_v2  ;;  %v2821_v38 = vld [vmem:[#allocation8 + $0xa8] ss:$16 sps:$4 sm:$0xff]   ;;  %1311 = vadd.xlane.f32.xlu0 %v3822_v5  ;;  %v953_v13 = vadd.f32 0.2548296, %v921_v43  ;;  %2083 = vmatprep.subr.bf16.mxu1 %v2820_v25  ;;  %v4693_v46 = vld [vmem:[#allocation71_spill] sm:$0xff] }
 0x1ca   :  { %v954_v51 = vadd.f32 0.2548296, %v922_v22  ;;  %v923_v28 = vmul.f32 %v4689_v29, %v891_v32  ;;  %v892_v18 = vadd.f32 -0.28449672, %v860_v58  ;;  %1437 = vadd.xlane.f32.xlu1 %v3829_v0  ;;  %v767_v2 = vadd.f32 -1.4531521, %v735_v36  ;;  %2084 = vmatpush1.bf16.msra.mxu1 %v2818_v47 }
 0x1cb   :  { %v1144_v60 = vmul.f32 %v4693_v46, %v984_v19  ;;  %v893_v10 = vadd.f32 -0.28449672, %v861_v16  ;;  %v830_v49 = vadd.f32 1.4214138, %v798_v8  ;;  %v985_v4 = vmul.f32 %v3529_v59, %v953_v13  ;;  %2277 = vmatpush1.bf16.msra.mxu0 %v2821_v38  ;;  %v4694_v25 = vld [vmem:[#allocation64_spill] sm:$0xff]  ;;  %v4695_v16 = vld [vmem:[#allocation69_spill] sm:$0xff] }
 0x1cc   :  { %v986_v33 = vmul.f32 %v3554_v45, %v954_v51  ;;  %v955_v21 = vadd.f32 0.2548296, %v923_v28  ;;  %v924_v43 = vmul.f32 %v3514_v34, %v892_v18  ;;  %v799_v0 = vmul.f32 %v3587_v15, %v767_v2  ;;  %v4696_v47 = vld [vmem:[#allocation55_spill] sm:$0xff]  ;;  %v4697_v46 = vld [vmem:[#allocation52_spill] sm:$0xff]  ;;  %v4698_v2 = vld [vmem:[#allocation49_spill] sm:$0xff] }
 0x1cd   :  { %v1176_v22 = vsub.f32 1.0, %v1144_v60  ;;  %v925_v32 = vmul.f32 %v4691_v24, %v893_v10  ;;  %v862_v58 = vmul.f32 %v3499_v44, %v830_v49  ;;  %1439 = vadd.xlane.f32.xlu0 %v3835_v48  ;;  %v1145_v19 = vmul.f32 %v4694_v25, %v985_v4  ;;  %v2826_v49 = vld [vmem:[#allocation8 + $0xc4] ss:$16 sps:$4 sm:$0xff]   ;;  %v2827_v25 = vld [vmem:[#allocation8 + $0xc8] ss:$16 sps:$4 sm:$0xff]  }
 0x1ce   :  { %v1146_v59 = vmul.f32 %v4695_v16, %v986_v33  ;;  %v987_v45 = vmul.f32 %v4689_v29, %v955_v21  ;;  %v956_v8 = vadd.f32 0.2548296, %v924_v43  ;;  %1313 = vadd.xlane.f32.xlu1 %v3841_v11  ;;  %v831_v51 = vadd.f32 1.4214138, %v799_v0  ;;  %v2824_v29 = vld [vmem:[#allocation8 + $0xc0] ss:$16 sps:$4 sm:$0xff]   ;;  %2085 = vmatprep.subr.bf16.mxu1 %v2826_v49 }
 0x1cf   :  { %v1208_v36 = vmul.f32 %v1176_v22, %v4696_v47  ;;  %v957_v7 = vadd.f32 0.2548296, %v925_v32  ;;  %v894_v13 = vadd.f32 -0.28449672, %v862_v58  ;;  %v1177_v28 = vsub.f32 1.0, %v1145_v19  ;;  %v4699_v43 = vld [vmem:[#allocation54_spill] sm:$0xff]  ;;  %2086 = vmatpush1.bf16.msra.mxu1 %v2824_v29 }
 0x1d0   :  { %v1178_v18 = vsub.f32 1.0, %v1146_v59  ;;  %v1147_v38 = vmul.f32 %v4697_v46, %v987_v45  ;;  %v988_v48 = vmul.f32 %v3514_v34, %v956_v8  ;;  %v863_v21 = vmul.f32 %v3587_v15, %v831_v51  ;;  %v4700_v58 = vld [vmem:[#allocation60_spill] sm:$0xff]  ;;  %v4705_v29 = vld [vmem:[#allocation43_spill] sm:$0xff] }
 0x1d1   :  { %v1240_v60 = vadd.f32 1.0, %v1208_v36  ;;  %v989_v10 = vmul.f32 %v4691_v24, %v957_v7  ;;  %v926_v33 = vmul.f32 %v3499_v44, %v894_v13  ;;  %1315 = vadd.xlane.f32.xlu0 %v3856_v40  ;;  %v1209_v4 = vmul.f32 %v1177_v28, %v4698_v2  ;;  %v2829_v34 = vld [vmem:[#allocation8 + $0xcc] ss:$16 sps:$4 sm:$0xff]   ;;  %v4701_v24 = vld [vmem:[#allocation53_spill] sm:$0xff] }
 0x1d2   :  { %v1210_v22 = vmul.f32 %v1178_v18, %v4699_v43  ;;  %v1179_v32 = vsub.f32 1.0, %v1147_v38  ;;  %v1148_v0 = vmul.f32 %v4700_v58, %v988_v48  ;;  %1441 = vadd.xlane.f32.xlu1 %v3850_v23  ;;  %v4702_v16 = vld [vmem:[#allocation48_spill] sm:$0xff]  ;;  %v895_v8 = vadd.f32 -0.28449672, %v863_v21  ;;  %v4703_v7 = vld [vmem:[#allocation37_spill] sm:$0xff]  ;;  %2278 = vmatprep.subr.bf16.mxu0 %v2829_v34 }
 0x1d3   :  { %v3902_v19 = vmul.f32 %v1240_v60, %v4701_v24  ;;  %v1149_v59 = vmul.f32 %v4702_v16, %v989_v10  ;;  %v958_v45 = vadd.f32 0.2548296, %v926_v33  ;;  %v1241_v47 = vadd.f32 1.0, %v1209_v4  ;;  %v2830_v28 = vld [vmem:[#allocation8 + $0xe0] ss:$16 sps:$4 sm:$0xff]   ;;  %2279 = vmatpush1.bf16.msra.mxu0 %v2827_v25  ;;  %v4704_v10 = vld [vmem:[#allocation46_spill] sm:$0xff] }
 0x1d4   :  { %v1242_v36 = vadd.f32 1.0, %v1210_v22  ;;  %v1211_v13 = vmul.f32 %v1179_v32, %v4703_v7  ;;  %v1180_v51 = vsub.f32 1.0, %v1148_v0  ;;  %v927_v46 = vmul.f32 %v3587_v15, %v895_v8  ;;  %v2832_v38 = vld [vmem:[#allocation8 + $0xe4] ss:$16 sps:$4 sm:$0xff]   ;;  %v2833_v48 = vld [vmem:[#allocation8 + $0xe8] ss:$16 sps:$4 sm:$0xff]  }
 0x1d5   :  { %v1181_v18 = vsub.f32 1.0, %v1149_v59  ;;  %v990_v23 = vmul.f32 %v3499_v44, %v958_v45  ;;  %v648_v60 = vadd.f32 1.0, %v3720_v14  ;;  %1443 = vadd.xlane.f32.xlu0 %v3866_v3  ;;  %v3912_v33 = vmul.f32 %v1241_v47, %v4704_v10  ;;  %v2835_v2 = vld [vmem:[#allocation8 + $0xec] ss:$16 sps:$4 sm:$0xff]   ;;  %2087 = vmatprep.subr.bf16.mxu1 %v2832_v38  ;;  %v4708_v3 = vld [vmem:[#allocation51_spill] sm:$0xff] }
 0x1d6   :  { %v1243_v21 = vadd.f32 1.0, %v1211_v13  ;;  %v1212_v49 = vmul.f32 %v1180_v51, %v4705_v29  ;;  %1317 = vadd.xlane.f32.xlu1 %v3902_v19  ;;  %v4707_v4 = vld [vmem:[#allocation56_spill] sm:$0xff]  ;;  %v959_v22 = vadd.f32 0.2548296, %v927_v46  ;;  %v736_v32 = vmul.f32 1.0614054, %v3633_v12  ;;  %2280 = vmatprep.subr.bf16.mxu0 %v2835_v2 }
 0x1d7   :  { %v1213_v44 = vmul.f32 %v1181_v18, %v4706_v27  ;;  %v1150_v43 = vmul.f32 %v4707_v4, %v990_v23  ;;  %v1400_v14 = vmul.f32 %v3902_v19, %v3902_v19  ;;  %v3922_v58 = vmul.f32 %v1242_v36, %v4708_v3  ;;  %v4709_v0 = vld [vmem:[#allocation34_spill] sm:$0xff]  ;;  %2088 = vmatpush1.bf16.msra.mxu1 %v2830_v28  ;;  %v4713_v18 = vld [vmem:[#allocation41_spill] sm:$0xff] }
 0x1d8   :  { %v3925_v25 = vmul.f32 %v1243_v21, %v4709_v0  ;;  %v1244_v34 = vadd.f32 1.0, %v1212_v49  ;;  %v991_v59 = vmul.f32 %v3587_v15, %v959_v22  ;;  %v768_v45 = vadd.f32 -1.4531521, %v736_v32  ;;  %2281 = vmatpush1.bf16.msra.mxu0 %v2833_v48  ;;  %v4711_v36 = vld [vmem:[#allocation74_spill] sm:$0xff]  ;;  %v4714_v21 = vld [vmem:[#allocation13_spill] sm:$0xff]  ;;  %v3955_v22 = vpop.eup %2950 }
 0x1d9   :  { %v1245_v24 = vadd.f32 1.0, %v1213_v44  ;;  %v1182_v16 = vsub.f32 1.0, %v1150_v43  ;;  %v4710_v8 = vsub.f32 0.0, %v3669_v17  ;;  %2952 = vrcp.f32 %v648_v60  ;;  %1319 = vadd.xlane.f32.xlu0 %v3912_v33  ;;  %v4712_v28 = vld [vmem:[#allocation42_spill] sm:$0xff] }
 0x1da   :  { %v737_v7 = vmul.f32 1.0614054, %v4711_v36  ;;  %v738_v13 = vmul.f32 1.0614054, %v3603_v37  ;;  %1445 = vadd.xlane.f32.xlu1 %v1400_v14  ;;  %v1401_v51 = vmul.f32 %v3912_v33, %v3912_v33  ;;  %v3939_v15 = vmul.f32 %v1244_v34, %v4712_v28 }
 0x1db   :  { %v3931_v47 = vmul.f32 %v4710_v8, %v3669_v17  ;;  %v1214_v23 = vmul.f32 %v1182_v16, %v4713_v18  ;;  %v800_v46 = vmul.f32 %v3633_v12, %v768_v45  ;;  %v1402_v17 = vmul.f32 %v3922_v58, %v3922_v58 }
 0x1dc   :  { %v769_v38 = vadd.f32 -1.4531521, %v737_v7  ;;  %v770_v48 = vadd.f32 -1.4531521, %v738_v13  ;;  %v739_v60 = vmul.f32 1.0614054, %v3666_v26  ;;  %v1403_v10 = vmul.f32 %v3925_v25, %v3925_v25 }
 0x1dd   :  { %v3949_v29 = vmul.f32 %v1245_v24, %v4714_v21  ;;  %v1151_v49 = vmul.f32 %v3601_v61, %v991_v59  ;;  %v832_v2 = vadd.f32 1.4214138, %v800_v46  ;;  %1447 = vadd.xlane.f32.xlu0 %v1401_v51  ;;  %v740_v43 = vmul.f32 1.0614054, %v3733_v20 }
 0x1de   :  { %v801_v27 = vmul.f32 %v4711_v36, %v769_v38  ;;  %v802_v44 = vmul.f32 %v3603_v37, %v770_v48  ;;  %v771_v4 = vadd.f32 -1.4531521, %v739_v60  ;;  %1321 = vadd.xlane.f32.xlu1 %v3922_v58  ;;  %v1404_v32 = vmul.f32 %v3939_v15, %v3939_v15 }
 0x1df   :  { %v1246_v14 = vadd.f32 1.0, %v1214_v23  ;;  %v864_v3 = vmul.f32 %v3633_v12, %v832_v2  ;;  %v741_v61 = vmul.f32 1.0614054, %v3654_v31  ;;  %v772_v16 = vadd.f32 -1.4531521, %v740_v43  ;;  %v4715_v23 = vld [vmem:[#allocation38_spill] sm:$0xff] }
 0x1e0   :  { %v833_v0 = vadd.f32 1.4214138, %v801_v27  ;;  %v834_v34 = vadd.f32 1.4214138, %v802_v44  ;;  %v803_v24 = vmul.f32 %v3666_v26, %v771_v4  ;;  %v1405_v59 = vmul.f32 %v3949_v29, %v3949_v29  ;;  %v4716_v4 = vld [vmem:[#allocation62_spill] sm:$0xff] }
 0x1e1   :  { %v1183_v45 = vsub.f32 1.0, %v1151_v49  ;;  %v896_v8 = vadd.f32 -0.28449672, %v864_v3  ;;  %v773_v7 = vadd.f32 -1.4531521, %v741_v61  ;;  %1323 = vadd.xlane.f32.xlu0 %v3925_v25  ;;  %v804_v18 = vmul.f32 %v3733_v20, %v772_v16 }
 0x1e2   :  { %v865_v13 = vmul.f32 %v4711_v36, %v833_v0  ;;  %v866_v51 = vmul.f32 %v3603_v37, %v834_v34  ;;  %v835_v28 = vadd.f32 1.4214138, %v803_v24  ;;  %1449 = vadd.xlane.f32.xlu1 %v1402_v17  ;;  %v3970_v46 = vmul.f32 %v1246_v14, %v4715_v23 }
 0x1e3   :  { %v928_v38 = vmul.f32 %v3633_v12, %v896_v8  ;;  %v805_v48 = vmul.f32 %v3654_v31, %v773_v7  ;;  %v742_v60 = vmul.f32 1.0614054, %v3730_v52  ;;  %v3975_v21 = vpop.eup %2952  ;;  %v836_v44 = vadd.f32 1.4214138, %v804_v18  ;;  %v4717_v18 = vld [vmem:[#allocation67_spill] sm:$0xff] }
 0x1e4   :  { %v897_v49 = vadd.f32 -0.28449672, %v865_v13  ;;  %v898_v2 = vadd.f32 -0.28449672, %v866_v51  ;;  %v867_v27 = vmul.f32 %v3666_v26, %v835_v28  ;;  %v1215_v43 = vmul.f32 %v1183_v45, %v4716_v4 }
 0x1e5   :  { %v960_v3 = vadd.f32 0.2548296, %v928_v38  ;;  %v837_v17 = vadd.f32 1.4214138, %v805_v48  ;;  %v774_v61 = vadd.f32 -1.4531521, %v742_v60  ;;  %1451 = vadd.xlane.f32.xlu0 %v1403_v10  ;;  %v868_v24 = vmul.f32 %v3733_v20, %v836_v44 }
 0x1e6   :  { %v929_v14 = vmul.f32 %v4711_v36, %v897_v49  ;;  %v930_v0 = vmul.f32 %v3603_v37, %v898_v2  ;;  %v899_v34 = vadd.f32 -0.28449672, %v867_v27  ;;  %1325 = vadd.xlane.f32.xlu1 %v3939_v15  ;;  %v743_v45 = vmul.f32 1.0614054, %v3762_v35 }
 0x1e7   :  { %v992_v16 = vmul.f32 %v3633_v12, %v960_v3  ;;  %v869_v8 = vmul.f32 %v3654_v31, %v837_v17  ;;  %v806_v7 = vmul.f32 %v3730_v52, %v774_v61  ;;  %v900_v28 = vadd.f32 -0.28449672, %v868_v24  ;;  %v4718_v61 = vld [vmem:[#allocation75_spill] sm:$0xff] }
 0x1e8   :  { %v961_v13 = vadd.f32 0.2548296, %v929_v14  ;;  %v962_v51 = vadd.f32 0.2548296, %v930_v0  ;;  %v931_v10 = vmul.f32 %v3666_v26, %v899_v34  ;;  %vm515_vm9 = vcmp.ge.f32.partialorder %v4717_v18, 0.0  ;;  %v4719_v34 = vld [vmem:[#allocation68_spill] sm:$0xff] }
 0x1e9   :  { %v1152_v23 = vmul.f32 %v3640_v63, %v992_v16  ;;  %v901_v38 = vadd.f32 -0.28449672, %v869_v8  ;;  %v838_v48 = vadd.f32 1.4214138, %v806_v7  ;;  %v775_v60 = vadd.f32 -1.4531521, %v743_v45  ;;  %1327 = vadd.xlane.f32.xlu0 %v3949_v29 }
 0x1ea   :  { %v993_v12 = vmul.f32 %v4711_v36, %v961_v13  ;;  %v994_v49 = vmul.f32 %v3603_v37, %v962_v51  ;;  %v963_v2 = vadd.f32 0.2548296, %v931_v10  ;;  %v932_v27 = vmul.f32 %v3733_v20, %v900_v28  ;;  %1453 = vadd.xlane.f32.xlu1 %v1404_v32 }
 0x1eb   :  { %v1184_v44 = vsub.f32 1.0, %v1152_v23  ;;  %v933_v4 = vmul.f32 %v3654_v31, %v901_v38  ;;  %v870_v3 = vmul.f32 %v3730_v52, %v838_v48  ;;  %v807_v63 = vmul.f32 %v3762_v35, %v775_v60 }
 0x1ec   :  { %v1247_v17 = vadd.f32 1.0, %v1215_v43  ;;  %v1153_v14 = vmul.f32 %v4718_v61, %v993_v12  ;;  %v1154_v0 = vmul.f32 %v3614_v30, %v994_v49  ;;  %v995_v36 = vmul.f32 %v3666_v26, %v963_v2  ;;  %v4723_v2 = vld [vmem:[#allocation66_spill] sm:$0xff] }
 0x1ed   :  { %v1216_v37 = vmul.f32 %v1184_v44, %v4719_v34  ;;  %v964_v24 = vadd.f32 0.2548296, %v932_v27  ;;  %v902_v16 = vadd.f32 -0.28449672, %v870_v3  ;;  %v839_v8 = vadd.f32 1.4214138, %v807_v63  ;;  %1455 = vadd.xlane.f32.xlu0 %v1405_v59 }
 0x1ee   :  { %v4720_v32 = vsub.f32 0.0, %v3658_v39  ;;  %v1123_v45 = vmul.f32 1.442695, %v3931_v47  ;;  %v1032_v13 = vsub.f32 0.0, %v3705_v54  ;;  %v1185_v43 = vsub.f32 1.0, %v1153_v14  ;;  %1329 = vadd.xlane.f32.xlu1 %v3970_v46  ;;  %v4722_v47 = vld [vmem:[#allocation59_spill] sm:$0xff] }
 0x1ef   :  { %v1186_v30 = vsub.f32 1.0, %v1154_v0  ;;  %v1155_v26 = vmul.f32 %v3725_v55, %v995_v36  ;;  %v965_v51 = vadd.f32 0.2548296, %v933_v4  ;;  %v871_v10 = vmul.f32 %v3762_v35, %v839_v8 }
 0x1f0   :  { %v1065_v7 = vmul.f32 %v4720_v32, %v3658_v39  ;;  %2954 = vpow2.f32 %v3696_v56  ;;  %v1406_v28 = vmul.f32 %v3970_v46, %v3970_v46  ;;  %v4721_v39 = vld [vmem:[#allocation58_spill] sm:$0xff]  ;;  %v1217_v38 = vmul.f32 %v1185_v43, %v4722_v47 }
 0x1f1   :  { %v4013_v23 = vmul.f32 %v1247_v17, %v4721_v39  ;;  %v1248_v59 = vadd.f32 1.0, %v1216_v37  ;;  %v996_v48 = vmul.f32 %v3733_v20, %v964_v24  ;;  %v934_v60 = vmul.f32 %v3730_v52, %v902_v16 }
 0x1f2   :  { %v903_v12 = vadd.f32 -0.28449672, %v871_v10  ;;  %v1127_v55 = vmul.f32 1.442695, %v1065_v7  ;;  %v1034_v49 = vsub.f32 0.0, %v3694_v57  ;;  %v1064_v56 = vmul.f32 %v1032_v13, %v3705_v54  ;;  %1457 = vadd.xlane.f32.xlu1 %v1406_v28  ;;  %v4725_v54 = vld [vmem:[#allocation65_spill] sm:$0xff] }
 0x1f3   :  { %1331 = vadd.xlane.f32.xlu0 %v4013_v23  ;;  %2956 = vpow2.f32 %v1123_v45  ;;  %v1218_v27 = vmul.f32 %v1186_v30, %v4723_v2  ;;  %v1187_v44 = vsub.f32 1.0, %v1155_v26  ;;  %v997_v4 = vmul.f32 %v3654_v31, %v965_v51 }
 0x1f4   :  { %v4724_v20 = vmov -1.0   ;;  %v1407_v63 = vmul.f32 %v4013_v23, %v4013_v23  ;;  %v1249_v17 = vadd.f32 1.0, %v1217_v38  ;;  %v935_v61 = vmul.f32 %v3762_v35, %v903_v12 }
 0x1f5   :  { %v547_v3 = vsel %vm515_vm9, 1.0, %v4724_v20  ;;  %v4031_v14 = vmul.f32 %v1248_v59, %v4725_v54  ;;  %v1156_v0 = vmul.f32 %v3737_v53, %v996_v48  ;;  %v966_v36 = vadd.f32 0.2548296, %v934_v60  ;;  %v4726_v53 = vld [vmem:[#allocation57_spill] sm:$0xff] }
 0x1f6   :  { %v744_v34 = vmul.f32 1.0614054, %v3975_v21  ;;  %v548_v31 = vsel %vm516_vm10, 1.0, %v4724_v20  ;;  %2958 = vpow2.f32 %v1127_v55  ;;  %v1066_v18 = vmul.f32 %v1034_v49, %v3694_v57  ;;  %v4727_v49 = vld [vmem:[#allocation63_spill] sm:$0xff] }
 0x1f7   :  { %v1125_v37 = vmul.f32 1.442695, %v1064_v56  ;;  %1459 = vadd.xlane.f32.xlu0 %v1407_v63  ;;  %1333 = vadd.xlane.f32.xlu1 %v4031_v14  ;;  %v1250_v24 = vadd.f32 1.0, %v1218_v27  ;;  %v1219_v16 = vmul.f32 %v1187_v44, %v547_v3  ;;  %v1157_v8 = vmul.f32 %v3686_v50, %v997_v4 }
 0x1f8   :  { %v776_v32 = vadd.f32 -1.4531521, %v744_v34  ;;  %v4042_v7 = vmul.f32 %v1249_v17, %v4726_v53  ;;  %v967_v45 = vadd.f32 0.2548296, %v935_v61  ;;  %v745_v13 = vmul.f32 1.0614054, %v3752_v41 }
 0x1f9   :  { %v746_v6 = vmul.f32 1.0614054, %v3955_v22  ;;  %v1408_v57 = vmul.f32 %v4031_v14, %v4031_v14  ;;  %v1188_v43 = vsub.f32 1.0, %v1156_v0  ;;  %v998_v30 = vmul.f32 %v3730_v52, %v966_v36  ;;  %v4729_v0 = vld [vmem:[#allocation70_spill] sm:$0xff] }
 0x1fa   :  { %v808_v26 = vmul.f32 %v3975_v21, %v776_v32  ;;  %v2955_v51 = vpop.eup %2954  ;;  %2960 = vpow2.f32 %v1125_v37  ;;  %v777_v50 = vadd.f32 -1.4531521, %v745_v13  ;;  %v1129_v28 = vmul.f32 1.442695, %v1066_v18 }
 0x1fb   :  { %1335 = vadd.xlane.f32.xlu0 %v4042_v7  ;;  %v778_v10 = vadd.f32 -1.4531521, %v746_v6  ;;  %1461 = vadd.xlane.f32.xlu1 %v1408_v57  ;;  %v1251_v39 = vadd.f32 1.0, %v1219_v16  ;;  %v1189_v47 = vsub.f32 1.0, %v1157_v8  ;;  %v3130_v59 = vmov 0   ;;  %v4730_v8 = vld [vmem:[#allocation80_spill] sm:$0xff] }
 0x1fc   :  { %v840_v38 = vadd.f32 1.4214138, %v808_v26  ;;  %2105 = vmatprep.mubr.bf16.mxu1 %v3130_v59  ;;  %v1409_v48 = vmul.f32 %v4042_v7, %v4042_v7  ;;  %v999_v52 = vmul.f32 %v3762_v35, %v967_v45  ;;  %v809_v60 = vmul.f32 %v3752_v41, %v777_v50  ;;  %2298 = vmatprep.mubr.bf16.mxu0 %v3130_v59  ;;  %v4728_v35 = vld [vmem:[#allocation73_spill] sm:$0xff] }
 0x1fd   :  { %v810_v12 = vmul.f32 %v3955_v22, %v778_v10  ;;  %v2957_v55 = vpop.eup %2956  ;;  %v4059_v56 = vmul.f32 %v1250_v24, %v4727_v49  ;;  %v1220_v2 = vmul.f32 %v1188_v43, %v548_v31  ;;  %v1158_v27 = vmul.f32 %v2955_v51, %v998_v30  ;;  %v4731_v45 = vld [vmem:[#allocation61_spill] sm:$0xff] }
 0x1fe   :  { %v872_v44 = vmul.f32 %v3975_v21, %v840_v38  ;;  %v452_v4 = vmul.f32 0.5, %v3594_v9  ;;  %v841_v3 = vadd.f32 1.4214138, %v809_v60  ;;  %2962 = vpow2.f32 %v1129_v28 }
 0x1ff   :  { %1463 = vadd.xlane.f32.xlu0 %v1409_v48  ;;  %v842_v63 = vadd.f32 1.4214138, %v810_v12  ;;  %1337 = vadd.xlane.f32.xlu1 %v4059_v56  ;;  %v1221_v17 = vmul.f32 %v1189_v47, %v4728_v35  ;;  %v4067_v36 = vmul.f32 %v1251_v39, %v4729_v0  ;;  %v1159_v34 = vmul.f32 %v2957_v55, %v999_v52  ;;  %v4732_v52 = vld [vmem:[#allocation85_spill] sm:$0xff]  ;;  %v4733_v12 = vld [vmem:[#allocation72_spill] sm:$0xff]  ;;  %v4734_v35 = vld [vmem:[#allocation78_spill] sm:$0xff] }
 0x200   :  { %v904_v61 = vadd.f32 -0.28449672, %v872_v44  ;;  %v2959_v54 = vpop.eup %2958  ;;  %v873_v31 = vmul.f32 %v3752_v41, %v841_v3  ;;  %v1410_v18 = vmul.f32 %v4059_v56, %v4059_v56  ;;  %v1252_v37 = vadd.f32 1.0, %v1220_v2  ;;  %v4735_v0 = vld [vmem:[#allocation77_spill] sm:$0xff] }
 0x201   :  { %v874_v9 = vmul.f32 %v3955_v22, %v842_v63  ;;  %v1190_v1 = vsub.f32 1.0, %v1158_v27  ;;  %v550_v16 = vsel %vm518_vm11, 1.0, %v4724_v20  ;;  %vm519_vm12 = vcmp.ge.f32.partialorder %v4730_v8, 0.0  ;;  %v4737_v8 = vld [vmem:[#allocation82_spill] sm:$0xff] }
 0x202   :  { %v936_v24 = vmul.f32 %v3975_v21, %v904_v61  ;;  %v905_v32 = vadd.f32 -0.28449672, %v873_v31  ;;  %v453_v13 = vmul.f32 0.5, %v4731_v45  ;;  %v1253_v6 = vadd.f32 1.0, %v1221_v17 }
 0x203   :  { %1339 = vadd.xlane.f32.xlu0 %v4067_v36  ;;  %v906_v53 = vadd.f32 -0.28449672, %v874_v9  ;;  %1465 = vadd.xlane.f32.xlu1 %v1410_v18  ;;  %v1411_v30 = vmul.f32 %v4067_v36, %v4067_v36  ;;  %v1191_v26 = vsub.f32 1.0, %v1159_v34  ;;  %v551_v10 = vsel %vm519_vm12, 1.0, %v4724_v20 }
 0x204   :  { %v968_v57 = vadd.f32 0.2548296, %v936_v24  ;;  %v2961_v43 = vpop.eup %2960  ;;  %v937_v51 = vmul.f32 %v3752_v41, %v905_v32  ;;  %v4083_v28 = vmul.f32 %v1252_v37, %v452_v4  ;;  %v1222_v39 = vmul.f32 %v1190_v1, %v550_v16  ;;  %v4736_v24 = vld [vmem:[#allocation84_spill] sm:$0xff] }
 0x205   :  { %v938_v50 = vmul.f32 %v3955_v22, %v906_v53  ;;  %vm520_vm13 = vcmp.ge.f32.partialorder %v4732_v52, 0.0  ;;  %v454_v55 = vmul.f32 0.5, %v4733_v12  ;;  %v4089_v49 = vmul.f32 %v1253_v6, %v453_v13 }
 0x206   :  { %v1000_v47 = vmul.f32 %v3975_v21, %v968_v57  ;;  %v969_v38 = vadd.f32 0.2548296, %v937_v51  ;;  %v1223_v2 = vmul.f32 %v1191_v26, %v551_v10  ;;  %v1412_v4 = vmul.f32 %v4083_v28, %v4083_v28  ;;  %v4738_v57 = vld [vmem:[#allocation76_spill] sm:$0xff] }
 0x207   :  { %1467 = vadd.xlane.f32.xlu0 %v1411_v30  ;;  %v970_v48 = vadd.f32 0.2548296, %v938_v50  ;;  %1341 = vadd.xlane.f32.xlu1 %v4083_v28  ;;  %v1254_v21 = vadd.f32 1.0, %v1222_v39  ;;  %vm521_vm14 = vcmp.ge.f32.partialorder %v4734_v35, 0.0  ;;  %v552_v17 = vsel %vm520_vm13, 1.0, %v4724_v20  ;;  %v4739_v39 = vld [vmem:[#allocation81_spill] sm:$0xff] }
 0x208   :  { %v1160_v60 = vmul.f32 %v2961_v43, %v1000_v47  ;;  %v1001_v27 = vmul.f32 %v3752_v41, %v969_v38  ;;  %v2963_v44 = vpop.eup %2962  ;;  %v455_v34 = vmul.f32 0.5, %v4735_v0  ;;  %v1413_v41 = vmul.f32 %v4089_v49, %v4089_v49 }
 0x209   :  { %v1002_v63 = vmul.f32 %v3955_v22, %v970_v48  ;;  %v1255_v31 = vadd.f32 1.0, %v1223_v2  ;;  %v553_v18 = vsel %vm521_vm14, 1.0, %v4724_v20  ;;  %v4102_v37 = vmul.f32 %v1254_v21, %v454_v55 }
 0x20a   :  { %v1192_v3 = vsub.f32 1.0, %v1160_v60  ;;  %v1161_v61 = vmul.f32 %v2959_v54, %v1001_v27  ;;  %vm522_vm15 = vcmp.ge.f32.partialorder %v4736_v24, 0.0  ;;  %v456_v32 = vmul.f32 0.5, %v4737_v8 }
 0x20b   :  { %1343 = vadd.xlane.f32.xlu0 %v4089_v49  ;;  %1469 = vadd.xlane.f32.xlu1 %v1412_v4  ;;  %v1162_v1 = vmul.f32 %v2963_v44, %v1002_v63  ;;  %v4106_v54 = vmul.f32 %v1255_v31, %v455_v34  ;;  %v1414_v53 = vmul.f32 %v4102_v37, %v4102_v37  ;;  %v554_v6 = vsel %vm522_vm15, 1.0, %v4724_v20 }
 0x20c   :  { %v1193_v9 = vsub.f32 1.0, %v1161_v61  ;;  %v1224_v22 = vmul.f32 %v1192_v3, %v552_v17  ;;  %v457_v43 = vmul.f32 0.5, %v4738_v57  ;;  %v458_v47 = vmul.f32 0.5, %v4739_v39 }
 0x20d   :  { %v1194_v13 = vsub.f32 1.0, %v1162_v1  ;;  %v1415_v30 = vmul.f32 %v4106_v54, %v4106_v54 }
 0x20e   :  { %v1225_v16 = vmul.f32 %v1193_v9, %v553_v18  ;;  %v1256_v45 = vadd.f32 1.0, %v1224_v22 }
 0x20f   :  { %1471 = vadd.xlane.f32.xlu0 %v1413_v41  ;;  %1345 = vadd.xlane.f32.xlu1 %v4102_v37  ;;  %v1226_v50 = vmul.f32 %v1194_v13, %v554_v6 }
 0x210   :  { %v1257_v26 = vadd.f32 1.0, %v1225_v16  ;;  %v4116_v51 = vmul.f32 %v1256_v45, %v456_v32 }
 0x211   :  { %v1258_v38 = vadd.f32 1.0, %v1226_v50  ;;  %v4740_v50 = vld [vmem:[#allocation79_spill] sm:$0xff] }
 0x212   :  { %v4119_v10 = vmul.f32 %v1257_v26, %v457_v43  ;;  %v1416_v20 = vmul.f32 %v4116_v51, %v4116_v51 }
 0x213   :  { %1347 = vadd.xlane.f32.xlu0 %v4106_v54  ;;  %1473 = vadd.xlane.f32.xlu1 %v1414_v53  ;;  %v4127_v52 = vmul.f32 %v1258_v38, %v458_v47 }
 0x214   :  { %v1417_v48 = vmul.f32 %v4119_v10, %v4119_v10 }
 0x215   :  { %v1418_v12 = vmul.f32 %v4127_v52, %v4127_v52 }
 0x217   :  { %1475 = vadd.xlane.f32.xlu0 %v1415_v30  ;;  %1349 = vadd.xlane.f32.xlu1 %v4116_v51 }
 0x21b   :  { %1351 = vadd.xlane.f32.xlu0 %v4119_v10  ;;  %1477 = vadd.xlane.f32.xlu1 %v1416_v20 }
 0x21f   :  { %1479 = vadd.xlane.f32.xlu0 %v1417_v48  ;;  %1353 = vadd.xlane.f32.xlu1 %v4127_v52 }
 0x220   :  { %v1292_v60 = vpop.xlane.xlu0 %1291 }
 0x221   :  { %v1355_v55 = vmul.f32 0.0078125, %v1292_v60  ;;  %v4138_v60 = vld [vmem:[%s4556_s2 + $0x1] ss:$0 sm:$0xff] }
 0x222   :  { %v1420_v2 = vpop.xlane.xlu1 %1419 }
 0x223   :  { %1481 = vadd.xlane.f32.xlu1 %v1418_v12  ;;  %v1515_v27 = vmul.f32 %v1355_v55, %v1355_v55  ;;  %v1483_v44 = vmul.f32 0.0078125, %v1420_v2  ;;  %v1675_v39 = vsub.f32 %v4740_v50, %v1355_v55  ;;  %v4741_v12 = vld [vmem:[#allocation83_spill] sm:$0xff] }
 0x225   :  { %v1547_v4 = vsub.f32 %v1483_v44, %v1515_v27  ;;  %v1294_v21 = vpop.xlane.xlu0 %1293 }
 0x226   :  { %v1356_v63 = vmul.f32 0.0078125, %v1294_v21 }
 0x227   :  { %v1579_v3 = vmax.f32 %v1547_v4, 0.0  ;;  %v1422_v35 = vpop.xlane.xlu1 %1421 }
 0x228   :  { %v1516_v61 = vmul.f32 %v1356_v63, %v1356_v63  ;;  %v1484_v0 = vmul.f32 0.0078125, %v1422_v35  ;;  %v1676_v2 = vsub.f32 %v4741_v12, %v1356_v63  ;;  %v4147_v35 = vld [vmem:[%s4556_s2 + $0x2] ss:$0 sm:$0xff] }
 0x229   :  { %v1611_v17 = vadd.f32 1e-12, %v1579_v3  ;;  %v1296_v34 = vpop.xlane.xlu0 %1295 }
 0x22a   :  { %v1548_v41 = vsub.f32 %v1484_v0, %v1516_v61  ;;  %v1357_v31 = vmul.f32 0.0078125, %v1296_v34  ;;  %v4742_v0 = vld [vmem:[#allocation86_spill] sm:$0xff] }
 0x22b   :  { %2964 = vrsqrt.f32 %v1611_v17  ;;  %v1298_v9 = vpop.xlane.xlu1 %1297 }
 0x22c   :  { %v1580_v18 = vmax.f32 %v1548_v41, 0.0  ;;  %v1358_v22 = vmul.f32 0.0078125, %v1298_v9  ;;  %v1517_v16 = vmul.f32 %v1357_v31, %v1357_v31  ;;  %v1677_v34 = vsub.f32 %v4742_v0, %v1357_v31 }
 0x22d   :  { %v1424_v1 = vpop.xlane.xlu0 %1423 }
 0x22e   :  { %v1612_v24 = vadd.f32 1e-12, %v1580_v18  ;;  %v1485_v8 = vmul.f32 0.0078125, %v1424_v1  ;;  %v1518_v53 = vmul.f32 %v1358_v22, %v1358_v22  ;;  %v4743_v18 = vld [vmem:[#allocation14_spill] sm:$0xff] }
 0x22f   :  { %v1426_v32 = vpop.xlane.xlu1 %1425  ;;  %v1678_v1 = vsub.f32 %v4743_v18, %v1358_v22 }
 0x230   :  { %2966 = vrsqrt.f32 %v1612_v24  ;;  %v1549_v45 = vsub.f32 %v1485_v8, %v1517_v16  ;;  %v1486_v13 = vmul.f32 0.0078125, %v1426_v32 }
 0x232   :  { %v1581_v6 = vmax.f32 %v1549_v45, 0.0  ;;  %v1550_v57 = vsub.f32 %v1486_v13, %v1518_v53 }
 0x234   :  { %v1613_v30 = vadd.f32 1e-12, %v1581_v6  ;;  %v1582_v26 = vmax.f32 %v1550_v57, 0.0 }
 0x235   :  { %v2965_v43 = vpop.eup %2964  ;;  %v1300_v47 = vpop.xlane.xlu0 %1299 }
 0x236   :  { %2968 = vrsqrt.f32 %v1613_v30  ;;  %v1614_v20 = vadd.f32 1e-12, %v1582_v26  ;;  %v1707_v38 = vmul.f32 %v2965_v43, %v1675_v39  ;;  %v4133_v48 = vmul.f32 0.0078125, %v1300_v47 }
 0x238   :  { %2970 = vrsqrt.f32 %v1614_v20  ;;  %v1519_v55 = vmul.f32 %v4133_v48, %v4133_v48  ;;  %v1743_v3 = vmul.f32 %v4138_v60, %v1707_v38 }
 0x239   :  { %v1428_v27 = vpop.xlane.xlu0 %1427 }
 0x23a   :  { %v2967_v44 = vpop.eup %2966  ;;  %v1487_v4 = vmul.f32 0.0078125, %v1428_v27  ;;  %v1779_v63 = vadd.f32 %v4147_v35, %v1743_v3 }
 0x23b   :  { %v1708_v21 = vmul.f32 %v2967_v44, %v1676_v2 }
 0x23c   :  { %v1551_v17 = vsub.f32 %v1487_v4, %v1519_v55 }
 0x23d   :  { %v1744_v61 = vmul.f32 %v4138_v60, %v1708_v21 }
 0x23e   :  { %v1583_v24 = vmax.f32 %v1551_v17, 0.0 }
 0x23f   :  { %v1780_v41 = vadd.f32 %v4147_v35, %v1744_v61 }
 0x240   :  { %v2969_v9 = vpop.eup %2968  ;;  %v1615_v31 = vadd.f32 1e-12, %v1583_v24 }
 0x241   :  { %v1811_v16 = vpack.c.bf16 %v1780_v41, %v1779_v63  ;;  %v1709_v8 = vmul.f32 %v2969_v9, %v1677_v34 }
 0x242   :  { %v2971_v32 = vpop.eup %2970  ;;  %2972 = vrsqrt.f32 %v1615_v31 }
 0x243   :  { %v1302_v53 = vpop.xlane.xlu1 %1301  ;;  %2106 = vmatmul.mubr.bf16.vlgmr.msra.gmra.mrb[16].mxu1 %v1811_v16  ;;  %2299 = vmatmul.mubr.bf16.vlgmr.msra.gmra.mrb[16].mxu0 %v1811_v16  ;;  %v1710_v45 = vmul.f32 %v2971_v32, %v1678_v1  ;;  %v1745_v13 = vmul.f32 %v4138_v60, %v1709_v8 }
 0x244   :  { %v4155_v6 = vmul.f32 0.0078125, %v1302_v53  ;;  %2115 = vmatprep.mubr.bf16.mxu1 %v3130_v59  ;;  %2308 = vmatprep.mubr.bf16.mxu0 %v3130_v59  ;;  %v4744_v53 = vld [vmem:[#allocation29_spill] sm:$0xff] }
 0x245   :  { %v1746_v57 = vmul.f32 %v4138_v60, %v1710_v45  ;;  %v1781_v26 = vadd.f32 %v4147_v35, %v1745_v13  ;;  %v1679_v45 = vsub.f32 %v4744_v53, %v4133_v48 }
 0x246   :  { %v1304_v22 = vpop.xlane.xlu0 %1303  ;;  %v1520_v39 = vmul.f32 %v4155_v6, %v4155_v6 }
 0x247   :  { %v1430_v43 = vpop.xlane.xlu1 %1429  ;;  %v4160_v30 = vmul.f32 0.0078125, %v1304_v22  ;;  %v1782_v50 = vadd.f32 %v4147_v35, %v1746_v57 }
 0x248   :  { %v1488_v47 = vmul.f32 0.0078125, %v1430_v43 }
 0x249   :  { %v1812_v20 = vpack.c.bf16 %v1782_v50, %v1781_v26  ;;  %v1521_v2 = vmul.f32 %v4160_v30, %v4160_v30 }
 0x24a   :  { %v1552_v38 = vsub.f32 %v1488_v47, %v1520_v39  ;;  %v1432_v12 = vpop.xlane.xlu0 %1431 }
 0x24b   :  { %v1306_v27 = vpop.xlane.xlu1 %1305  ;;  %v1489_v44 = vmul.f32 0.0078125, %v1432_v12  ;;  %2116 = vmatmul.mubr.bf16.gmra.mrb[20].mxu1 %v1812_v20  ;;  %2309 = vmatmul.mubr.bf16.gmra.mrb[20].mxu0 %v1812_v20  ;;  %v1680_v12 = vsub.f32 %v3784_v42, %v4155_v6 }
 0x24c   :  { %v1584_v4 = vmax.f32 %v1552_v38, 0.0  ;;  %v4168_v21 = vmul.f32 0.0078125, %v1306_v27  ;;  %2125 = vmatprep.mubr.bf16.mxu1 %v3130_v59  ;;  %2318 = vmatprep.mubr.bf16.mxu0 %v3130_v59  ;;  %v2973_v24 = vpop.eup %2972 }
 0x24d   :  { %v1553_v55 = vsub.f32 %v1489_v44, %v1521_v2  ;;  %v1711_v26 = vmul.f32 %v2973_v24, %v1679_v45 }
 0x24e   :  { %v1616_v3 = vadd.f32 1e-12, %v1584_v4  ;;  %v1308_v17 = vpop.xlane.xlu0 %1307  ;;  %v1522_v63 = vmul.f32 %v4168_v21, %v4168_v21 }
 0x24f   :  { %v1585_v61 = vmax.f32 %v1553_v55, 0.0  ;;  %v1434_v0 = vpop.xlane.xlu1 %1433  ;;  %v4172_v34 = vmul.f32 0.0078125, %v1308_v17  ;;  %v1747_v4 = vmul.f32 %v4138_v60, %v1711_v26 }
 0x250   :  { %2974 = vrsqrt.f32 %v1616_v3  ;;  %v1490_v41 = vmul.f32 0.0078125, %v1434_v0  ;;  %v1681_v0 = vsub.f32 %v3794_v62, %v4160_v30 }
 0x251   :  { %v1617_v9 = vadd.f32 1e-12, %v1585_v61  ;;  %v1523_v16 = vmul.f32 %v4172_v34, %v4172_v34  ;;  %v1783_v53 = vadd.f32 %v4147_v35, %v1747_v4 }
 0x252   :  { %v1554_v18 = vsub.f32 %v1490_v41, %v1522_v63  ;;  %v1436_v1 = vpop.xlane.xlu0 %1435 }
 0x253   :  { %2976 = vrsqrt.f32 %v1617_v9  ;;  %v1310_v8 = vpop.xlane.xlu1 %1309  ;;  %v1491_v32 = vmul.f32 0.0078125, %v1436_v1 }
 0x254   :  { %v1586_v13 = vmax.f32 %v1554_v18, 0.0  ;;  %v4180_v31 = vmul.f32 0.0078125, %v1310_v8 }
 0x255   :  { %v1555_v57 = vsub.f32 %v1491_v32, %v1523_v16 }
 0x256   :  { %v1618_v22 = vadd.f32 1e-12, %v1586_v13  ;;  %v1312_v43 = vpop.xlane.xlu0 %1311  ;;  %v1524_v20 = vmul.f32 %v4180_v31, %v4180_v31  ;;  %v4745_v13 = vld [vmem:[#allocation19_spill] sm:$0xff] }
 0x257   :  { %v1587_v50 = vmax.f32 %v1555_v57, 0.0  ;;  %v1438_v39 = vpop.xlane.xlu1 %1437  ;;  %v4182_v47 = vmul.f32 0.0078125, %v1312_v43  ;;  %v1682_v57 = vsub.f32 %v4745_v13, %v4168_v21 }
 0x258   :  { %2978 = vrsqrt.f32 %v1618_v22  ;;  %v1492_v38 = vmul.f32 0.0078125, %v1438_v39 }
 0x259   :  { %v1619_v48 = vadd.f32 1e-12, %v1587_v50  ;;  %v1525_v55 = vmul.f32 %v4182_v47, %v4182_v47 }
 0x25a   :  { %v2975_v2 = vpop.eup %2974  ;;  %v1556_v27 = vsub.f32 %v1492_v38, %v1524_v20  ;;  %v1440_v44 = vpop.xlane.xlu0 %1439 }
 0x25b   :  { %2980 = vrsqrt.f32 %v1619_v48  ;;  %v1314_v3 = vpop.xlane.xlu1 %1313  ;;  %v1493_v17 = vmul.f32 0.0078125, %v1440_v44  ;;  %v1712_v61 = vmul.f32 %v2975_v2, %v1680_v12 }
 0x25c   :  { %v1588_v63 = vmax.f32 %v1556_v27, 0.0  ;;  %v4193_v41 = vmul.f32 0.0078125, %v1314_v3  ;;  %v4746_v27 = vld [vmem:[#allocation16_spill] sm:$0xff] }
 0x25d   :  { %v2977_v42 = vpop.eup %2976  ;;  %v1557_v6 = vsub.f32 %v1493_v17, %v1525_v55  ;;  %v1748_v9 = vmul.f32 %v4138_v60, %v1712_v61  ;;  %v1683_v44 = vsub.f32 %v4746_v27, %v4172_v34 }
 0x25e   :  { %v1620_v18 = vadd.f32 1e-12, %v1588_v63  ;;  %v1316_v1 = vpop.xlane.xlu0 %1315  ;;  %v1713_v24 = vmul.f32 %v2977_v42, %v1681_v0  ;;  %v1526_v62 = vmul.f32 %v4193_v41, %v4193_v41 }
 0x25f   :  { %v1589_v16 = vmax.f32 %v1557_v6, 0.0  ;;  %v1442_v8 = vpop.xlane.xlu1 %1441  ;;  %v4196_v32 = vmul.f32 0.0078125, %v1316_v1  ;;  %v1784_v45 = vadd.f32 %v4147_v35, %v1748_v9 }
 0x260   :  { %2982 = vrsqrt.f32 %v1620_v18  ;;  %v1494_v30 = vmul.f32 0.0078125, %v1442_v8  ;;  %v1749_v20 = vmul.f32 %v4138_v60, %v1713_v24 }
 0x261   :  { %v1621_v22 = vadd.f32 1e-12, %v1589_v16  ;;  %v1813_v43 = vpack.c.bf16 %v1784_v45, %v1783_v53  ;;  %v1527_v38 = vmul.f32 %v4196_v32, %v4196_v32  ;;  %v4747_v16 = vld [vmem:[#allocation36_spill] sm:$0xff] }
 0x262   :  { %v2979_v26 = vpop.eup %2978  ;;  %v1558_v50 = vsub.f32 %v1494_v30, %v1526_v62  ;;  %v1444_v39 = vpop.xlane.xlu0 %1443  ;;  %v1785_v34 = vadd.f32 %v4147_v35, %v1749_v20  ;;  %v1684_v8 = vsub.f32 %v4747_v16, %v4180_v31 }
 0x263   :  { %2984 = vrsqrt.f32 %v1621_v22  ;;  %v1318_v12 = vpop.xlane.xlu1 %1317  ;;  %2126 = vmatmul.mubr.bf16.gmra.mrb[24].mxu1 %v1813_v43  ;;  %2319 = vmatmul.mubr.bf16.gmra.mrb[24].mxu0 %v1813_v43  ;;  %v1495_v48 = vmul.f32 0.0078125, %v1444_v39  ;;  %v1714_v2 = vmul.f32 %v2979_v26, %v1682_v57  ;;  %v1685_v39 = vsub.f32 %v3822_v5, %v4182_v47 }
 0x264   :  { %v1590_v21 = vmax.f32 %v1558_v50, 0.0  ;;  %v4209_v4 = vmul.f32 0.0078125, %v1318_v12  ;;  %2135 = vmatprep.mubr.bf16.mxu1 %v3130_v59  ;;  %2328 = vmatprep.mubr.bf16.mxu0 %v3130_v59 }
 0x265   :  { %v2981_v55 = vpop.eup %2980  ;;  %v1559_v3 = vsub.f32 %v1495_v48, %v1527_v38  ;;  %v1750_v17 = vmul.f32 %v4138_v60, %v1714_v2 }
 0x266   :  { %v1622_v61 = vadd.f32 1e-12, %v1590_v21  ;;  %v1320_v0 = vpop.xlane.xlu0 %1319  ;;  %v1715_v63 = vmul.f32 %v2981_v55, %v1683_v44  ;;  %v1528_v1 = vmul.f32 %v4209_v4, %v4209_v4 }
 0x267   :  { %v1591_v42 = vmax.f32 %v1559_v3, 0.0  ;;  %v1446_v6 = vpop.xlane.xlu1 %1445  ;;  %v4214_v9 = vmul.f32 0.0078125, %v1320_v0  ;;  %v1786_v18 = vadd.f32 %v4147_v35, %v1750_v17  ;;  %v1686_v0 = vsub.f32 %v3841_v11, %v4193_v41 }
 0x268   :  { %2986 = vrsqrt.f32 %v1622_v61  ;;  %v1496_v24 = vmul.f32 0.0078125, %v1446_v6  ;;  %v1751_v57 = vmul.f32 %v4138_v60, %v1715_v63 }
 0x269   :  { %v1623_v53 = vadd.f32 1e-12, %v1591_v42  ;;  %v1814_v45 = vpack.c.bf16 %v1786_v18, %v1785_v34  ;;  %v1529_v22 = vmul.f32 %v4214_v9, %v4214_v9 }
 0x26a   :  { %v2983_v62 = vpop.eup %2982  ;;  %v1560_v30 = vsub.f32 %v1496_v24, %v1528_v1  ;;  %v1448_v13 = vpop.xlane.xlu0 %1447  ;;  %v1787_v5 = vadd.f32 %v4147_v35, %v1751_v57 }
 0x26b   :  { %2988 = vrsqrt.f32 %v1623_v53  ;;  %v1322_v43 = vpop.xlane.xlu1 %1321  ;;  %2136 = vmatmul.mubr.bf16.gmra.mrb[28].mxu1 %v1814_v45  ;;  %2329 = vmatmul.mubr.bf16.gmra.mrb[28].mxu0 %v1814_v45  ;;  %v1497_v26 = vmul.f32 0.0078125, %v1448_v13  ;;  %v1716_v50 = vmul.f32 %v2983_v62, %v1684_v8  ;;  %v1687_v45 = vsub.f32 %v3856_v40, %v4196_v32 }
 0x26c   :  { %v1592_v31 = vmax.f32 %v1560_v30, 0.0  ;;  %v4227_v20 = vmul.f32 0.0078125, %v1322_v43  ;;  %2145 = vmatprep.mubr.bf16.mxu1 %v3130_v59  ;;  %2338 = vmatprep.mubr.bf16.mxu0 %v3130_v59 }
 0x26d   :  { %v2985_v38 = vpop.eup %2984  ;;  %v1561_v12 = vsub.f32 %v1497_v26, %v1529_v22  ;;  %v1752_v48 = vmul.f32 %v4138_v60, %v1716_v50 }
 0x26e   :  { %v1624_v2 = vadd.f32 1e-12, %v1592_v31  ;;  %v1324_v27 = vpop.xlane.xlu0 %1323  ;;  %v1717_v44 = vmul.f32 %v2985_v38, %v1685_v39  ;;  %v1530_v17 = vmul.f32 %v4227_v20, %v4227_v20 }
 0x26f   :  { %v1593_v21 = vmax.f32 %v1561_v12, 0.0  ;;  %v1450_v55 = vpop.xlane.xlu1 %1449  ;;  %v4232_v3 = vmul.f32 0.0078125, %v1324_v27  ;;  %v1788_v47 = vadd.f32 %v4147_v35, %v1752_v48  ;;  %v1688_v12 = vsub.f32 %v3902_v19, %v4209_v4 }
 0x270   :  { %2990 = vrsqrt.f32 %v1624_v2  ;;  %v1498_v61 = vmul.f32 0.0078125, %v1450_v55  ;;  %v1753_v1 = vmul.f32 %v4138_v60, %v1717_v44 }
 0x271   :  { %v1625_v63 = vadd.f32 1e-12, %v1593_v21  ;;  %v1815_v42 = vpack.c.bf16 %v1788_v47, %v1787_v5  ;;  %v1531_v24 = vmul.f32 %v4232_v3, %v4232_v3 }
 0x272   :  { %v2987_v6 = vpop.eup %2986  ;;  %v1562_v34 = vsub.f32 %v1498_v61, %v1530_v17  ;;  %v1452_v18 = vpop.xlane.xlu0 %1451  ;;  %v1789_v40 = vadd.f32 %v4147_v35, %v1753_v1 }
 0x273   :  { %2992 = vrsqrt.f32 %v1625_v63  ;;  %v1326_v16 = vpop.xlane.xlu1 %1325  ;;  %2146 = vmatmul.mubr.bf16.gmra.mrb[32].mxu1 %v1815_v42  ;;  %2339 = vmatmul.mubr.bf16.gmra.mrb[32].mxu0 %v1815_v42  ;;  %v1499_v8 = vmul.f32 0.0078125, %v1452_v18  ;;  %v1718_v53 = vmul.f32 %v2987_v6, %v1686_v0  ;;  %v1689_v0 = vsub.f32 %v3912_v33, %v4214_v9 }
 0x274   :  { %v1594_v11 = vmax.f32 %v1562_v34, 0.0  ;;  %v4245_v41 = vmul.f32 0.0078125, %v1326_v16  ;;  %2155 = vmatprep.mubr.bf16.mxu1 %v3130_v59  ;;  %2348 = vmatprep.mubr.bf16.mxu0 %v3130_v59 }
 0x275   :  { %v2989_v62 = vpop.eup %2988  ;;  %v1563_v30 = vsub.f32 %v1499_v8, %v1531_v24  ;;  %v1754_v13 = vmul.f32 %v4138_v60, %v1718_v53 }
 0x276   :  { %v1626_v57 = vadd.f32 1e-12, %v1594_v11  ;;  %v1328_v22 = vpop.xlane.xlu0 %1327  ;;  %v1719_v43 = vmul.f32 %v2989_v62, %v1687_v45  ;;  %v1532_v31 = vmul.f32 %v4245_v41, %v4245_v41  ;;  %v1690_v11 = vsub.f32 %v3922_v58, %v4227_v20 }
 0x277   :  { %v1595_v26 = vmax.f32 %v1563_v30, 0.0  ;;  %v1454_v50 = vpop.xlane.xlu1 %1453  ;;  %v4250_v39 = vmul.f32 0.0078125, %v1328_v22  ;;  %v1790_v32 = vadd.f32 %v4147_v35, %v1754_v13 }
 0x278   :  { %2994 = vrsqrt.f32 %v1626_v57  ;;  %v1500_v38 = vmul.f32 0.0078125, %v1454_v50  ;;  %v1755_v55 = vmul.f32 %v4138_v60, %v1719_v43 }
 0x279   :  { %v1627_v48 = vadd.f32 1e-12, %v1595_v26  ;;  %v1816_v2 = vpack.c.bf16 %v1790_v32, %v1789_v40  ;;  %v1533_v5 = vmul.f32 %v4250_v39, %v4250_v39 }
 0x27a   :  { %v2991_v27 = vpop.eup %2990  ;;  %v1564_v44 = vsub.f32 %v1500_v38, %v1532_v31  ;;  %v1456_v21 = vpop.xlane.xlu0 %1455  ;;  %v1791_v33 = vadd.f32 %v4147_v35, %v1755_v55  ;;  %v1691_v31 = vsub.f32 %v3925_v25, %v4232_v3 }
 0x27b   :  { %2996 = vrsqrt.f32 %v1627_v48  ;;  %v1330_v47 = vpop.xlane.xlu1 %1329  ;;  %2156 = vmatmul.mubr.bf16.gmra.mrb[36].mxu1 %v1816_v2  ;;  %2349 = vmatmul.mubr.bf16.gmra.mrb[36].mxu0 %v1816_v2  ;;  %v1501_v17 = vmul.f32 0.0078125, %v1456_v21  ;;  %v1720_v61 = vmul.f32 %v2991_v27, %v1688_v12 }
 0x27c   :  { %v1596_v19 = vmax.f32 %v1564_v44, 0.0  ;;  %v4263_v4 = vmul.f32 0.0078125, %v1330_v47  ;;  %2165 = vmatprep.mubr.bf16.mxu1 %v3130_v59  ;;  %2358 = vmatprep.mubr.bf16.mxu0 %v3130_v59 }
 0x27d   :  { %v2993_v63 = vpop.eup %2992  ;;  %v1565_v42 = vsub.f32 %v1501_v17, %v1533_v5  ;;  %v1756_v6 = vmul.f32 %v4138_v60, %v1720_v61  ;;  %v1692_v61 = vsub.f32 %v3939_v15, %v4245_v41 }
 0x27e   :  { %v1628_v34 = vadd.f32 1e-12, %v1596_v19  ;;  %v1721_v1 = vmul.f32 %v2993_v63, %v1689_v0  ;;  %v1534_v53 = vmul.f32 %v4263_v4, %v4263_v4 }
 0x27f   :  { %v1597_v24 = vmax.f32 %v1565_v42, 0.0  ;;  %v1458_v16 = vpop.xlane.xlu1 %1457  ;;  %v1792_v9 = vadd.f32 %v4147_v35, %v1756_v6 }
 0x280   :  { %v1332_v18 = vpop.xlane.xlu0 %1331  ;;  %2998 = vrsqrt.f32 %v1628_v34  ;;  %v1502_v45 = vmul.f32 0.0078125, %v1458_v16  ;;  %v1757_v43 = vmul.f32 %v4138_v60, %v1721_v1 }
 0x281   :  { %v4268_v8 = vmul.f32 0.0078125, %v1332_v18  ;;  %v1629_v62 = vadd.f32 1e-12, %v1597_v24  ;;  %v1817_v30 = vpack.c.bf16 %v1792_v9, %v1791_v33  ;;  %v1693_v33 = vsub.f32 %v3949_v29, %v4250_v39 }
 0x282   :  { %v2995_v13 = vpop.eup %2994  ;;  %v1566_v57 = vsub.f32 %v1502_v45, %v1534_v53  ;;  %v1793_v25 = vadd.f32 %v4147_v35, %v1757_v43 }
 0x283   :  { %3000 = vrsqrt.f32 %v1629_v62  ;;  %v1535_v26 = vmul.f32 %v4268_v8, %v4268_v8  ;;  %2166 = vmatmul.mubr.bf16.gmra.mrb[40].mxu1 %v1817_v30  ;;  %2359 = vmatmul.mubr.bf16.gmra.mrb[40].mxu0 %v1817_v30  ;;  %v1722_v32 = vmul.f32 %v2995_v13, %v1690_v11 }
 0x284   :  { %v1460_v22 = vpop.xlane.xlu0 %1459  ;;  %v1334_v50 = vpop.xlane.xlu1 %1333  ;;  %v1598_v58 = vmax.f32 %v1566_v57, 0.0  ;;  %2175 = vmatprep.mubr.bf16.mxu1 %v3130_v59  ;;  %2368 = vmatprep.mubr.bf16.mxu0 %v3130_v59 }
 0x285   :  { %v1503_v40 = vmul.f32 0.0078125, %v1460_v22  ;;  %v4281_v20 = vmul.f32 0.0078125, %v1334_v50  ;;  %v2997_v38 = vpop.eup %2996  ;;  %v1758_v48 = vmul.f32 %v4138_v60, %v1722_v32  ;;  %v1694_v50 = vsub.f32 %v3970_v46, %v4263_v4 }
 0x286   :  { %v1630_v2 = vadd.f32 1e-12, %v1598_v58  ;;  %v1723_v44 = vmul.f32 %v2997_v38, %v1691_v31 }
 0x287   :  { %v1567_v12 = vsub.f32 %v1503_v40, %v1535_v26  ;;  %v1794_v3 = vadd.f32 %v4147_v35, %v1758_v48  ;;  %v1536_v47 = vmul.f32 %v4281_v20, %v4281_v20 }
 0x288   :  { %v1336_v27 = vpop.xlane.xlu0 %1335  ;;  %v1462_v55 = vpop.xlane.xlu1 %1461  ;;  %3002 = vrsqrt.f32 %v1630_v2  ;;  %v1759_v34 = vmul.f32 %v4138_v60, %v1723_v44 }
 0x289   :  { %v1599_v21 = vmax.f32 %v1567_v12, 0.0  ;;  %v4286_v5 = vmul.f32 0.0078125, %v1336_v27  ;;  %v1504_v17 = vmul.f32 0.0078125, %v1462_v55  ;;  %v1818_v19 = vpack.c.bf16 %v1794_v3, %v1793_v25 }
 0x28a   :  { %v2999_v63 = vpop.eup %2998  ;;  %v1795_v29 = vadd.f32 %v4147_v35, %v1759_v34  ;;  %v1696_v34 = vsub.f32 %v4031_v14, %v4281_v20 }
 0x28b   :  { %v1631_v0 = vadd.f32 1e-12, %v1599_v21  ;;  %v1568_v42 = vsub.f32 %v1504_v17, %v1536_v47  ;;  %v1537_v18 = vmul.f32 %v4286_v5, %v4286_v5  ;;  %2176 = vmatmul.mubr.bf16.gmra.mrb[44].mxu1 %v1818_v19  ;;  %2369 = vmatmul.mubr.bf16.gmra.mrb[44].mxu0 %v1818_v19  ;;  %v1724_v16 = vmul.f32 %v2999_v63, %v1692_v61 }
 0x28c   :  { %v1464_v6 = vpop.xlane.xlu0 %1463  ;;  %v1338_v1 = vpop.xlane.xlu1 %1337  ;;  %2185 = vmatprep.mubr.bf16.mxu1 %v3130_v59  ;;  %2378 = vmatprep.mubr.bf16.mxu0 %v3130_v59  ;;  %v1695_v21 = vsub.f32 %v4013_v23, %v4268_v8 }
 0x28d   :  { %3004 = vrsqrt.f32 %v1631_v0  ;;  %v1505_v24 = vmul.f32 0.0078125, %v1464_v6  ;;  %v1600_v15 = vmax.f32 %v1568_v42, 0.0  ;;  %v4299_v41 = vmul.f32 0.0078125, %v1338_v1  ;;  %v3001_v9 = vpop.eup %3000 }
 0x28e   :  { %v1760_v45 = vmul.f32 %v4138_v60, %v1724_v16  ;;  %v1725_v30 = vmul.f32 %v3001_v9, %v1693_v33 }
 0x28f   :  { %v1569_v53 = vsub.f32 %v1505_v24, %v1537_v18  ;;  %v1632_v11 = vadd.f32 1e-12, %v1600_v15  ;;  %v1538_v43 = vmul.f32 %v4299_v41, %v4299_v41 }
 0x290   :  { %v1340_v62 = vpop.xlane.xlu0 %1339  ;;  %v1466_v57 = vpop.xlane.xlu1 %1465  ;;  %v1796_v39 = vadd.f32 %v4147_v35, %v1760_v45  ;;  %v1761_v12 = vmul.f32 %v4138_v60, %v1725_v30 }
 0x291   :  { %v1601_v13 = vmax.f32 %v1569_v53, 0.0  ;;  %v4304_v22 = vmul.f32 0.0078125, %v1340_v62  ;;  %3006 = vrsqrt.f32 %v1632_v11  ;;  %v1506_v26 = vmul.f32 0.0078125, %v1466_v57 }
 0x292   :  { %v1819_v32 = vpack.c.bf16 %v1796_v39, %v1795_v29  ;;  %v3003_v31 = vpop.eup %3002  ;;  %v1797_v23 = vadd.f32 %v4147_v35, %v1761_v12  ;;  %v1697_v62 = vsub.f32 %v4042_v7, %v4286_v5 }
 0x293   :  { %v1633_v40 = vadd.f32 1e-12, %v1601_v13  ;;  %v1570_v58 = vsub.f32 %v1506_v26, %v1538_v43  ;;  %v1539_v48 = vmul.f32 %v4304_v22, %v4304_v22  ;;  %v1726_v44 = vmul.f32 %v3003_v31, %v1694_v50 }
 0x294   :  { %v1468_v38 = vpop.xlane.xlu0 %1467  ;;  %v1342_v2 = vpop.xlane.xlu1 %1341  ;;  %2186 = vmatmul.mubr.bf16.gmra.mrb[48].mxu1 %v1819_v32  ;;  %2379 = vmatmul.mubr.bf16.gmra.mrb[48].mxu0 %v1819_v32 }
 0x295   :  { %3008 = vrsqrt.f32 %v1633_v40  ;;  %v1507_v27 = vmul.f32 0.0078125, %v1468_v38  ;;  %v1602_v46 = vmax.f32 %v1570_v58, 0.0  ;;  %v4317_v4 = vmul.f32 0.0078125, %v1342_v2  ;;  %2195 = vmatprep.mubr.bf16.mxu1 %v3130_v59  ;;  %2388 = vmatprep.mubr.bf16.mxu0 %v3130_v59 }
 0x296   :  { %v1762_v3 = vmul.f32 %v4138_v60, %v1726_v44  ;;  %v1698_v58 = vsub.f32 %v4059_v56, %v4299_v41 }
 0x297   :  { %v3005_v55 = vpop.eup %3004  ;;  %v1571_v25 = vsub.f32 %v1507_v27, %v1539_v48  ;;  %v1634_v47 = vadd.f32 1e-12, %v1602_v46  ;;  %v1540_v42 = vmul.f32 %v4317_v4, %v4317_v4 }
 0x298   :  { %v1344_v17 = vpop.xlane.xlu0 %1343  ;;  %v1727_v61 = vmul.f32 %v3005_v55, %v1695_v21  ;;  %v1470_v19 = vpop.xlane.xlu1 %1469  ;;  %v1798_v8 = vadd.f32 %v4147_v35, %v1762_v3  ;;  %v1699_v3 = vsub.f32 %v4067_v36, %v4304_v22 }
 0x299   :  { %v1603_v0 = vmax.f32 %v1571_v25, 0.0  ;;  %v4322_v63 = vmul.f32 0.0078125, %v1344_v17  ;;  %3010 = vrsqrt.f32 %v1634_v47  ;;  %v1508_v6 = vmul.f32 0.0078125, %v1470_v19 }
 0x29a   :  { %v1820_v1 = vpack.c.bf16 %v1798_v8, %v1797_v23  ;;  %v1763_v15 = vmul.f32 %v4138_v60, %v1727_v61 }
 0x29b   :  { %v1635_v18 = vadd.f32 1e-12, %v1603_v0  ;;  %v3007_v24 = vpop.eup %3006  ;;  %v1572_v16 = vsub.f32 %v1508_v6, %v1540_v42  ;;  %v1541_v9 = vmul.f32 %v4322_v63, %v4322_v63 }
 0x29c   :  { %v1472_v33 = vpop.xlane.xlu0 %1471  ;;  %v1346_v53 = vpop.xlane.xlu1 %1345  ;;  %2196 = vmatmul.mubr.bf16.gmra.mrb[52].mxu1 %v1820_v1  ;;  %2389 = vmatmul.mubr.bf16.gmra.mrb[52].mxu0 %v1820_v1  ;;  %v1728_v11 = vmul.f32 %v3007_v24, %v1696_v34  ;;  %v1799_v7 = vadd.f32 %v4147_v35, %v1763_v15  ;;  %v1700_v1 = vsub.f32 %v4083_v28, %v4317_v4 }
 0x29d   :  { %3012 = vrsqrt.f32 %v1635_v18  ;;  %v1509_v45 = vmul.f32 0.0078125, %v1472_v33  ;;  %v1604_v14 = vmax.f32 %v1572_v16, 0.0  ;;  %v4335_v20 = vmul.f32 0.0078125, %v1346_v53  ;;  %2205 = vmatprep.mubr.bf16.mxu1 %v3130_v59  ;;  %2398 = vmatprep.mubr.bf16.mxu0 %v3130_v59 }
 0x29e   :  { %v1764_v57 = vmul.f32 %v4138_v60, %v1728_v11  ;;  %v1701_v4 = vsub.f32 %v4089_v49, %v4322_v63 }
 0x29f   :  { %v3009_v30 = vpop.eup %3008  ;;  %v1573_v13 = vsub.f32 %v1509_v45, %v1541_v9  ;;  %v1636_v29 = vadd.f32 1e-12, %v1604_v14  ;;  %v1542_v32 = vmul.f32 %v4335_v20, %v4335_v20 }
 0x2a0   :  { %v1348_v39 = vpop.xlane.xlu0 %1347  ;;  %v1729_v43 = vmul.f32 %v3009_v30, %v1697_v62  ;;  %v1474_v50 = vpop.xlane.xlu1 %1473  ;;  %v1800_v5 = vadd.f32 %v4147_v35, %v1764_v57 }
 0x2a1   :  { %v1605_v26 = vmax.f32 %v1573_v13, 0.0  ;;  %v4340_v40 = vmul.f32 0.0078125, %v1348_v39  ;;  %3014 = vrsqrt.f32 %v1636_v29  ;;  %v1510_v31 = vmul.f32 0.0078125, %v1474_v50 }
 0x2a2   :  { %v1821_v12 = vpack.c.bf16 %v1800_v5, %v1799_v7  ;;  %v1765_v44 = vmul.f32 %v4138_v60, %v1729_v43 }
 0x2a3   :  { %v1637_v38 = vadd.f32 1e-12, %v1605_v26  ;;  %v3011_v48 = vpop.eup %3010  ;;  %v1574_v2 = vsub.f32 %v1510_v31, %v1542_v32  ;;  %v1543_v21 = vmul.f32 %v4340_v40, %v4340_v40 }
 0x2a4   :  { %v1476_v27 = vpop.xlane.xlu0 %1475  ;;  %v1350_v46 = vpop.xlane.xlu1 %1349  ;;  %2206 = vmatmul.mubr.bf16.gmra.mrb[56].mxu1 %v1821_v12  ;;  %2399 = vmatmul.mubr.bf16.gmra.mrb[56].mxu0 %v1821_v12  ;;  %v1730_v25 = vmul.f32 %v3011_v48, %v1698_v58  ;;  %v1801_v36 = vadd.f32 %v4147_v35, %v1765_v44  ;;  %v1702_v58 = vsub.f32 %v4102_v37, %v4335_v20 }
 0x2a5   :  { %3016 = vrsqrt.f32 %v1637_v38  ;;  %v1511_v55 = vmul.f32 0.0078125, %v1476_v27  ;;  %v1606_v56 = vmax.f32 %v1574_v2, 0.0  ;;  %v4353_v41 = vmul.f32 0.0078125, %v1350_v46  ;;  %2215 = vmatprep.mubr.bf16.mxu1 %v3130_v59  ;;  %2408 = vmatprep.mubr.bf16.mxu0 %v3130_v59 }
 0x2a6   :  { %v1766_v61 = vmul.f32 %v4138_v60, %v1730_v25 }
 0x2a7   :  { %v3013_v47 = vpop.eup %3012  ;;  %v1575_v17 = vsub.f32 %v1511_v55, %v1543_v21  ;;  %v1638_v0 = vadd.f32 1e-12, %v1606_v56  ;;  %v1544_v34 = vmul.f32 %v4353_v41, %v4353_v41  ;;  %v1703_v21 = vsub.f32 %v4106_v54, %v4340_v40 }
 0x2a8   :  { %v1352_v19 = vpop.xlane.xlu0 %1351  ;;  %v1731_v23 = vmul.f32 %v3013_v47, %v1699_v3  ;;  %v1478_v42 = vpop.xlane.xlu1 %1477  ;;  %v1802_v22 = vadd.f32 %v4147_v35, %v1766_v61  ;;  %v1704_v3 = vsub.f32 %v4116_v51, %v4353_v41 }
 0x2a9   :  { %v1607_v8 = vmax.f32 %v1575_v17, 0.0  ;;  %v4358_v6 = vmul.f32 0.0078125, %v1352_v19  ;;  %3018 = vrsqrt.f32 %v1638_v0  ;;  %v1512_v18 = vmul.f32 0.0078125, %v1478_v42 }
 0x2aa   :  { %v1822_v16 = vpack.c.bf16 %v1802_v22, %v1801_v36  ;;  %v1767_v53 = vmul.f32 %v4138_v60, %v1731_v23 }
 0x2ab   :  { %v1639_v24 = vadd.f32 1e-12, %v1607_v8  ;;  %v3015_v33 = vpop.eup %3014  ;;  %v1576_v15 = vsub.f32 %v1512_v18, %v1544_v34  ;;  %v1545_v45 = vmul.f32 %v4358_v6, %v4358_v6  ;;  %v1705_v40 = vsub.f32 %v4119_v10, %v4358_v6 }
 0x2ac   :  { %v1480_v9 = vpop.xlane.xlu0 %1479  ;;  %v1354_v11 = vpop.xlane.xlu1 %1353  ;;  %2216 = vmatmul.mubr.bf16.gmra.mrb[60].mxu1 %v1822_v16  ;;  %2409 = vmatmul.mubr.bf16.gmra.mrb[60].mxu0 %v1822_v16  ;;  %v1732_v14 = vmul.f32 %v3015_v33, %v1700_v1  ;;  %v1803_v50 = vadd.f32 %v4147_v35, %v1767_v53  ;;  %v1891_v33 = vld [vmem:[%s4558_s4] sm:$0xf]  ;;  %s3131_s4 = smov [#allocation9]  }
 0x2ad   :  { %3020 = vrsqrt.f32 %v1639_v24  ;;  %v1513_v62 = vmul.f32 0.0078125, %v1480_v9  ;;  %v1608_v30 = vmax.f32 %v1576_v15, 0.0  ;;  %v1386_v13 = vmul.f32 0.0078125, %v1354_v11  ;;  %2225 = vmatprep.mubr.bf16.mxu1 %v3130_v59  ;;  %2418 = vmatprep.mubr.bf16.mxu0 %v3130_v59  ;;  %s2592_s12 = sshll.u32 %s3131_s4, 4  ;;  %s2593_s12 = int_to_ptr.vmem [resolvable:$true] %s2592_s12 }
 0x2ae   :  { %v1768_v29 = vmul.f32 %v4138_v60, %v1732_v14  ;;  %s3094_s13 = scalar_lea.vmem %s2593_s12, 16384  ;;  %p3099_p11 = scmp.lt.s32.totalorder %s2593_s12, %s2593_s12 }
 0x2af   :  { %v3017_v28 = vpop.eup %3016  ;;  %v1577_v57 = vsub.f32 %v1513_v62, %v1545_v45  ;;  %v1640_v39 = vadd.f32 1e-12, %v1608_v30  ;;  %v1546_v32 = vmul.f32 %v1386_v13, %v1386_v13  ;;  %v1706_v23 = vsub.f32 %v4127_v52, %v1386_v13  ;;  %p3095_p10 = scmp.ne.s32.totalorder %s2593_s12, %s3094_s13  ;;  %p3100_p12 = scmp.lt.s32.totalorder %s3094_s13, %s3094_s13 }
 0x2b0   :  { %v1482_v26 = vpop.xlane.xlu1 %1481  ;;  %v1804_v7 = vadd.f32 %v4147_v35, %v1768_v29  ;;  %v1733_v5 = vmul.f32 %v3017_v28, %v1701_v4  ;;  %v1893_v52 = vlaneseq }
 0x2b1   :  { %v1609_v43 = vmax.f32 %v1577_v57, 0.0  ;;  %3022 = vrsqrt.f32 %v1640_v39  ;;  %v1514_v31 = vmul.f32 0.0078125, %v1482_v26  ;;  %p3101_p13 = por %p3100_p12, %p3099_p11 }
 0x2b2   :  { %v1823_v12 = vpack.c.bf16 %v1804_v7, %v1803_v50  ;;  %v1769_v2 = vmul.f32 %v4138_v60, %v1733_v5  ;;  %v1894_v1 = vshrl.u32 %v1893_v52, 7 }
 0x2b3   :  { %v1641_v38 = vadd.f32 1e-12, %v1609_v43  ;;  %v3019_v49 = vpop.eup %3018  ;;  %v1578_v63 = vsub.f32 %v1514_v31, %v1546_v32  ;;  %p3102_p0 = pnand %p3101_p13, %p3095_p10 }
 0x2b4   :  { %2226 = vmatmul.mubr.bf16.gmra.mrb[64].mxu1 %v1823_v12  ;;  %2419 = vmatmul.mubr.bf16.gmra.mrb[64].mxu0 %v1823_v12  ;;  %v1734_v48 = vmul.f32 %v3019_v49, %v1702_v58  ;;  %v1805_v46 = vadd.f32 %v4147_v35, %v1769_v2  ;;  %v1895_v24 = vsub.s32 0, %v1894_v1  ;;  %v1903_v16 = vsub.s32 2, %v1894_v1 }
 0x2b5   :  { %3024 = vrsqrt.f32 %v1641_v38  ;;  %v1610_v27 = vmax.f32 %v1578_v63, 0.0  ;;  %2235 = vmatprep.mubr.bf16.mxu1 %v3130_v59  ;;  %2428 = vmatprep.mubr.bf16.mxu0 %v3130_v59  ;;  %v1899_v15 = vsub.s32 1, %v1894_v1  ;;  %v1907_v9 = vsub.s32 3, %v1894_v1 }
 0x2b6   :  { %v1770_v37 = vmul.f32 %v4138_v60, %v1734_v48 }
 0x2b7   :  { %v3021_v44 = vpop.eup %3020  ;;  %v1642_v20 = vadd.f32 1e-12, %v1610_v27  ;;  %v4410_v53 = vrot.slane %v1891_v33, %v1899_v15 }
 0x2b8   :  { %v1806_v55 = vadd.f32 %v4147_v35, %v1770_v37  ;;  %v1735_v25 = vmul.f32 %v3021_v44, %v1703_v21 }
 0x2b9   :  { %3026 = vrsqrt.f32 %v1642_v20 }
 0x2ba   :  { %v1824_v56 = vpack.c.bf16 %v1806_v55, %v1805_v46  ;;  %v1771_v61 = vmul.f32 %v4138_v60, %v1735_v25 }
 0x2bb   :  { %v3023_v47 = vpop.eup %3022 }
 0x2bc   :  { %2236 = vmatmul.mubr.bf16.gmra.mrb[68].mxu1 %v1824_v56  ;;  %2429 = vmatmul.mubr.bf16.gmra.mrb[68].mxu0 %v1824_v56  ;;  %v1736_v17 = vmul.f32 %v3023_v47, %v1704_v3  ;;  %v1807_v19 = vadd.f32 %v4147_v35, %v1771_v61 }
 0x2bd   :  { %2245 = vmatprep.mubr.bf16.mxu1 %v3130_v59  ;;  %2438 = vmatprep.mubr.bf16.mxu0 %v3130_v59 }
 0x2be   :  { %v1772_v0 = vmul.f32 %v4138_v60, %v1736_v17 }
 0x2bf   :  { %v3025_v54 = vpop.eup %3024 }
 0x2c0   :  { %v1808_v51 = vadd.f32 %v4147_v35, %v1772_v0  ;;  %v1737_v41 = vmul.f32 %v3025_v54, %v1705_v40 }
 0x2c2   :  { %v1825_v8 = vpack.c.bf16 %v1808_v51, %v1807_v19  ;;  %v1773_v22 = vmul.f32 %v4138_v60, %v1737_v41 }
 0x2c3   :  { %v3027_v42 = vpop.eup %3026 }
 0x2c4   :  { %2246 = vmatmul.mubr.bf16.gmra.mrb[72].mxu1 %v1825_v8  ;;  %2439 = vmatmul.mubr.bf16.gmra.mrb[72].mxu0 %v1825_v8  ;;  %v1738_v36 = vmul.f32 %v3027_v42, %v1706_v23  ;;  %v1809_v6 = vadd.f32 %v4147_v35, %v1773_v22 }
 0x2c5   :  { %2255 = vmatprep.mubr.bf16.mxu1 %v3130_v59  ;;  %2448 = vmatprep.mubr.bf16.mxu0 %v3130_v59  ;;  %v4406_v59 = vrot.slane %v1891_v33, %v1895_v24 }
 0x2c6   :  { %v1774_v10 = vmul.f32 %v4138_v60, %v1738_v36  ;;  %v4408_v60 = vrot.slane %v1891_v33, %v1903_v16 }
 0x2c8   :  { %v1810_v34 = vadd.f32 %v4147_v35, %v1774_v10  ;;  %v4412_v35 = vrot.slane %v1891_v33, %v1907_v9 }
 0x2ca   :  { %v1826_v18 = vpack.c.bf16 %v1810_v34, %v1809_v6 }
 0x2cc   :  { %2256 = vmatmul.mubr.bf16.gmra.mrb[76].mxu1 %v1826_v18  ;;  %2449 = vmatmul.mubr.bf16.gmra.mrb[76].mxu0 %v1826_v18 }
 0x316   :  { %v2107_v45 = vpop.f32.mrb[16].mxu1  ;;  %v2300_v11 = vpop.f32.mrb[16].mxu0 }
 0x317   :  { %v2108_v62 = vadd.f32 %v2107_v45, %v4406_v59  ;;  %v2301_v14 = vadd.f32 %v2300_v11, %v4408_v60  ;;  %v2109_v30 = vpop.f32.mrb[17].mxu1  ;;  %v2302_v13 = vpop.f32.mrb[17].mxu0 }
 0x318   :  { %v2110_v28 = vadd.f32 %v2109_v30, %v4410_v53  ;;  %v2303_v4 = vadd.f32 %v2302_v13, %v4412_v35  ;;  %v2111_v57 = vpop.f32.mrb[18].mxu1  ;;  %v2304_v29 = vpop.f32.mrb[18].mxu0 }
 0x319   :  { %2459 = vst [vmem:[#allocation9] sm:$0xff] %v2108_v62  ;;  %2461 = vst [vmem:[#allocation9 + $0x10] sm:$0xff] %v2301_v14  ;;  %v2112_v39 = vadd.f32 %v2111_v57, %v4406_v59  ;;  %v2305_v43 = vadd.f32 %v2304_v29, %v4408_v60  ;;  %v2113_v26 = vpop.f32.mrb[19].mxu1  ;;  %v2306_v50 = vpop.f32.mrb[19].mxu0 }
 0x31a   :  { %2460 = vst [vmem:[#allocation9 + $0x8] sm:$0xff] %v2110_v28  ;;  %2462 = vst [vmem:[#allocation9 + $0x18] sm:$0xff] %v2303_v4  ;;  %v2114_v7 = vadd.f32 %v2113_v26, %v4410_v53  ;;  %v2307_v5 = vadd.f32 %v2306_v50, %v4412_v35 }
 0x31b   :  { %2463 = vst [vmem:[#allocation9 + $0x20] sm:$0xff] %v2112_v39  ;;  %2465 = vst [vmem:[#allocation9 + $0x30] sm:$0xff] %v2305_v43 }
 0x31c   :  { %2464 = vst [vmem:[#allocation9 + $0x28] sm:$0xff] %v2114_v7  ;;  %2466 = vst [vmem:[#allocation9 + $0x38] sm:$0xff] %v2307_v5 }
 0x31e   :  { %v2117_v32 = vpop.f32.mrb[20].mxu1  ;;  %v2310_v31 = vpop.f32.mrb[20].mxu0 }
 0x31f   :  { %v2118_v58 = vadd.f32 %v2117_v32, %v4406_v59  ;;  %v2311_v38 = vadd.f32 %v2310_v31, %v4408_v60  ;;  %v2119_v12 = vpop.f32.mrb[21].mxu1  ;;  %v2312_v49 = vpop.f32.mrb[21].mxu0 }
 0x320   :  { %v2120_v63 = vadd.f32 %v2119_v12, %v4410_v53  ;;  %v2313_v48 = vadd.f32 %v2312_v49, %v4412_v35  ;;  %v2121_v2 = vpop.f32.mrb[22].mxu1  ;;  %v2314_v27 = vpop.f32.mrb[22].mxu0 }
 0x321   :  { %2467 = vst [vmem:[#allocation9 + $0x40] sm:$0xff] %v2118_v58  ;;  %2469 = vst [vmem:[#allocation9 + $0x50] sm:$0xff] %v2311_v38  ;;  %v2122_v44 = vadd.f32 %v2121_v2, %v4406_v59  ;;  %v2315_v21 = vadd.f32 %v2314_v27, %v4408_v60  ;;  %v2123_v37 = vpop.f32.mrb[23].mxu1  ;;  %v2316_v20 = vpop.f32.mrb[23].mxu0 }
 0x322   :  { %2468 = vst [vmem:[#allocation9 + $0x48] sm:$0xff] %v2120_v63  ;;  %2470 = vst [vmem:[#allocation9 + $0x58] sm:$0xff] %v2313_v48  ;;  %v2124_v46 = vadd.f32 %v2123_v37, %v4410_v53  ;;  %v2317_v55 = vadd.f32 %v2316_v20, %v4412_v35 }
 0x323   :  { %2471 = vst [vmem:[#allocation9 + $0x60] sm:$0xff] %v2122_v44  ;;  %2473 = vst [vmem:[#allocation9 + $0x70] sm:$0xff] %v2315_v21 }
 0x324   :  { %2472 = vst [vmem:[#allocation9 + $0x68] sm:$0xff] %v2124_v46  ;;  %2474 = vst [vmem:[#allocation9 + $0x78] sm:$0xff] %v2317_v55 }
 0x336   :  { %v2127_v25 = vpop.f32.mrb[24].mxu1  ;;  %v2320_v3 = vpop.f32.mrb[24].mxu0 }
 0x337   :  { %v2128_v56 = vadd.f32 %v2127_v25, %v4406_v59  ;;  %v2321_v47 = vadd.f32 %v2320_v3, %v4408_v60  ;;  %v2129_v17 = vpop.f32.mrb[25].mxu1  ;;  %v2322_v61 = vpop.f32.mrb[25].mxu0 }
 0x338   :  { %v2130_v54 = vadd.f32 %v2129_v17, %v4410_v53  ;;  %v2323_v40 = vadd.f32 %v2322_v61, %v4412_v35  ;;  %v2131_v0 = vpop.f32.mrb[26].mxu1  ;;  %v2324_v19 = vpop.f32.mrb[26].mxu0 }
 0x339   :  { %2475 = vst [vmem:[#allocation9 + $0x80] sm:$0xff] %v2128_v56  ;;  %2477 = vst [vmem:[#allocation9 + $0x90] sm:$0xff] %v2321_v47  ;;  %v2132_v51 = vadd.f32 %v2131_v0, %v4406_v59  ;;  %v2325_v41 = vadd.f32 %v2324_v19, %v4408_v60  ;;  %v2133_v23 = vpop.f32.mrb[27].mxu1  ;;  %v2326_v8 = vpop.f32.mrb[27].mxu0 }
 0x33a   :  { %2476 = vst [vmem:[#allocation9 + $0x88] sm:$0xff] %v2130_v54  ;;  %2478 = vst [vmem:[#allocation9 + $0x98] sm:$0xff] %v2323_v40  ;;  %v2134_v42 = vadd.f32 %v2133_v23, %v4410_v53  ;;  %v2327_v36 = vadd.f32 %v2326_v8, %v4412_v35 }
 0x33b   :  { %2479 = vst [vmem:[#allocation9 + $0xa0] sm:$0xff] %v2132_v51  ;;  %2481 = vst [vmem:[#allocation9 + $0xb0] sm:$0xff] %v2325_v41 }
 0x33c   :  { %2480 = vst [vmem:[#allocation9 + $0xa8] sm:$0xff] %v2134_v42  ;;  %2482 = vst [vmem:[#allocation9 + $0xb8] sm:$0xff] %v2327_v36 }
 0x33e   :  { %v2137_v22 = vpop.f32.mrb[28].mxu1  ;;  %v2330_v10 = vpop.f32.mrb[28].mxu0 }
 0x33f   :  { %v2138_v6 = vadd.f32 %v2137_v22, %v4406_v59  ;;  %v2331_v34 = vadd.f32 %v2330_v10, %v4408_v60  ;;  %v2139_v18 = vpop.f32.mrb[29].mxu1  ;;  %v2332_v52 = vpop.f32.mrb[29].mxu0 }
 0x340   :  { %v2140_v1 = vadd.f32 %v2139_v18, %v4410_v53  ;;  %v2333_v24 = vadd.f32 %v2332_v52, %v4412_v35  ;;  %v2141_v16 = vpop.f32.mrb[30].mxu1  ;;  %v2334_v33 = vpop.f32.mrb[30].mxu0 }
 0x341   :  { %2483 = vst [vmem:[#allocation9 + $0xc0] sm:$0xff] %v2138_v6  ;;  %2485 = vst [vmem:[#allocation9 + $0xd0] sm:$0xff] %v2331_v34  ;;  %v2142_v15 = vadd.f32 %v2141_v16, %v4406_v59  ;;  %v2335_v9 = vadd.f32 %v2334_v33, %v4408_v60  ;;  %v2143_v45 = vpop.f32.mrb[31].mxu1  ;;  %v2336_v11 = vpop.f32.mrb[31].mxu0 }
 0x342   :  { %2484 = vst [vmem:[#allocation9 + $0xc8] sm:$0xff] %v2140_v1  ;;  %2486 = vst [vmem:[#allocation9 + $0xd8] sm:$0xff] %v2333_v24  ;;  %v2144_v62 = vadd.f32 %v2143_v45, %v4410_v53  ;;  %v2337_v14 = vadd.f32 %v2336_v11, %v4412_v35 }
 0x343   :  { %2487 = vst [vmem:[#allocation9 + $0xe0] sm:$0xff] %v2142_v15  ;;  %2489 = vst [vmem:[#allocation9 + $0xf0] sm:$0xff] %v2335_v9 }
 0x344   :  { %2488 = vst [vmem:[#allocation9 + $0xe8] sm:$0xff] %v2144_v62  ;;  %2490 = vst [vmem:[#allocation9 + $0xf8] sm:$0xff] %v2337_v14 }
 0x346   :  { %v2147_v30 = vpop.f32.mrb[32].mxu1  ;;  %v2340_v13 = vpop.f32.mrb[32].mxu0 }
 0x347   :  { %v2148_v28 = vadd.f32 %v2147_v30, %v4406_v59  ;;  %v2341_v4 = vadd.f32 %v2340_v13, %v4408_v60  ;;  %v2149_v57 = vpop.f32.mrb[33].mxu1  ;;  %v2342_v29 = vpop.f32.mrb[33].mxu0 }
 0x348   :  { %v2150_v39 = vadd.f32 %v2149_v57, %v4410_v53  ;;  %v2343_v43 = vadd.f32 %v2342_v29, %v4412_v35  ;;  %v2151_v26 = vpop.f32.mrb[34].mxu1  ;;  %v2344_v50 = vpop.f32.mrb[34].mxu0 }
 0x349   :  { %2491 = vst [vmem:[#allocation9 + $0x100] sm:$0xff] %v2148_v28  ;;  %2493 = vst [vmem:[#allocation9 + $0x110] sm:$0xff] %v2341_v4  ;;  %v2152_v7 = vadd.f32 %v2151_v26, %v4406_v59  ;;  %v2345_v5 = vadd.f32 %v2344_v50, %v4408_v60  ;;  %v2153_v32 = vpop.f32.mrb[35].mxu1  ;;  %v2346_v31 = vpop.f32.mrb[35].mxu0 }
 0x34a   :  { %2492 = vst [vmem:[#allocation9 + $0x108] sm:$0xff] %v2150_v39  ;;  %2494 = vst [vmem:[#allocation9 + $0x118] sm:$0xff] %v2343_v43  ;;  %v2154_v58 = vadd.f32 %v2153_v32, %v4410_v53  ;;  %v2347_v38 = vadd.f32 %v2346_v31, %v4412_v35 }
 0x34b   :  { %2495 = vst [vmem:[#allocation9 + $0x120] sm:$0xff] %v2152_v7  ;;  %2497 = vst [vmem:[#allocation9 + $0x130] sm:$0xff] %v2345_v5 }
 0x34c   :  { %2496 = vst [vmem:[#allocation9 + $0x128] sm:$0xff] %v2154_v58  ;;  %2498 = vst [vmem:[#allocation9 + $0x138] sm:$0xff] %v2347_v38 }
 0x34e   :  { %v2157_v12 = vpop.f32.mrb[36].mxu1  ;;  %v2350_v49 = vpop.f32.mrb[36].mxu0 }
 0x34f   :  { %v2158_v63 = vadd.f32 %v2157_v12, %v4406_v59  ;;  %v2351_v48 = vadd.f32 %v2350_v49, %v4408_v60  ;;  %v2159_v2 = vpop.f32.mrb[37].mxu1  ;;  %v2352_v27 = vpop.f32.mrb[37].mxu0 }
 0x350   :  { %v2160_v44 = vadd.f32 %v2159_v2, %v4410_v53  ;;  %v2353_v21 = vadd.f32 %v2352_v27, %v4412_v35  ;;  %v2161_v37 = vpop.f32.mrb[38].mxu1  ;;  %v2354_v20 = vpop.f32.mrb[38].mxu0 }
 0x351   :  { %2499 = vst [vmem:[#allocation9 + $0x140] sm:$0xff] %v2158_v63  ;;  %2501 = vst [vmem:[#allocation9 + $0x150] sm:$0xff] %v2351_v48  ;;  %v2162_v46 = vadd.f32 %v2161_v37, %v4406_v59  ;;  %v2355_v55 = vadd.f32 %v2354_v20, %v4408_v60  ;;  %v2163_v25 = vpop.f32.mrb[39].mxu1  ;;  %v2356_v3 = vpop.f32.mrb[39].mxu0 }
 0x352   :  { %2500 = vst [vmem:[#allocation9 + $0x148] sm:$0xff] %v2160_v44  ;;  %2502 = vst [vmem:[#allocation9 + $0x158] sm:$0xff] %v2353_v21  ;;  %v2164_v56 = vadd.f32 %v2163_v25, %v4410_v53  ;;  %v2357_v47 = vadd.f32 %v2356_v3, %v4412_v35 }
 0x353   :  { %2503 = vst [vmem:[#allocation9 + $0x160] sm:$0xff] %v2162_v46  ;;  %2505 = vst [vmem:[#allocation9 + $0x170] sm:$0xff] %v2355_v55 }
 0x354   :  { %2504 = vst [vmem:[#allocation9 + $0x168] sm:$0xff] %v2164_v56  ;;  %2506 = vst [vmem:[#allocation9 + $0x178] sm:$0xff] %v2357_v47 }
 0x356   :  { %v2167_v17 = vpop.f32.mrb[40].mxu1  ;;  %v2360_v61 = vpop.f32.mrb[40].mxu0 }
 0x357   :  { %v2168_v54 = vadd.f32 %v2167_v17, %v4406_v59  ;;  %v2361_v40 = vadd.f32 %v2360_v61, %v4408_v60  ;;  %v2169_v0 = vpop.f32.mrb[41].mxu1  ;;  %v2362_v19 = vpop.f32.mrb[41].mxu0 }
 0x358   :  { %v2170_v51 = vadd.f32 %v2169_v0, %v4410_v53  ;;  %v2363_v41 = vadd.f32 %v2362_v19, %v4412_v35  ;;  %v2171_v23 = vpop.f32.mrb[42].mxu1  ;;  %v2364_v8 = vpop.f32.mrb[42].mxu0 }
 0x359   :  { %2507 = vst [vmem:[#allocation9 + $0x180] sm:$0xff] %v2168_v54  ;;  %2509 = vst [vmem:[#allocation9 + $0x190] sm:$0xff] %v2361_v40  ;;  %v2172_v42 = vadd.f32 %v2171_v23, %v4406_v59  ;;  %v2365_v36 = vadd.f32 %v2364_v8, %v4408_v60  ;;  %v2173_v22 = vpop.f32.mrb[43].mxu1  ;;  %v2366_v10 = vpop.f32.mrb[43].mxu0 }
 0x35a   :  { %2508 = vst [vmem:[#allocation9 + $0x188] sm:$0xff] %v2170_v51  ;;  %2510 = vst [vmem:[#allocation9 + $0x198] sm:$0xff] %v2363_v41  ;;  %v2174_v6 = vadd.f32 %v2173_v22, %v4410_v53  ;;  %v2367_v34 = vadd.f32 %v2366_v10, %v4412_v35 }
 0x35b   :  { %2511 = vst [vmem:[#allocation9 + $0x1a0] sm:$0xff] %v2172_v42  ;;  %2513 = vst [vmem:[#allocation9 + $0x1b0] sm:$0xff] %v2365_v36 }
 0x35c   :  { %2512 = vst [vmem:[#allocation9 + $0x1a8] sm:$0xff] %v2174_v6  ;;  %2514 = vst [vmem:[#allocation9 + $0x1b8] sm:$0xff] %v2367_v34 }
 0x35e   :  { %v2177_v18 = vpop.f32.mrb[44].mxu1  ;;  %v2370_v52 = vpop.f32.mrb[44].mxu0 }
 0x35f   :  { %v2178_v1 = vadd.f32 %v2177_v18, %v4406_v59  ;;  %v2371_v24 = vadd.f32 %v2370_v52, %v4408_v60  ;;  %v2179_v16 = vpop.f32.mrb[45].mxu1  ;;  %v2372_v33 = vpop.f32.mrb[45].mxu0 }
 0x360   :  { %v2180_v15 = vadd.f32 %v2179_v16, %v4410_v53  ;;  %v2373_v9 = vadd.f32 %v2372_v33, %v4412_v35  ;;  %v2181_v45 = vpop.f32.mrb[46].mxu1  ;;  %v2374_v11 = vpop.f32.mrb[46].mxu0 }
 0x361   :  { %2515 = vst [vmem:[#allocation9 + $0x1c0] sm:$0xff] %v2178_v1  ;;  %2517 = vst [vmem:[#allocation9 + $0x1d0] sm:$0xff] %v2371_v24  ;;  %v2182_v62 = vadd.f32 %v2181_v45, %v4406_v59  ;;  %v2375_v14 = vadd.f32 %v2374_v11, %v4408_v60  ;;  %v2183_v30 = vpop.f32.mrb[47].mxu1  ;;  %v2376_v13 = vpop.f32.mrb[47].mxu0 }
 0x362   :  { %2516 = vst [vmem:[#allocation9 + $0x1c8] sm:$0xff] %v2180_v15  ;;  %2518 = vst [vmem:[#allocation9 + $0x1d8] sm:$0xff] %v2373_v9  ;;  %v2184_v28 = vadd.f32 %v2183_v30, %v4410_v53  ;;  %v2377_v4 = vadd.f32 %v2376_v13, %v4412_v35 }
 0x363   :  { %2519 = vst [vmem:[#allocation9 + $0x1e0] sm:$0xff] %v2182_v62  ;;  %2521 = vst [vmem:[#allocation9 + $0x1f0] sm:$0xff] %v2375_v14 }
 0x364   :  { %2520 = vst [vmem:[#allocation9 + $0x1e8] sm:$0xff] %v2184_v28  ;;  %2522 = vst [vmem:[#allocation9 + $0x1f8] sm:$0xff] %v2377_v4 }
 0x367   :  { %v2187_v57 = vpop.f32.mrb[48].mxu1  ;;  %v2380_v29 = vpop.f32.mrb[48].mxu0 }
 0x368   :  { %v2188_v39 = vadd.f32 %v2187_v57, %v4406_v59  ;;  %v2381_v43 = vadd.f32 %v2380_v29, %v4408_v60  ;;  %v2189_v26 = vpop.f32.mrb[49].mxu1  ;;  %v2382_v50 = vpop.f32.mrb[49].mxu0 }
 0x369   :  { %v2190_v7 = vadd.f32 %v2189_v26, %v4410_v53  ;;  %v2383_v5 = vadd.f32 %v2382_v50, %v4412_v35  ;;  %v2191_v32 = vpop.f32.mrb[50].mxu1  ;;  %v2384_v31 = vpop.f32.mrb[50].mxu0 }
 0x36a   :  { %2523 = vst [vmem:[#allocation9 + $0x200] sm:$0xff] %v2188_v39  ;;  %2525 = vst [vmem:[#allocation9 + $0x210] sm:$0xff] %v2381_v43  ;;  %v2192_v58 = vadd.f32 %v2191_v32, %v4406_v59  ;;  %v2385_v38 = vadd.f32 %v2384_v31, %v4408_v60  ;;  %v2193_v12 = vpop.f32.mrb[51].mxu1  ;;  %v2386_v49 = vpop.f32.mrb[51].mxu0 }
 0x36b   :  { %2524 = vst [vmem:[#allocation9 + $0x208] sm:$0xff] %v2190_v7  ;;  %2526 = vst [vmem:[#allocation9 + $0x218] sm:$0xff] %v2383_v5  ;;  %v2194_v63 = vadd.f32 %v2193_v12, %v4410_v53  ;;  %v2387_v48 = vadd.f32 %v2386_v49, %v4412_v35 }
 0x36c   :  { %2527 = vst [vmem:[#allocation9 + $0x220] sm:$0xff] %v2192_v58  ;;  %2529 = vst [vmem:[#allocation9 + $0x230] sm:$0xff] %v2385_v38 }
 0x36d   :  { %2528 = vst [vmem:[#allocation9 + $0x228] sm:$0xff] %v2194_v63  ;;  %2530 = vst [vmem:[#allocation9 + $0x238] sm:$0xff] %v2387_v48 }
 0x36f   :  { %v2197_v2 = vpop.f32.mrb[52].mxu1  ;;  %v2390_v27 = vpop.f32.mrb[52].mxu0 }
 0x370   :  { %v2198_v44 = vadd.f32 %v2197_v2, %v4406_v59  ;;  %v2391_v21 = vadd.f32 %v2390_v27, %v4408_v60  ;;  %v2199_v37 = vpop.f32.mrb[53].mxu1  ;;  %v2392_v20 = vpop.f32.mrb[53].mxu0 }
 0x371   :  { %v2200_v46 = vadd.f32 %v2199_v37, %v4410_v53  ;;  %v2393_v55 = vadd.f32 %v2392_v20, %v4412_v35  ;;  %v2201_v25 = vpop.f32.mrb[54].mxu1  ;;  %v2394_v3 = vpop.f32.mrb[54].mxu0 }
 0x372   :  { %2531 = vst [vmem:[#allocation9 + $0x240] sm:$0xff] %v2198_v44  ;;  %2533 = vst [vmem:[#allocation9 + $0x250] sm:$0xff] %v2391_v21  ;;  %v2202_v56 = vadd.f32 %v2201_v25, %v4406_v59  ;;  %v2395_v47 = vadd.f32 %v2394_v3, %v4408_v60  ;;  %v2203_v17 = vpop.f32.mrb[55].mxu1  ;;  %v2396_v61 = vpop.f32.mrb[55].mxu0 }
 0x373   :  { %2532 = vst [vmem:[#allocation9 + $0x248] sm:$0xff] %v2200_v46  ;;  %2534 = vst [vmem:[#allocation9 + $0x258] sm:$0xff] %v2393_v55  ;;  %v2204_v54 = vadd.f32 %v2203_v17, %v4410_v53  ;;  %v2397_v40 = vadd.f32 %v2396_v61, %v4412_v35 }
 0x374   :  { %2535 = vst [vmem:[#allocation9 + $0x260] sm:$0xff] %v2202_v56  ;;  %2537 = vst [vmem:[#allocation9 + $0x270] sm:$0xff] %v2395_v47 }
 0x375   :  { %2536 = vst [vmem:[#allocation9 + $0x268] sm:$0xff] %v2204_v54  ;;  %2538 = vst [vmem:[#allocation9 + $0x278] sm:$0xff] %v2397_v40 }
 0x377   :  { %v2207_v0 = vpop.f32.mrb[56].mxu1  ;;  %v2400_v19 = vpop.f32.mrb[56].mxu0 }
 0x378   :  { %v2208_v51 = vadd.f32 %v2207_v0, %v4406_v59  ;;  %v2401_v41 = vadd.f32 %v2400_v19, %v4408_v60  ;;  %v2209_v23 = vpop.f32.mrb[57].mxu1  ;;  %v2402_v8 = vpop.f32.mrb[57].mxu0 }
 0x379   :  { %v2210_v42 = vadd.f32 %v2209_v23, %v4410_v53  ;;  %v2403_v36 = vadd.f32 %v2402_v8, %v4412_v35  ;;  %v2211_v22 = vpop.f32.mrb[58].mxu1  ;;  %v2404_v10 = vpop.f32.mrb[58].mxu0 }
 0x37a   :  { %2539 = vst [vmem:[#allocation9 + $0x280] sm:$0xff] %v2208_v51  ;;  %2541 = vst [vmem:[#allocation9 + $0x290] sm:$0xff] %v2401_v41  ;;  %v2212_v6 = vadd.f32 %v2211_v22, %v4406_v59  ;;  %v2405_v34 = vadd.f32 %v2404_v10, %v4408_v60  ;;  %v2213_v18 = vpop.f32.mrb[59].mxu1  ;;  %v2406_v52 = vpop.f32.mrb[59].mxu0 }
 0x37b   :  { %2540 = vst [vmem:[#allocation9 + $0x288] sm:$0xff] %v2210_v42  ;;  %2542 = vst [vmem:[#allocation9 + $0x298] sm:$0xff] %v2403_v36  ;;  %v2214_v1 = vadd.f32 %v2213_v18, %v4410_v53  ;;  %v2407_v24 = vadd.f32 %v2406_v52, %v4412_v35 }
 0x37c   :  { %2543 = vst [vmem:[#allocation9 + $0x2a0] sm:$0xff] %v2212_v6  ;;  %2545 = vst [vmem:[#allocation9 + $0x2b0] sm:$0xff] %v2405_v34 }
 0x37d   :  { %2544 = vst [vmem:[#allocation9 + $0x2a8] sm:$0xff] %v2214_v1  ;;  %2546 = vst [vmem:[#allocation9 + $0x2b8] sm:$0xff] %v2407_v24 }
 0x37f   :  { %v2217_v16 = vpop.f32.mrb[60].mxu1  ;;  %v2410_v33 = vpop.f32.mrb[60].mxu0 }
 0x380   :  { %v2218_v15 = vadd.f32 %v2217_v16, %v4406_v59  ;;  %v2411_v9 = vadd.f32 %v2410_v33, %v4408_v60  ;;  %v2219_v45 = vpop.f32.mrb[61].mxu1  ;;  %v2412_v11 = vpop.f32.mrb[61].mxu0 }
 0x381   :  { %v2220_v62 = vadd.f32 %v2219_v45, %v4410_v53  ;;  %v2413_v14 = vadd.f32 %v2412_v11, %v4412_v35  ;;  %v2221_v30 = vpop.f32.mrb[62].mxu1  ;;  %v2414_v13 = vpop.f32.mrb[62].mxu0 }
 0x382   :  { %2547 = vst [vmem:[#allocation9 + $0x2c0] sm:$0xff] %v2218_v15  ;;  %2549 = vst [vmem:[#allocation9 + $0x2d0] sm:$0xff] %v2411_v9  ;;  %v2222_v28 = vadd.f32 %v2221_v30, %v4406_v59  ;;  %v2415_v4 = vadd.f32 %v2414_v13, %v4408_v60  ;;  %v2223_v57 = vpop.f32.mrb[63].mxu1  ;;  %v2416_v29 = vpop.f32.mrb[63].mxu0 }
 0x383   :  { %2548 = vst [vmem:[#allocation9 + $0x2c8] sm:$0xff] %v2220_v62  ;;  %2550 = vst [vmem:[#allocation9 + $0x2d8] sm:$0xff] %v2413_v14  ;;  %v2224_v39 = vadd.f32 %v2223_v57, %v4410_v53  ;;  %v2417_v43 = vadd.f32 %v2416_v29, %v4412_v35 }
 0x384   :  { %2551 = vst [vmem:[#allocation9 + $0x2e0] sm:$0xff] %v2222_v28  ;;  %2553 = vst [vmem:[#allocation9 + $0x2f0] sm:$0xff] %v2415_v4 }
 0x385   :  { %2552 = vst [vmem:[#allocation9 + $0x2e8] sm:$0xff] %v2224_v39  ;;  %2554 = vst [vmem:[#allocation9 + $0x2f8] sm:$0xff] %v2417_v43 }
 0x387   :  { %v2227_v26 = vpop.f32.mrb[64].mxu1  ;;  %v2420_v50 = vpop.f32.mrb[64].mxu0 }
 0x388   :  { %v2228_v7 = vadd.f32 %v2227_v26, %v4406_v59  ;;  %v2421_v5 = vadd.f32 %v2420_v50, %v4408_v60  ;;  %v2229_v32 = vpop.f32.mrb[65].mxu1  ;;  %v2422_v31 = vpop.f32.mrb[65].mxu0 }
 0x389   :  { %v2230_v58 = vadd.f32 %v2229_v32, %v4410_v53  ;;  %v2423_v38 = vadd.f32 %v2422_v31, %v4412_v35  ;;  %v2231_v12 = vpop.f32.mrb[66].mxu1  ;;  %v2424_v49 = vpop.f32.mrb[66].mxu0 }
 0x38a   :  { %2555 = vst [vmem:[#allocation9 + $0x300] sm:$0xff] %v2228_v7  ;;  %2557 = vst [vmem:[#allocation9 + $0x310] sm:$0xff] %v2421_v5  ;;  %v2232_v63 = vadd.f32 %v2231_v12, %v4406_v59  ;;  %v2425_v48 = vadd.f32 %v2424_v49, %v4408_v60  ;;  %v2233_v2 = vpop.f32.mrb[67].mxu1  ;;  %v2426_v27 = vpop.f32.mrb[67].mxu0 }
 0x38b   :  { %2556 = vst [vmem:[#allocation9 + $0x308] sm:$0xff] %v2230_v58  ;;  %2558 = vst [vmem:[#allocation9 + $0x318] sm:$0xff] %v2423_v38  ;;  %v2234_v44 = vadd.f32 %v2233_v2, %v4410_v53  ;;  %v2427_v21 = vadd.f32 %v2426_v27, %v4412_v35 }
 0x38c   :  { %2559 = vst [vmem:[#allocation9 + $0x320] sm:$0xff] %v2232_v63  ;;  %2561 = vst [vmem:[#allocation9 + $0x330] sm:$0xff] %v2425_v48 }
 0x38d   :  { %2560 = vst [vmem:[#allocation9 + $0x328] sm:$0xff] %v2234_v44  ;;  %2562 = vst [vmem:[#allocation9 + $0x338] sm:$0xff] %v2427_v21 }
 0x38f   :  { %v2237_v37 = vpop.f32.mrb[68].mxu1  ;;  %v2430_v20 = vpop.f32.mrb[68].mxu0 }
 0x390   :  { %v2238_v46 = vadd.f32 %v2237_v37, %v4406_v59  ;;  %v2431_v55 = vadd.f32 %v2430_v20, %v4408_v60  ;;  %v2239_v25 = vpop.f32.mrb[69].mxu1  ;;  %v2432_v3 = vpop.f32.mrb[69].mxu0 }
 0x391   :  { %v2240_v56 = vadd.f32 %v2239_v25, %v4410_v53  ;;  %v2433_v47 = vadd.f32 %v2432_v3, %v4412_v35  ;;  %v2241_v17 = vpop.f32.mrb[70].mxu1  ;;  %v2434_v61 = vpop.f32.mrb[70].mxu0 }
 0x392   :  { %2563 = vst [vmem:[#allocation9 + $0x340] sm:$0xff] %v2238_v46  ;;  %2565 = vst [vmem:[#allocation9 + $0x350] sm:$0xff] %v2431_v55  ;;  %v2242_v54 = vadd.f32 %v2241_v17, %v4406_v59  ;;  %v2435_v40 = vadd.f32 %v2434_v61, %v4408_v60  ;;  %v2243_v0 = vpop.f32.mrb[71].mxu1  ;;  %v2436_v19 = vpop.f32.mrb[71].mxu0 }
 0x393   :  { %2564 = vst [vmem:[#allocation9 + $0x348] sm:$0xff] %v2240_v56  ;;  %2566 = vst [vmem:[#allocation9 + $0x358] sm:$0xff] %v2433_v47  ;;  %v2244_v51 = vadd.f32 %v2243_v0, %v4410_v53  ;;  %v2437_v41 = vadd.f32 %v2436_v19, %v4412_v35 }
 0x394   :  { %2567 = vst [vmem:[#allocation9 + $0x360] sm:$0xff] %v2242_v54  ;;  %2569 = vst [vmem:[#allocation9 + $0x370] sm:$0xff] %v2435_v40 }
 0x395   :  { %2568 = vst [vmem:[#allocation9 + $0x368] sm:$0xff] %v2244_v51  ;;  %2570 = vst [vmem:[#allocation9 + $0x378] sm:$0xff] %v2437_v41 }
 0x397   :  { %v2247_v23 = vpop.f32.mrb[72].mxu1  ;;  %v2440_v8 = vpop.f32.mrb[72].mxu0 }
 0x398   :  { %v2248_v42 = vadd.f32 %v2247_v23, %v4406_v59  ;;  %v2441_v36 = vadd.f32 %v2440_v8, %v4408_v60  ;;  %v2249_v22 = vpop.f32.mrb[73].mxu1  ;;  %v2442_v10 = vpop.f32.mrb[73].mxu0 }
 0x399   :  { %v2250_v6 = vadd.f32 %v2249_v22, %v4410_v53  ;;  %v2443_v34 = vadd.f32 %v2442_v10, %v4412_v35  ;;  %v2251_v18 = vpop.f32.mrb[74].mxu1  ;;  %v2444_v52 = vpop.f32.mrb[74].mxu0 }
 0x39a   :  { %2571 = vst [vmem:[#allocation9 + $0x380] sm:$0xff] %v2248_v42  ;;  %2573 = vst [vmem:[#allocation9 + $0x390] sm:$0xff] %v2441_v36  ;;  %v2252_v1 = vadd.f32 %v2251_v18, %v4406_v59  ;;  %v2445_v24 = vadd.f32 %v2444_v52, %v4408_v60  ;;  %v2253_v16 = vpop.f32.mrb[75].mxu1  ;;  %v2446_v33 = vpop.f32.mrb[75].mxu0 }
 0x39b   :  { %2572 = vst [vmem:[#allocation9 + $0x388] sm:$0xff] %v2250_v6  ;;  %2574 = vst [vmem:[#allocation9 + $0x398] sm:$0xff] %v2443_v34  ;;  %v2254_v15 = vadd.f32 %v2253_v16, %v4410_v53  ;;  %v2447_v9 = vadd.f32 %v2446_v33, %v4412_v35 }
 0x39c   :  { %2575 = vst [vmem:[#allocation9 + $0x3a0] sm:$0xff] %v2252_v1  ;;  %2577 = vst [vmem:[#allocation9 + $0x3b0] sm:$0xff] %v2445_v24 }
 0x39d   :  { %2576 = vst [vmem:[#allocation9 + $0x3a8] sm:$0xff] %v2254_v15  ;;  %2578 = vst [vmem:[#allocation9 + $0x3b8] sm:$0xff] %v2447_v9 }
 0x39f   :  { %v2257_v45 = vpop.f32.mrb[76].mxu1  ;;  %v2450_v11 = vpop.f32.mrb[76].mxu0 }
 0x3a0   :  { %v2258_v62 = vadd.f32 %v2257_v45, %v4406_v59  ;;  %v2451_v14 = vadd.f32 %v2450_v11, %v4408_v60  ;;  %v2259_v30 = vpop.f32.mrb[77].mxu1  ;;  %v2452_v13 = vpop.f32.mrb[77].mxu0 }
 0x3a1   :  { %v2260_v28 = vadd.f32 %v2259_v30, %v4410_v53  ;;  %v2453_v4 = vadd.f32 %v2452_v13, %v4412_v35  ;;  %v2261_v57 = vpop.f32.mrb[78].mxu1  ;;  %v2454_v29 = vpop.f32.mrb[78].mxu0 }
 0x3a2   :  { %2579 = vst [vmem:[#allocation9 + $0x3c0] sm:$0xff] %v2258_v62  ;;  %2581 = vst [vmem:[#allocation9 + $0x3d0] sm:$0xff] %v2451_v14  ;;  %v2262_v39 = vadd.f32 %v2261_v57, %v4406_v59  ;;  %v2455_v43 = vadd.f32 %v2454_v29, %v4408_v60  ;;  %v2263_v26 = vpop.f32.mrb[79].mxu1  ;;  %v2456_v50 = vpop.f32.mrb[79].mxu0 }
 0x3a3   :  { %2580 = vst [vmem:[#allocation9 + $0x3c8] sm:$0xff] %v2260_v28  ;;  %2582 = vst [vmem:[#allocation9 + $0x3d8] sm:$0xff] %v2453_v4  ;;  %v2264_v7 = vadd.f32 %v2263_v26, %v4410_v53  ;;  %v2457_v5 = vadd.f32 %v2456_v50, %v4412_v35 }
 0x3a4   :  { %2583 = vst [vmem:[#allocation9 + $0x3e0] sm:$0xff] %v2262_v39  ;;  %2585 = vst [vmem:[#allocation9 + $0x3f0] sm:$0xff] %v2455_v43 }
 0x3a5   :  { %2584 = vst [vmem:[#allocation9 + $0x3e8] sm:$0xff] %v2264_v7  ;;  %2586 = vst [vmem:[#allocation9 + $0x3f8] sm:$0xff] %v2457_v5 }
 0x3a6   :  { %3105 = shalt.err (!%p3102_p0)
}
 0x3a7   :  { %s3106_s16 = scalar_lea.hbm %s4559_s5, 16384 }
 0x3a8   :  { %p3107_p1 = scmp.ne.s32.totalorder %s4559_s5, %s3106_s16  ;;  %p3110_p2 = scmp.lt.u32.totalorder %s3106_s16, %s4559_s5 }
 0x3aa   :  { %p3112_p3 = pnand %p3110_p2, %p3107_p1 }
 0x3ac   :  { %3115 = shalt.err (!%p3112_p3)
}
 0x3ad   :  { %s3132_s20 = smov 512   ;;  %s3133_s22 = smov 32  }
 0x3ae   :  { %2598 = dma.vmem_to_hbm [thread:$0]  %s2593_s12, 16384, %s4559_s5, [#allocation5], %s3132_s20, %s3132_s20, %s3133_s22  }
 0x3af   :  { %3120 = dma.done.wait [#allocation5], 16384  }
 0x3b0   :  { %3121 = vsyncadd [#allocation5], 4294950912 }
 0x3b1   :  { %2602 = vsyncpa [#allocation4], 1 }
 0x3b2   :  { %2603 = vsyncpa [#allocation7], 1 }
 0x3b3   :  { %2604 = vsyncpa [#allocation5], 1 }

</bundles_post_ra>
